<compile_context>
chip_gen: v5e
topology: v5e:2x2
jax: 0.10.0
libtpu: 0.0.40
codegen_flags: <defaults>
</compile_context>

<pallas_src>
import functools

import jax
import jax.numpy as jnp
from jax import lax
from jax.experimental import pallas as pl
from jax.experimental.pallas import tpu as pltpu

_LANE = 128
_SUBLANE = 8


def _round_up(x, m):
    return (x + m - 1) // m * m


# --------------------------- fused GRU + FC kernel ---------------------------
def _make_fused_kernel(num_layers, T, Bp, Hp, unroll):
    n_in = 1 + 4 * num_layers + 2  # x, per-layer (wih, whh, b_comb, b_hh_n), wfc, bfc

    def kernel(*refs):
        x_ref = refs[0]
        wfc_ref = refs[n_in - 2]
        bfc_ref = refs[n_in - 1]
        out_ref = refs[n_in]
        gi_sc, seq_buf = refs[n_in + 1:]

        h = None
        for l in range(num_layers):
            wih_ref, whh_ref, bcomb_ref, bhhn_ref = refs[1 + 4 * l:1 + 4 * l + 4]
            in_ref = x_ref if l == 0 else seq_buf
            write_seq = l < num_layers - 1  # last layer: only h_last is needed

            # (1) Hoisted input projection for ALL timesteps: one big bf16 MXU matmul
            #     with f32 accumulation.  b_comb = b_ih + b_hh for the r/z slabs and
            #     b_ih only for the n slab (b_hh_n is applied inside the loop).
            #     NOTE: this read fully consumes in_ref, so it is safe for the
            #     recurrence below to overwrite seq_buf (single-buffer scheme).
            gi_sc[...] = (
                jnp.dot(in_ref[...], wih_ref[...], preferred_element_type=jnp.float32)
                + bcomb_ref[...]
            )

            # Hoist the tiny bias broadcast out of the recurrent loop.
            bhh_n = jnp.broadcast_to(bhhn_ref[...], (Bp, Hp))

            def step(t, h_prev):
                off = pl.multiple_of(t * Bp, Bp)
                gi_t = gi_sc[pl.ds(off, Bp), :]                          # (Bp, 3Hp) f32
                # Recurrent matmul: bf16 x bf16 -> f32 accumulate on the MXU.
                gh = jnp.dot(h_prev.astype(jnp.bfloat16), whh_ref[...],
                             preferred_element_type=jnp.float32)         # (Bp, 3Hp)
                # Gate slabs are exactly Hp = k*128 lanes wide -> lane-aligned slices.
                r = jax.nn.sigmoid(gi_t[:, 0 * Hp:1 * Hp] + gh[:, 0 * Hp:1 * Hp])
                z = jax.nn.sigmoid(gi_t[:, 1 * Hp:2 * Hp] + gh[:, 1 * Hp:2 * Hp])
                n = jnp.tanh(gi_t[:, 2 * Hp:3 * Hp] + r * (gh[:, 2 * Hp:3 * Hp] + bhh_n))
                h_new = (1.0 - z) * n + z * h_prev
                if write_seq:
                    seq_buf[pl.ds(off, Bp), :] = h_new.astype(jnp.bfloat16)
                return h_new

            h = lax.fori_loop(0, T, step, jnp.zeros((Bp, Hp), jnp.float32),
                              unroll=unroll)

        # FC head fused into the same kernel (lane-dense (Bp, Cp) output).
        out_ref[...] = (
            jnp.dot(h.astype(jnp.bfloat16), wfc_ref[...],
                    preferred_element_type=jnp.float32)
            + bfc_ref[...]
        )

    return kernel


def _pick_vmem_limit_bytes(resident_bytes):
    """Generation-aware VMEM limit: resident set + headroom, capped by physical VMEM."""
    try:
        physical = int(pltpu.get_tpu_info().vmem_capacity_bytes)
    except Exception:
        physical = 64 * 1024 * 1024  # conservative (v7x) fallback
    cap = min(100 * 1024 * 1024, int(physical * 0.85))
    want = int(resident_bytes * 1.5) + 4 * 1024 * 1024
    return max(16 * 1024 * 1024, min(want, cap))


@functools.partial(jax.jit, static_argnames=("num_classes",))
def pose_scoring_forward(packed, x_btf, *, num_classes):
    """x_btf: (B, T, input_size) float32, batch_first like the PyTorch module."""
    B, T, F = x_btf.shape
    Fp = packed["gru"][0]["w_ih"].shape[0]
    Hp = packed["gru"][0]["w_hh"].shape[0]
    Cp = packed["fc"]["w"].shape[1]
    L = len(packed["gru"])
    Bp = _round_up(max(B, 1), _SUBLANE)

    # Pad batch->sublane multiple, feature->lane multiple; time-major, flattened
    # to (T*Bp, Fp) so per-timestep rows are contiguous, tile-aligned slices.
    x = x_btf.astype(jnp.float32)
    x = jnp.pad(x, ((0, Bp - B), (0, 0), (0, Fp - F)))
    x = jnp.transpose(x, (1, 0, 2)).reshape(T * Bp, Fp).astype(jnp.bfloat16)

    args = [x]
    for lp in packed["gru"]:
        args += [lp["w_ih"], lp["w_hh"], lp["b_comb"], lp["b_hh_n"]]
    args += [packed["fc"]["w"], packed["fc"]["b"]]

    vmem = pl.BlockSpec(memory_space=pltpu.MemorySpace.VMEM)
    unroll = True if T <= 16 else 4

    seq_rows = T * Bp if L > 1 else _SUBLANE  # dummy-sized when no inter-layer seq
    scratch_shapes = [
        pltpu.VMEM((T * Bp, 3 * Hp), jnp.float32),   # precomputed input gates (f32)
        pltpu.VMEM((seq_rows, Hp), jnp.bfloat16),    # single inter-layer seq buffer
    ]

    arg_bytes = sum(int(a.size) * a.dtype.itemsize for a in args)
    scratch_bytes = T * Bp * 3 * Hp * 4 + seq_rows * Hp * 2
    out_bytes = Bp * Cp * 4
    vmem_limit = _pick_vmem_limit_bytes(arg_bytes + scratch_bytes + out_bytes)

    flops = 0
    for l in range(L):
        d_in_p = Fp if l == 0 else Hp
        flops += 2 * T * Bp * d_in_p * 3 * Hp   # hoisted input projection
        flops += 2 * T * Bp * Hp * 3 * Hp       # recurrent matmuls
    flops += 2 * Bp * Hp * Cp                   # FC head
    transcendentals = L * T * Bp * 3 * Hp       # 2 sigmoids + 1 tanh per (t, b, h)
    bytes_accessed = arg_bytes + out_bytes

    kernel = _make_fused_kernel(L, T, Bp, Hp, unroll)
    out = pl.pallas_call(
        kernel,
        out_shape=jax.ShapeDtypeStruct((Bp, Cp), jnp.float32),
        in_specs=[vmem] * len(args),
        out_specs=vmem,
        scratch_shapes=scratch_shapes,
        compiler_params=pltpu.CompilerParams(vmem_limit_bytes=vmem_limit),
        cost_estimate=pl.CostEstimate(flops=flops,
                                      transcendentals=transcendentals,
                                      bytes_accessed=bytes_accessed),
    )(*args)
    return out[:B, :num_classes]


# --------------------------- params: init + packing --------------------------
def init_params(key, input_size, hidden_size, num_layers, num_classes):
    """Raw PyTorch-layout params, U(-1/sqrt(H), 1/sqrt(H)) like nn.GRU/nn.Linear."""
    bound = 1.0 / jnp.sqrt(jnp.float32(hidden_size))
    params = {"gru": []}
    for layer in range(num_layers):
        d_in = input_size if layer == 0 else hidden_size
        key, k1, k2, k3, k4 = jax.random.split(key, 5)
        params["gru"].append(dict(
            w_ih=jax.random.uniform(k1, (3 * hidden_size, d_in), jnp.float32, -bound, bound),
            w_hh=jax.random.uniform(k2, (3 * hidden_size, hidden_size), jnp.float32, -bound, bound),
            b_ih=jax.random.uniform(k3, (3 * hidden_size,), jnp.float32, -bound, bound),
            b_hh=jax.random.uniform(k4, (3 * hidden_size,), jnp.float32, -bound, bound),
        ))
    key, k5, k6 = jax.random.split(key, 3)
    params["fc"] = dict(
        w=jax.random.uniform(k5, (num_classes, hidden_size), jnp.float32, -bound, bound),
        b=jax.random.uniform(k6, (num_classes,), jnp.float32, -bound, bound),
    )
    return params


def pack_params(raw, input_size, hidden_size, num_classes):
    """Transpose + lane-pad weights (bf16) for the kernel; fuse r/z biases (f32)."""
    H = hidden_size
    Hp = _round_up(H, _LANE)
    Fp = _round_up(input_size, _LANE)
    Cp = _round_up(num_classes, _LANE)

    def pad_gate(w_gate, rows_pad):          # (H, d_in) -> (rows_pad, Hp), zero-padded
        wt = w_gate.T
        return jnp.pad(wt, ((0, rows_pad - wt.shape[0]), (0, Hp - wt.shape[1])))

    def pad_vec(v):
        return jnp.pad(v, (0, Hp - H))

    packed = {"gru": []}
    for l, lp in enumerate(raw["gru"]):
        d_in_p = Fp if l == 0 else Hp
        w_ih, w_hh, b_ih, b_hh = lp["w_ih"], lp["w_hh"], lp["b_ih"], lp["b_hh"]
        wih_p = jnp.concatenate(
            [pad_gate(w_ih[g * H:(g + 1) * H], d_in_p) for g in range(3)], axis=1)
        whh_p = jnp.concatenate(
            [pad_gate(w_hh[g * H:(g + 1) * H], Hp) for g in range(3)], axis=1)
        b_comb = jnp.concatenate([
            pad_vec(b_ih[0 * H:1 * H] + b_hh[0 * H:1 * H]),   # r: b_ir + b_hr
            pad_vec(b_ih[1 * H:2 * H] + b_hh[1 * H:2 * H]),   # z: b_iz + b_hz
            pad_vec(b_ih[2 * H:3 * H]),                       # n: b_in only
        ]).reshape(1, 3 * Hp)
        b_hh_n = pad_vec(b_hh[2 * H:3 * H]).reshape(1, Hp)
        packed["gru"].append(dict(
            w_ih=wih_p.astype(jnp.bfloat16),
            w_hh=whh_p.astype(jnp.bfloat16),
            b_comb=b_comb,            # f32
            b_hh_n=b_hh_n))           # f32

    wfc_p = jnp.pad(raw["fc"]["w"].T,
                    ((0, Hp - H), (0, Cp - num_classes))).astype(jnp.bfloat16)
    bfc_p = jnp.pad(raw["fc"]["b"], (0, Cp - num_classes)).reshape(1, Cp)
    packed["fc"] = dict(w=wfc_p, b=bfc_p)
    return packed


# ----------------------------- pure-JAX reference ----------------------------
def _reference_forward(raw, x_btf):
    x = jnp.transpose(x_btf, (1, 0, 2)).astype(jnp.float32)
    T, B, _ = x.shape
    inp = x
    for lp in raw["gru"]:
        H = lp["w_hh"].shape[1]
        h = jnp.zeros((B, H), jnp.float32)
        outs = []
        for t in range(T):
            gi = inp[t] @ lp["w_ih"].T + lp["b_ih"]
            gh = h @ lp["w_hh"].T + lp["b_hh"]
            r = jax.nn.sigmoid(gi[:, :H] + gh[:, :H])
            z = jax.nn.sigmoid(gi[:, H:2 * H] + gh[:, H:2 * H])
            n = jnp.tanh(gi[:, 2 * H:] + r * gh[:, 2 * H:])
            h = (1.0 - z) * n + z * h
            outs.append(h)
        inp = jnp.stack(outs, axis=0)
    return inp[-1] @ raw["fc"]["w"].T + raw["fc"]["b"]


if __name__ == "__main__":
    B, T = 2, 8
    input_size, hidden_size, num_layers, num_classes = 16, 32, 2, 4

    key = jax.random.PRNGKey(0)
    key, pkey, xkey = jax.random.split(key, 3)
    raw_params = init_params(pkey, input_size, hidden_size, num_layers, num_classes)
    packed_params = pack_params(raw_params, input_size, hidden_size, num_classes)
    x = jax.random.normal(xkey, (B, T, input_size), jnp.float32)

    out = pose_scoring_forward(packed_params, x, num_classes=num_classes)
    out = jax.block_until_ready(out)
    assert out.shape == (B, num_classes)

    ref = jax.block_until_ready(_reference_forward(raw_params, x))
    # bf16 matmul operands (f32 accumulation / gate math) -> relaxed tolerance.
    err = float(jnp.max(jnp.abs(out - ref)))
    assert err < 2e-2, f"mismatch vs JAX reference (max abs err {err})"

    print("KERNEL_OK")
</pallas_src>

<mosaic_0001>
module attributes {stable_mosaic.version = 11 : i64} {
  func.func @kernel(%arg0: memref<64x128xbf16, #tpu.memory_space<vmem>>, %arg1: memref<128x384xbf16, #tpu.memory_space<vmem>>, %arg2: memref<128x384xbf16, #tpu.memory_space<vmem>>, %arg3: memref<1x384xf32, #tpu.memory_space<vmem>>, %arg4: memref<1x128xf32, #tpu.memory_space<vmem>>, %arg5: memref<128x384xbf16, #tpu.memory_space<vmem>>, %arg6: memref<128x384xbf16, #tpu.memory_space<vmem>>, %arg7: memref<1x384xf32, #tpu.memory_space<vmem>>, %arg8: memref<1x128xf32, #tpu.memory_space<vmem>>, %arg9: memref<128x128xbf16, #tpu.memory_space<vmem>>, %arg10: memref<1x128xf32, #tpu.memory_space<vmem>>, %arg11: memref<8x128xf32, #tpu.memory_space<vmem>>, %arg12: memref<64x384xf32, #tpu.memory_space<vmem>>, %arg13: memref<64x128xbf16, #tpu.memory_space<vmem>>) attributes {dimension_semantics = [], scalar_prefetch = 0 : i64, scratch_operands = 2 : i64, tpu.core_type = #tpu.core_type<tc>} {
    %c0 = arith.constant 0 : index
    %c0_0 = arith.constant 0 : index
    %0 = vector.load %arg0[%c0, %c0_0] : memref<64x128xbf16, #tpu.memory_space<vmem>>, vector<64x128xbf16>
    %c0_1 = arith.constant 0 : index
    %c0_2 = arith.constant 0 : index
    %1 = vector.load %arg1[%c0_1, %c0_2] : memref<128x384xbf16, #tpu.memory_space<vmem>>, vector<128x384xbf16>
    %cst = arith.constant dense<0.000000e+00> : vector<64x384xf32>
    %2 = tpu.matmul %0, %1, %cst {dimension_numbers = #tpu.dot_dimension_numbers<[1], [0], [0], [1], [0, 0, 1, 1], [], []>} : vector<64x128xbf16>, vector<128x384xbf16>, vector<64x384xf32> -> vector<64x384xf32>
    %c0_3 = arith.constant 0 : index
    %c0_4 = arith.constant 0 : index
    %3 = vector.load %arg3[%c0_3, %c0_4] : memref<1x384xf32, #tpu.memory_space<vmem>>, vector<1x384xf32>
    %4 = vector.broadcast %3 : vector<1x384xf32> to vector<64x384xf32>
    %5 = arith.addf %2, %4 : vector<64x384xf32>
    %c0_5 = arith.constant 0 : index
    %c0_6 = arith.constant 0 : index
    %6 = vector.load %arg12[%c0_5, %c0_6] : memref<64x384xf32, #tpu.memory_space<vmem>>, vector<64x384xf32>
    tpu.vector_store %arg12[%c0_5, %c0_6], %5 {strides = array<i32>} : memref<64x384xf32, #tpu.memory_space<vmem>>, vector<64x384xf32>,
    %c0_7 = arith.constant 0 : index
    %c0_8 = arith.constant 0 : index
    %7 = vector.load %arg4[%c0_7, %c0_8] : memref<1x128xf32, #tpu.memory_space<vmem>>, vector<1x128xf32>
    %8 = vector.shape_cast %7 : vector<1x128xf32> to vector<1x128xf32>
    %9 = vector.broadcast %8 : vector<1x128xf32> to vector<8x128xf32>
    %cst_9 = arith.constant 0.000000e+00 : f32
    %10 = vector.broadcast %cst_9 : f32 to vector<8x128xf32>
    %c0_i32 = arith.constant 0 : i32
    %c8_i32 = arith.constant 8 : i32
    %11 = arith.muli %c0_i32, %c8_i32 : i32
    %12 = tpu.assume_multiple %11, 8 : i32
    %13 = arith.index_cast %12 : i32 to index
    %c0_10 = arith.constant 0 : index
    %14 = vector.load %arg12[%13, %c0_10] : memref<64x384xf32, #tpu.memory_space<vmem>>, vector<8x384xf32>
    %15 = arith.truncf %10 : vector<8x128xf32> to vector<8x128xbf16>
    %c0_11 = arith.constant 0 : index
    %c0_12 = arith.constant 0 : index
    %16 = vector.load %arg2[%c0_11, %c0_12] : memref<128x384xbf16, #tpu.memory_space<vmem>>, vector<128x384xbf16>
    %cst_13 = arith.constant dense<0.000000e+00> : vector<8x384xf32>
    %17 = tpu.matmul %15, %16, %cst_13 {dimension_numbers = #tpu.dot_dimension_numbers<[1], [0], [0], [1], [0, 0, 1, 1], [], []>} : vector<8x128xbf16>, vector<128x384xbf16>, vector<8x384xf32> -> vector<8x384xf32>
    %18 = vector.extract_strided_slice %14 {offsets = [0, 0], sizes = [8, 128], strides = [1, 1]} : vector<8x384xf32> to vector<8x128xf32>
    %19 = vector.extract_strided_slice %17 {offsets = [0, 0], sizes = [8, 128], strides = [1, 1]} : vector<8x384xf32> to vector<8x128xf32>
    %20 = arith.addf %18, %19 : vector<8x128xf32>
    %21 = arith.negf %20 : vector<8x128xf32>
    %22 = math.exp %21 : vector<8x128xf32>
    %cst_14 = arith.constant 1.000000e+00 : f32
    %23 = vector.broadcast %cst_14 : f32 to vector<8x128xf32>
    %24 = arith.addf %23, %22 : vector<8x128xf32>
    %25 = arith.divf %23, %24 : vector<8x128xf32>
    %26 = vector.extract_strided_slice %14 {offsets = [0, 128], sizes = [8, 128], strides = [1, 1]} : vector<8x384xf32> to vector<8x128xf32>
    %27 = vector.extract_strided_slice %17 {offsets = [0, 128], sizes = [8, 128], strides = [1, 1]} : vector<8x384xf32> to vector<8x128xf32>
    %28 = arith.addf %26, %27 : vector<8x128xf32>
    %29 = arith.negf %28 : vector<8x128xf32>
    %30 = math.exp %29 : vector<8x128xf32>
    %cst_15 = arith.constant 1.000000e+00 : f32
    %31 = vector.broadcast %cst_15 : f32 to vector<8x128xf32>
    %32 = arith.addf %31, %30 : vector<8x128xf32>
    %33 = arith.divf %31, %32 : vector<8x128xf32>
    %34 = vector.extract_strided_slice %14 {offsets = [0, 256], sizes = [8, 128], strides = [1, 1]} : vector<8x384xf32> to vector<8x128xf32>
    %35 = vector.extract_strided_slice %17 {offsets = [0, 256], sizes = [8, 128], strides = [1, 1]} : vector<8x384xf32> to vector<8x128xf32>
    %36 = arith.addf %35, %9 : vector<8x128xf32>
    %37 = arith.mulf %25, %36 : vector<8x128xf32>
    %38 = arith.addf %34, %37 : vector<8x128xf32>
    %39 = math.tanh %38 : vector<8x128xf32>
    %cst_16 = arith.constant 1.000000e+00 : f32
    %40 = vector.broadcast %cst_16 : f32 to vector<8x128xf32>
    %41 = arith.subf %40, %33 : vector<8x128xf32>
    %42 = arith.mulf %41, %39 : vector<8x128xf32>
    %43 = arith.mulf %33, %10 : vector<8x128xf32>
    %44 = arith.addf %42, %43 : vector<8x128xf32>
    %45 = arith.truncf %44 : vector<8x128xf32> to vector<8x128xbf16>
    %46 = arith.index_cast %12 : i32 to index
    %c0_17 = arith.constant 0 : index
    %47 = vector.load %arg13[%46, %c0_17] : memref<64x128xbf16, #tpu.memory_space<vmem>>, vector<8x128xbf16>
    tpu.vector_store %arg13[%46, %c0_17], %45 {strides = array<i32>} : memref<64x128xbf16, #tpu.memory_space<vmem>>, vector<8x128xbf16>,
    %c1_i32 = arith.constant 1 : i32
    %c8_i32_18 = arith.constant 8 : i32
    %48 = arith.muli %c1_i32, %c8_i32_18 : i32
    %49 = tpu.assume_multiple %48, 8 : i32
    %50 = arith.index_cast %49 : i32 to index
    %c0_19 = arith.constant 0 : index
    %51 = vector.load %arg12[%50, %c0_19] : memref<64x384xf32, #tpu.memory_space<vmem>>, vector<8x384xf32>
    %52 = arith.truncf %44 : vector<8x128xf32> to vector<8x128xbf16>
    %c0_20 = arith.constant 0 : index
    %c0_21 = arith.constant 0 : index
    %53 = vector.load %arg2[%c0_20, %c0_21] : memref<128x384xbf16, #tpu.memory_space<vmem>>, vector<128x384xbf16>
    %cst_22 = arith.constant dense<0.000000e+00> : vector<8x384xf32>
    %54 = tpu.matmul %52, %53, %cst_22 {dimension_numbers = #tpu.dot_dimension_numbers<[1], [0], [0], [1], [0, 0, 1, 1], [], []>} : vector<8x128xbf16>, vector<128x384xbf16>, vector<8x384xf32> -> vector<8x384xf32>
    %55 = vector.extract_strided_slice %51 {offsets = [0, 0], sizes = [8, 128], strides = [1, 1]} : vector<8x384xf32> to vector<8x128xf32>
    %56 = vector.extract_strided_slice %54 {offsets = [0, 0], sizes = [8, 128], strides = [1, 1]} : vector<8x384xf32> to vector<8x128xf32>
    %57 = arith.addf %55, %56 : vector<8x128xf32>
    %58 = arith.negf %57 : vector<8x128xf32>
    %59 = math.exp %58 : vector<8x128xf32>
    %cst_23 = arith.constant 1.000000e+00 : f32
    %60 = vector.broadcast %cst_23 : f32 to vector<8x128xf32>
    %61 = arith.addf %60, %59 : vector<8x128xf32>
    %62 = arith.divf %60, %61 : vector<8x128xf32>
    %63 = vector.extract_strided_slice %51 {offsets = [0, 128], sizes = [8, 128], strides = [1, 1]} : vector<8x384xf32> to vector<8x128xf32>
    %64 = vector.extract_strided_slice %54 {offsets = [0, 128], sizes = [8, 128], strides = [1, 1]} : vector<8x384xf32> to vector<8x128xf32>
    %65 = arith.addf %63, %64 : vector<8x128xf32>
    %66 = arith.negf %65 : vector<8x128xf32>
    %67 = math.exp %66 : vector<8x128xf32>
    %cst_24 = arith.constant 1.000000e+00 : f32
    %68 = vector.broadcast %cst_24 : f32 to vector<8x128xf32>
    %69 = arith.addf %68, %67 : vector<8x128xf32>
    %70 = arith.divf %68, %69 : vector<8x128xf32>
    %71 = vector.extract_strided_slice %51 {offsets = [0, 256], sizes = [8, 128], strides = [1, 1]} : vector<8x384xf32> to vector<8x128xf32>
    %72 = vector.extract_strided_slice %54 {offsets = [0, 256], sizes = [8, 128], strides = [1, 1]} : vector<8x384xf32> to vector<8x128xf32>
    %73 = arith.addf %72, %9 : vector<8x128xf32>
    %74 = arith.mulf %62, %73 : vector<8x128xf32>
    %75 = arith.addf %71, %74 : vector<8x128xf32>
    %76 = math.tanh %75 : vector<8x128xf32>
    %cst_25 = arith.constant 1.000000e+00 : f32
    %77 = vector.broadcast %cst_25 : f32 to vector<8x128xf32>
    %78 = arith.subf %77, %70 : vector<8x128xf32>
    %79 = arith.mulf %78, %76 : vector<8x128xf32>
    %80 = arith.mulf %70, %44 : vector<8x128xf32>
    %81 = arith.addf %79, %80 : vector<8x128xf32>
    %82 = arith.truncf %81 : vector<8x128xf32> to vector<8x128xbf16>
    %83 = arith.index_cast %49 : i32 to index
    %c0_26 = arith.constant 0 : index
    %84 = vector.load %arg13[%83, %c0_26] : memref<64x128xbf16, #tpu.memory_space<vmem>>, vector<8x128xbf16>
    tpu.vector_store %arg13[%83, %c0_26], %82 {strides = array<i32>} : memref<64x128xbf16, #tpu.memory_space<vmem>>, vector<8x128xbf16>,
    %c2_i32 = arith.constant 2 : i32
    %c8_i32_27 = arith.constant 8 : i32
    %85 = arith.muli %c2_i32, %c8_i32_27 : i32
    %86 = tpu.assume_multiple %85, 8 : i32
    %87 = arith.index_cast %86 : i32 to index
    %c0_28 = arith.constant 0 : index
    %88 = vector.load %arg12[%87, %c0_28] : memref<64x384xf32, #tpu.memory_space<vmem>>, vector<8x384xf32>
    %89 = arith.truncf %81 : vector<8x128xf32> to vector<8x128xbf16>
    %c0_29 = arith.constant 0 : index
    %c0_30 = arith.constant 0 : index
    %90 = vector.load %arg2[%c0_29, %c0_30] : memref<128x384xbf16, #tpu.memory_space<vmem>>, vector<128x384xbf16>
    %cst_31 = arith.constant dense<0.000000e+00> : vector<8x384xf32>
    %91 = tpu.matmul %89, %90, %cst_31 {dimension_numbers = #tpu.dot_dimension_numbers<[1], [0], [0], [1], [0, 0, 1, 1], [], []>} : vector<8x128xbf16>, vector<128x384xbf16>, vector<8x384xf32> -> vector<8x384xf32>
    %92 = vector.extract_strided_slice %88 {offsets = [0, 0], sizes = [8, 128], strides = [1, 1]} : vector<8x384xf32> to vector<8x128xf32>
    %93 = vector.extract_strided_slice %91 {offsets = [0, 0], sizes = [8, 128], strides = [1, 1]} : vector<8x384xf32> to vector<8x128xf32>
    %94 = arith.addf %92, %93 : vector<8x128xf32>
    %95 = arith.negf %94 : vector<8x128xf32>
    %96 = math.exp %95 : vector<8x128xf32>
    %cst_32 = arith.constant 1.000000e+00 : f32
    %97 = vector.broadcast %cst_32 : f32 to vector<8x128xf32>
    %98 = arith.addf %97, %96 : vector<8x128xf32>
    %99 = arith.divf %97, %98 : vector<8x128xf32>
    %100 = vector.extract_strided_slice %88 {offsets = [0, 128], sizes = [8, 128], strides = [1, 1]} : vector<8x384xf32> to vector<8x128xf32>
    %101 = vector.extract_strided_slice %91 {offsets = [0, 128], sizes = [8, 128], strides = [1, 1]} : vector<8x384xf32> to vector<8x128xf32>
    %102 = arith.addf %100, %101 : vector<8x128xf32>
    %103 = arith.negf %102 : vector<8x128xf32>
    %104 = math.exp %103 : vector<8x128xf32>
    %cst_33 = arith.constant 1.000000e+00 : f32
    %105 = vector.broadcast %cst_33 : f32 to vector<8x128xf32>
    %106 = arith.addf %105, %104 : vector<8x128xf32>
    %107 = arith.divf %105, %106 : vector<8x128xf32>
    %108 = vector.extract_strided_slice %88 {offsets = [0, 256], sizes = [8, 128], strides = [1, 1]} : vector<8x384xf32> to vector<8x128xf32>
    %109 = vector.extract_strided_slice %91 {offsets = [0, 256], sizes = [8, 128], strides = [1, 1]} : vector<8x384xf32> to vector<8x128xf32>
    %110 = arith.addf %109, %9 : vector<8x128xf32>
    %111 = arith.mulf %99, %110 : vector<8x128xf32>
    %112 = arith.addf %108, %111 : vector<8x128xf32>
    %113 = math.tanh %112 : vector<8x128xf32>
    %cst_34 = arith.constant 1.000000e+00 : f32
    %114 = vector.broadcast %cst_34 : f32 to vector<8x128xf32>
    %115 = arith.subf %114, %107 : vector<8x128xf32>
    %116 = arith.mulf %115, %113 : vector<8x128xf32>
    %117 = arith.mulf %107, %81 : vector<8x128xf32>
    %118 = arith.addf %116, %117 : vector<8x128xf32>
    %119 = arith.truncf %118 : vector<8x128xf32> to vector<8x128xbf16>
    %120 = arith.index_cast %86 : i32 to index
    %c0_35 = arith.constant 0 : index
    %121 = vector.load %arg13[%120, %c0_35] : memref<64x128xbf16, #tpu.memory_space<vmem>>, vector<8x128xbf16>
    tpu.vector_store %arg13[%120, %c0_35], %119 {strides = array<i32>} : memref<64x128xbf16, #tpu.memory_space<vmem>>, vector<8x128xbf16>,
    %c3_i32 = arith.constant 3 : i32
    %c8_i32_36 = arith.constant 8 : i32
    %122 = arith.muli %c3_i32, %c8_i32_36 : i32
    %123 = tpu.assume_multiple %122, 8 : i32
    %124 = arith.index_cast %123 : i32 to index
    %c0_37 = arith.constant 0 : index
    %125 = vector.load %arg12[%124, %c0_37] : memref<64x384xf32, #tpu.memory_space<vmem>>, vector<8x384xf32>
    %126 = arith.truncf %118 : vector<8x128xf32> to vector<8x128xbf16>
    %c0_38 = arith.constant 0 : index
    %c0_39 = arith.constant 0 : index
    %127 = vector.load %arg2[%c0_38, %c0_39] : memref<128x384xbf16, #tpu.memory_space<vmem>>, vector<128x384xbf16>
    %cst_40 = arith.constant dense<0.000000e+00> : vector<8x384xf32>
    %128 = tpu.matmul %126, %127, %cst_40 {dimension_numbers = #tpu.dot_dimension_numbers<[1], [0], [0], [1], [0, 0, 1, 1], [], []>} : vector<8x128xbf16>, vector<128x384xbf16>, vector<8x384xf32> -> vector<8x384xf32>
    %129 = vector.extract_strided_slice %125 {offsets = [0, 0], sizes = [8, 128], strides = [1, 1]} : vector<8x384xf32> to vector<8x128xf32>
    %130 = vector.extract_strided_slice %128 {offsets = [0, 0], sizes = [8, 128], strides = [1, 1]} : vector<8x384xf32> to vector<8x128xf32>
    %131 = arith.addf %129, %130 : vector<8x128xf32>
    %132 = arith.negf %131 : vector<8x128xf32>
    %133 = math.exp %132 : vector<8x128xf32>
    %cst_41 = arith.constant 1.000000e+00 : f32
    %134 = vector.broadcast %cst_41 : f32 to vector<8x128xf32>
    %135 = arith.addf %134, %133 : vector<8x128xf32>
    %136 = arith.divf %134, %135 : vector<8x128xf32>
    %137 = vector.extract_strided_slice %125 {offsets = [0, 128], sizes = [8, 128], strides = [1, 1]} : vector<8x384xf32> to vector<8x128xf32>
    %138 = vector.extract_strided_slice %128 {offsets = [0, 128], sizes = [8, 128], strides = [1, 1]} : vector<8x384xf32> to vector<8x128xf32>
    %139 = arith.addf %137, %138 : vector<8x128xf32>
    %140 = arith.negf %139 : vector<8x128xf32>
    %141 = math.exp %140 : vector<8x128xf32>
    %cst_42 = arith.constant 1.000000e+00 : f32
    %142 = vector.broadcast %cst_42 : f32 to vector<8x128xf32>
    %143 = arith.addf %142, %141 : vector<8x128xf32>
    %144 = arith.divf %142, %143 : vector<8x128xf32>
    %145 = vector.extract_strided_slice %125 {offsets = [0, 256], sizes = [8, 128], strides = [1, 1]} : vector<8x384xf32> to vector<8x128xf32>
    %146 = vector.extract_strided_slice %128 {offsets = [0, 256], sizes = [8, 128], strides = [1, 1]} : vector<8x384xf32> to vector<8x128xf32>
    %147 = arith.addf %146, %9 : vector<8x128xf32>
    %148 = arith.mulf %136, %147 : vector<8x128xf32>
    %149 = arith.addf %145, %148 : vector<8x128xf32>
    %150 = math.tanh %149 : vector<8x128xf32>
    %cst_43 = arith.constant 1.000000e+00 : f32
    %151 = vector.broadcast %cst_43 : f32 to vector<8x128xf32>
    %152 = arith.subf %151, %144 : vector<8x128xf32>
    %153 = arith.mulf %152, %150 : vector<8x128xf32>
    %154 = arith.mulf %144, %118 : vector<8x128xf32>
    %155 = arith.addf %153, %154 : vector<8x128xf32>
    %156 = arith.truncf %155 : vector<8x128xf32> to vector<8x128xbf16>
    %157 = arith.index_cast %123 : i32 to index
    %c0_44 = arith.constant 0 : index
    %158 = vector.load %arg13[%157, %c0_44] : memref<64x128xbf16, #tpu.memory_space<vmem>>, vector<8x128xbf16>
    tpu.vector_store %arg13[%157, %c0_44], %156 {strides = array<i32>} : memref<64x128xbf16, #tpu.memory_space<vmem>>, vector<8x128xbf16>,
    %c4_i32 = arith.constant 4 : i32
    %c8_i32_45 = arith.constant 8 : i32
    %159 = arith.muli %c4_i32, %c8_i32_45 : i32
    %160 = tpu.assume_multiple %159, 8 : i32
    %161 = arith.index_cast %160 : i32 to index
    %c0_46 = arith.constant 0 : index
    %162 = vector.load %arg12[%161, %c0_46] : memref<64x384xf32, #tpu.memory_space<vmem>>, vector<8x384xf32>
    %163 = arith.truncf %155 : vector<8x128xf32> to vector<8x128xbf16>
    %c0_47 = arith.constant 0 : index
    %c0_48 = arith.constant 0 : index
    %164 = vector.load %arg2[%c0_47, %c0_48] : memref<128x384xbf16, #tpu.memory_space<vmem>>, vector<128x384xbf16>
    %cst_49 = arith.constant dense<0.000000e+00> : vector<8x384xf32>
    %165 = tpu.matmul %163, %164, %cst_49 {dimension_numbers = #tpu.dot_dimension_numbers<[1], [0], [0], [1], [0, 0, 1, 1], [], []>} : vector<8x128xbf16>, vector<128x384xbf16>, vector<8x384xf32> -> vector<8x384xf32>
    %166 = vector.extract_strided_slice %162 {offsets = [0, 0], sizes = [8, 128], strides = [1, 1]} : vector<8x384xf32> to vector<8x128xf32>
    %167 = vector.extract_strided_slice %165 {offsets = [0, 0], sizes = [8, 128], strides = [1, 1]} : vector<8x384xf32> to vector<8x128xf32>
    %168 = arith.addf %166, %167 : vector<8x128xf32>
    %169 = arith.negf %168 : vector<8x128xf32>
    %170 = math.exp %169 : vector<8x128xf32>
    %cst_50 = arith.constant 1.000000e+00 : f32
    %171 = vector.broadcast %cst_50 : f32 to vector<8x128xf32>
    %172 = arith.addf %171, %170 : vector<8x128xf32>
    %173 = arith.divf %171, %172 : vector<8x128xf32>
    %174 = vector.extract_strided_slice %162 {offsets = [0, 128], sizes = [8, 128], strides = [1, 1]} : vector<8x384xf32> to vector<8x128xf32>
    %175 = vector.extract_strided_slice %165 {offsets = [0, 128], sizes = [8, 128], strides = [1, 1]} : vector<8x384xf32> to vector<8x128xf32>
    %176 = arith.addf %174, %175 : vector<8x128xf32>
    %177 = arith.negf %176 : vector<8x128xf32>
    %178 = math.exp %177 : vector<8x128xf32>
    %cst_51 = arith.constant 1.000000e+00 : f32
    %179 = vector.broadcast %cst_51 : f32 to vector<8x128xf32>
    %180 = arith.addf %179, %178 : vector<8x128xf32>
    %181 = arith.divf %179, %180 : vector<8x128xf32>
    %182 = vector.extract_strided_slice %162 {offsets = [0, 256], sizes = [8, 128], strides = [1, 1]} : vector<8x384xf32> to vector<8x128xf32>
    %183 = vector.extract_strided_slice %165 {offsets = [0, 256], sizes = [8, 128], strides = [1, 1]} : vector<8x384xf32> to vector<8x128xf32>
    %184 = arith.addf %183, %9 : vector<8x128xf32>
    %185 = arith.mulf %173, %184 : vector<8x128xf32>
    %186 = arith.addf %182, %185 : vector<8x128xf32>
    %187 = math.tanh %186 : vector<8x128xf32>
    %cst_52 = arith.constant 1.000000e+00 : f32
    %188 = vector.broadcast %cst_52 : f32 to vector<8x128xf32>
    %189 = arith.subf %188, %181 : vector<8x128xf32>
    %190 = arith.mulf %189, %187 : vector<8x128xf32>
    %191 = arith.mulf %181, %155 : vector<8x128xf32>
    %192 = arith.addf %190, %191 : vector<8x128xf32>
    %193 = arith.truncf %192 : vector<8x128xf32> to vector<8x128xbf16>
    %194 = arith.index_cast %160 : i32 to index
    %c0_53 = arith.constant 0 : index
    %195 = vector.load %arg13[%194, %c0_53] : memref<64x128xbf16, #tpu.memory_space<vmem>>, vector<8x128xbf16>
    tpu.vector_store %arg13[%194, %c0_53], %193 {strides = array<i32>} : memref<64x128xbf16, #tpu.memory_space<vmem>>, vector<8x128xbf16>,
    %c5_i32 = arith.constant 5 : i32
    %c8_i32_54 = arith.constant 8 : i32
    %196 = arith.muli %c5_i32, %c8_i32_54 : i32
    %197 = tpu.assume_multiple %196, 8 : i32
    %198 = arith.index_cast %197 : i32 to index
    %c0_55 = arith.constant 0 : index
    %199 = vector.load %arg12[%198, %c0_55] : memref<64x384xf32, #tpu.memory_space<vmem>>, vector<8x384xf32>
    %200 = arith.truncf %192 : vector<8x128xf32> to vector<8x128xbf16>
    %c0_56 = arith.constant 0 : index
    %c0_57 = arith.constant 0 : index
    %201 = vector.load %arg2[%c0_56, %c0_57] : memref<128x384xbf16, #tpu.memory_space<vmem>>, vector<128x384xbf16>
    %cst_58 = arith.constant dense<0.000000e+00> : vector<8x384xf32>
    %202 = tpu.matmul %200, %201, %cst_58 {dimension_numbers = #tpu.dot_dimension_numbers<[1], [0], [0], [1], [0, 0, 1, 1], [], []>} : vector<8x128xbf16>, vector<128x384xbf16>, vector<8x384xf32> -> vector<8x384xf32>
    %203 = vector.extract_strided_slice %199 {offsets = [0, 0], sizes = [8, 128], strides = [1, 1]} : vector<8x384xf32> to vector<8x128xf32>
    %204 = vector.extract_strided_slice %202 {offsets = [0, 0], sizes = [8, 128], strides = [1, 1]} : vector<8x384xf32> to vector<8x128xf32>
    %205 = arith.addf %203, %204 : vector<8x128xf32>
    %206 = arith.negf %205 : vector<8x128xf32>
    %207 = math.exp %206 : vector<8x128xf32>
    %cst_59 = arith.constant 1.000000e+00 : f32
    %208 = vector.broadcast %cst_59 : f32 to vector<8x128xf32>
    %209 = arith.addf %208, %207 : vector<8x128xf32>
    %210 = arith.divf %208, %209 : vector<8x128xf32>
    %211 = vector.extract_strided_slice %199 {offsets = [0, 128], sizes = [8, 128], strides = [1, 1]} : vector<8x384xf32> to vector<8x128xf32>
    %212 = vector.extract_strided_slice %202 {offsets = [0, 128], sizes = [8, 128], strides = [1, 1]} : vector<8x384xf32> to vector<8x128xf32>
    %213 = arith.addf %211, %212 : vector<8x128xf32>
    %214 = arith.negf %213 : vector<8x128xf32>
    %215 = math.exp %214 : vector<8x128xf32>
    %cst_60 = arith.constant 1.000000e+00 : f32
    %216 = vector.broadcast %cst_60 : f32 to vector<8x128xf32>
    %217 = arith.addf %216, %215 : vector<8x128xf32>
    %218 = arith.divf %216, %217 : vector<8x128xf32>
    %219 = vector.extract_strided_slice %199 {offsets = [0, 256], sizes = [8, 128], strides = [1, 1]} : vector<8x384xf32> to vector<8x128xf32>
    %220 = vector.extract_strided_slice %202 {offsets = [0, 256], sizes = [8, 128], strides = [1, 1]} : vector<8x384xf32> to vector<8x128xf32>
    %221 = arith.addf %220, %9 : vector<8x128xf32>
    %222 = arith.mulf %210, %221 : vector<8x128xf32>
    %223 = arith.addf %219, %222 : vector<8x128xf32>
    %224 = math.tanh %223 : vector<8x128xf32>
    %cst_61 = arith.constant 1.000000e+00 : f32
    %225 = vector.broadcast %cst_61 : f32 to vector<8x128xf32>
    %226 = arith.subf %225, %218 : vector<8x128xf32>
    %227 = arith.mulf %226, %224 : vector<8x128xf32>
    %228 = arith.mulf %218, %192 : vector<8x128xf32>
    %229 = arith.addf %227, %228 : vector<8x128xf32>
    %230 = arith.truncf %229 : vector<8x128xf32> to vector<8x128xbf16>
    %231 = arith.index_cast %197 : i32 to index
    %c0_62 = arith.constant 0 : index
    %232 = vector.load %arg13[%231, %c0_62] : memref<64x128xbf16, #tpu.memory_space<vmem>>, vector<8x128xbf16>
    tpu.vector_store %arg13[%231, %c0_62], %230 {strides = array<i32>} : memref<64x128xbf16, #tpu.memory_space<vmem>>, vector<8x128xbf16>,
    %c6_i32 = arith.constant 6 : i32
    %c8_i32_63 = arith.constant 8 : i32
    %233 = arith.muli %c6_i32, %c8_i32_63 : i32
    %234 = tpu.assume_multiple %233, 8 : i32
    %235 = arith.index_cast %234 : i32 to index
    %c0_64 = arith.constant 0 : index
    %236 = vector.load %arg12[%235, %c0_64] : memref<64x384xf32, #tpu.memory_space<vmem>>, vector<8x384xf32>
    %237 = arith.truncf %229 : vector<8x128xf32> to vector<8x128xbf16>
    %c0_65 = arith.constant 0 : index
    %c0_66 = arith.constant 0 : index
    %238 = vector.load %arg2[%c0_65, %c0_66] : memref<128x384xbf16, #tpu.memory_space<vmem>>, vector<128x384xbf16>
    %cst_67 = arith.constant dense<0.000000e+00> : vector<8x384xf32>
    %239 = tpu.matmul %237, %238, %cst_67 {dimension_numbers = #tpu.dot_dimension_numbers<[1], [0], [0], [1], [0, 0, 1, 1], [], []>} : vector<8x128xbf16>, vector<128x384xbf16>, vector<8x384xf32> -> vector<8x384xf32>
    %240 = vector.extract_strided_slice %236 {offsets = [0, 0], sizes = [8, 128], strides = [1, 1]} : vector<8x384xf32> to vector<8x128xf32>
    %241 = vector.extract_strided_slice %239 {offsets = [0, 0], sizes = [8, 128], strides = [1, 1]} : vector<8x384xf32> to vector<8x128xf32>
    %242 = arith.addf %240, %241 : vector<8x128xf32>
    %243 = arith.negf %242 : vector<8x128xf32>
    %244 = math.exp %243 : vector<8x128xf32>
    %cst_68 = arith.constant 1.000000e+00 : f32
    %245 = vector.broadcast %cst_68 : f32 to vector<8x128xf32>
    %246 = arith.addf %245, %244 : vector<8x128xf32>
    %247 = arith.divf %245, %246 : vector<8x128xf32>
    %248 = vector.extract_strided_slice %236 {offsets = [0, 128], sizes = [8, 128], strides = [1, 1]} : vector<8x384xf32> to vector<8x128xf32>
    %249 = vector.extract_strided_slice %239 {offsets = [0, 128], sizes = [8, 128], strides = [1, 1]} : vector<8x384xf32> to vector<8x128xf32>
    %250 = arith.addf %248, %249 : vector<8x128xf32>
    %251 = arith.negf %250 : vector<8x128xf32>
    %252 = math.exp %251 : vector<8x128xf32>
    %cst_69 = arith.constant 1.000000e+00 : f32
    %253 = vector.broadcast %cst_69 : f32 to vector<8x128xf32>
    %254 = arith.addf %253, %252 : vector<8x128xf32>
    %255 = arith.divf %253, %254 : vector<8x128xf32>
    %256 = vector.extract_strided_slice %236 {offsets = [0, 256], sizes = [8, 128], strides = [1, 1]} : vector<8x384xf32> to vector<8x128xf32>
    %257 = vector.extract_strided_slice %239 {offsets = [0, 256], sizes = [8, 128], strides = [1, 1]} : vector<8x384xf32> to vector<8x128xf32>
    %258 = arith.addf %257, %9 : vector<8x128xf32>
    %259 = arith.mulf %247, %258 : vector<8x128xf32>
    %260 = arith.addf %256, %259 : vector<8x128xf32>
    %261 = math.tanh %260 : vector<8x128xf32>
    %cst_70 = arith.constant 1.000000e+00 : f32
    %262 = vector.broadcast %cst_70 : f32 to vector<8x128xf32>
    %263 = arith.subf %262, %255 : vector<8x128xf32>
    %264 = arith.mulf %263, %261 : vector<8x128xf32>
    %265 = arith.mulf %255, %229 : vector<8x128xf32>
    %266 = arith.addf %264, %265 : vector<8x128xf32>
    %267 = arith.truncf %266 : vector<8x128xf32> to vector<8x128xbf16>
    %268 = arith.index_cast %234 : i32 to index
    %c0_71 = arith.constant 0 : index
    %269 = vector.load %arg13[%268, %c0_71] : memref<64x128xbf16, #tpu.memory_space<vmem>>, vector<8x128xbf16>
    tpu.vector_store %arg13[%268, %c0_71], %267 {strides = array<i32>} : memref<64x128xbf16, #tpu.memory_space<vmem>>, vector<8x128xbf16>,
    %c7_i32 = arith.constant 7 : i32
    %c8_i32_72 = arith.constant 8 : i32
    %270 = arith.muli %c7_i32, %c8_i32_72 : i32
    %271 = tpu.assume_multiple %270, 8 : i32
    %272 = arith.index_cast %271 : i32 to index
    %c0_73 = arith.constant 0 : index
    %273 = vector.load %arg12[%272, %c0_73] : memref<64x384xf32, #tpu.memory_space<vmem>>, vector<8x384xf32>
    %274 = arith.truncf %266 : vector<8x128xf32> to vector<8x128xbf16>
    %c0_74 = arith.constant 0 : index
    %c0_75 = arith.constant 0 : index
    %275 = vector.load %arg2[%c0_74, %c0_75] : memref<128x384xbf16, #tpu.memory_space<vmem>>, vector<128x384xbf16>
    %cst_76 = arith.constant dense<0.000000e+00> : vector<8x384xf32>
    %276 = tpu.matmul %274, %275, %cst_76 {dimension_numbers = #tpu.dot_dimension_numbers<[1], [0], [0], [1], [0, 0, 1, 1], [], []>} : vector<8x128xbf16>, vector<128x384xbf16>, vector<8x384xf32> -> vector<8x384xf32>
    %277 = vector.extract_strided_slice %273 {offsets = [0, 0], sizes = [8, 128], strides = [1, 1]} : vector<8x384xf32> to vector<8x128xf32>
    %278 = vector.extract_strided_slice %276 {offsets = [0, 0], sizes = [8, 128], strides = [1, 1]} : vector<8x384xf32> to vector<8x128xf32>
    %279 = arith.addf %277, %278 : vector<8x128xf32>
    %280 = arith.negf %279 : vector<8x128xf32>
    %281 = math.exp %280 : vector<8x128xf32>
    %cst_77 = arith.constant 1.000000e+00 : f32
    %282 = vector.broadcast %cst_77 : f32 to vector<8x128xf32>
    %283 = arith.addf %282, %281 : vector<8x128xf32>
    %284 = arith.divf %282, %283 : vector<8x128xf32>
    %285 = vector.extract_strided_slice %273 {offsets = [0, 128], sizes = [8, 128], strides = [1, 1]} : vector<8x384xf32> to vector<8x128xf32>
    %286 = vector.extract_strided_slice %276 {offsets = [0, 128], sizes = [8, 128], strides = [1, 1]} : vector<8x384xf32> to vector<8x128xf32>
    %287 = arith.addf %285, %286 : vector<8x128xf32>
    %288 = arith.negf %287 : vector<8x128xf32>
    %289 = math.exp %288 : vector<8x128xf32>
    %cst_78 = arith.constant 1.000000e+00 : f32
    %290 = vector.broadcast %cst_78 : f32 to vector<8x128xf32>
    %291 = arith.addf %290, %289 : vector<8x128xf32>
    %292 = arith.divf %290, %291 : vector<8x128xf32>
    %293 = vector.extract_strided_slice %273 {offsets = [0, 256], sizes = [8, 128], strides = [1, 1]} : vector<8x384xf32> to vector<8x128xf32>
    %294 = vector.extract_strided_slice %276 {offsets = [0, 256], sizes = [8, 128], strides = [1, 1]} : vector<8x384xf32> to vector<8x128xf32>
    %295 = arith.addf %294, %9 : vector<8x128xf32>
    %296 = arith.mulf %284, %295 : vector<8x128xf32>
    %297 = arith.addf %293, %296 : vector<8x128xf32>
    %298 = math.tanh %297 : vector<8x128xf32>
    %cst_79 = arith.constant 1.000000e+00 : f32
    %299 = vector.broadcast %cst_79 : f32 to vector<8x128xf32>
    %300 = arith.subf %299, %292 : vector<8x128xf32>
    %301 = arith.mulf %300, %298 : vector<8x128xf32>
    %302 = arith.mulf %292, %266 : vector<8x128xf32>
    %303 = arith.addf %301, %302 : vector<8x128xf32>
    %304 = arith.truncf %303 : vector<8x128xf32> to vector<8x128xbf16>
    %305 = arith.index_cast %271 : i32 to index
    %c0_80 = arith.constant 0 : index
    %306 = vector.load %arg13[%305, %c0_80] : memref<64x128xbf16, #tpu.memory_space<vmem>>, vector<8x128xbf16>
    tpu.vector_store %arg13[%305, %c0_80], %304 {strides = array<i32>} : memref<64x128xbf16, #tpu.memory_space<vmem>>, vector<8x128xbf16>,
    %c8_i32_81 = arith.constant 8 : i32
    %c0_82 = arith.constant 0 : index
    %c0_83 = arith.constant 0 : index
    %307 = vector.load %arg13[%c0_82, %c0_83] : memref<64x128xbf16, #tpu.memory_space<vmem>>, vector<64x128xbf16>
    %c0_84 = arith.constant 0 : index
    %c0_85 = arith.constant 0 : index
    %308 = vector.load %arg5[%c0_84, %c0_85] : memref<128x384xbf16, #tpu.memory_space<vmem>>, vector<128x384xbf16>
    %cst_86 = arith.constant dense<0.000000e+00> : vector<64x384xf32>
    %309 = tpu.matmul %307, %308, %cst_86 {dimension_numbers = #tpu.dot_dimension_numbers<[1], [0], [0], [1], [0, 0, 1, 1], [], []>} : vector<64x128xbf16>, vector<128x384xbf16>, vector<64x384xf32> -> vector<64x384xf32>
    %c0_87 = arith.constant 0 : index
    %c0_88 = arith.constant 0 : index
    %310 = vector.load %arg7[%c0_87, %c0_88] : memref<1x384xf32, #tpu.memory_space<vmem>>, vector<1x384xf32>
    %311 = vector.broadcast %310 : vector<1x384xf32> to vector<64x384xf32>
    %312 = arith.addf %309, %311 : vector<64x384xf32>
    %c0_89 = arith.constant 0 : index
    %c0_90 = arith.constant 0 : index
    %313 = vector.load %arg12[%c0_89, %c0_90] : memref<64x384xf32, #tpu.memory_space<vmem>>, vector<64x384xf32>
    tpu.vector_store %arg12[%c0_89, %c0_90], %312 {strides = array<i32>} : memref<64x384xf32, #tpu.memory_space<vmem>>, vector<64x384xf32>,
    %c0_91 = arith.constant 0 : index
    %c0_92 = arith.constant 0 : index
    %314 = vector.load %arg8[%c0_91, %c0_92] : memref<1x128xf32, #tpu.memory_space<vmem>>, vector<1x128xf32>
    %315 = vector.shape_cast %314 : vector<1x128xf32> to vector<1x128xf32>
    %316 = vector.broadcast %315 : vector<1x128xf32> to vector<8x128xf32>
    %cst_93 = arith.constant 0.000000e+00 : f32
    %317 = vector.broadcast %cst_93 : f32 to vector<8x128xf32>
    %c0_i32_94 = arith.constant 0 : i32
    %c8_i32_95 = arith.constant 8 : i32
    %318 = arith.muli %c0_i32_94, %c8_i32_95 : i32
    %319 = tpu.assume_multiple %318, 8 : i32
    %320 = arith.index_cast %319 : i32 to index
    %c0_96 = arith.constant 0 : index
    %321 = vector.load %arg12[%320, %c0_96] : memref<64x384xf32, #tpu.memory_space<vmem>>, vector<8x384xf32>
    %322 = arith.truncf %317 : vector<8x128xf32> to vector<8x128xbf16>
    %c0_97 = arith.constant 0 : index
    %c0_98 = arith.constant 0 : index
    %323 = vector.load %arg6[%c0_97, %c0_98] : memref<128x384xbf16, #tpu.memory_space<vmem>>, vector<128x384xbf16>
    %cst_99 = arith.constant dense<0.000000e+00> : vector<8x384xf32>
    %324 = tpu.matmul %322, %323, %cst_99 {dimension_numbers = #tpu.dot_dimension_numbers<[1], [0], [0], [1], [0, 0, 1, 1], [], []>} : vector<8x128xbf16>, vector<128x384xbf16>, vector<8x384xf32> -> vector<8x384xf32>
    %325 = vector.extract_strided_slice %321 {offsets = [0, 0], sizes = [8, 128], strides = [1, 1]} : vector<8x384xf32> to vector<8x128xf32>
    %326 = vector.extract_strided_slice %324 {offsets = [0, 0], sizes = [8, 128], strides = [1, 1]} : vector<8x384xf32> to vector<8x128xf32>
    %327 = arith.addf %325, %326 : vector<8x128xf32>
    %328 = arith.negf %327 : vector<8x128xf32>
    %329 = math.exp %328 : vector<8x128xf32>
    %cst_100 = arith.constant 1.000000e+00 : f32
    %330 = vector.broadcast %cst_100 : f32 to vector<8x128xf32>
    %331 = arith.addf %330, %329 : vector<8x128xf32>
    %332 = arith.divf %330, %331 : vector<8x128xf32>
    %333 = vector.extract_strided_slice %321 {offsets = [0, 128], sizes = [8, 128], strides = [1, 1]} : vector<8x384xf32> to vector<8x128xf32>
    %334 = vector.extract_strided_slice %324 {offsets = [0, 128], sizes = [8, 128], strides = [1, 1]} : vector<8x384xf32> to vector<8x128xf32>
    %335 = arith.addf %333, %334 : vector<8x128xf32>
    %336 = arith.negf %335 : vector<8x128xf32>
    %337 = math.exp %336 : vector<8x128xf32>
    %cst_101 = arith.constant 1.000000e+00 : f32
    %338 = vector.broadcast %cst_101 : f32 to vector<8x128xf32>
    %339 = arith.addf %338, %337 : vector<8x128xf32>
    %340 = arith.divf %338, %339 : vector<8x128xf32>
    %341 = vector.extract_strided_slice %321 {offsets = [0, 256], sizes = [8, 128], strides = [1, 1]} : vector<8x384xf32> to vector<8x128xf32>
    %342 = vector.extract_strided_slice %324 {offsets = [0, 256], sizes = [8, 128], strides = [1, 1]} : vector<8x384xf32> to vector<8x128xf32>
    %343 = arith.addf %342, %316 : vector<8x128xf32>
    %344 = arith.mulf %332, %343 : vector<8x128xf32>
    %345 = arith.addf %341, %344 : vector<8x128xf32>
    %346 = math.tanh %345 : vector<8x128xf32>
    %cst_102 = arith.constant 1.000000e+00 : f32
    %347 = vector.broadcast %cst_102 : f32 to vector<8x128xf32>
    %348 = arith.subf %347, %340 : vector<8x128xf32>
    %349 = arith.mulf %348, %346 : vector<8x128xf32>
    %350 = arith.mulf %340, %317 : vector<8x128xf32>
    %351 = arith.addf %349, %350 : vector<8x128xf32>
    %c1_i32_103 = arith.constant 1 : i32
    %c8_i32_104 = arith.constant 8 : i32
    %352 = arith.muli %c1_i32_103, %c8_i32_104 : i32
    %353 = tpu.assume_multiple %352, 8 : i32
    %354 = arith.index_cast %353 : i32 to index
    %c0_105 = arith.constant 0 : index
    %355 = vector.load %arg12[%354, %c0_105] : memref<64x384xf32, #tpu.memory_space<vmem>>, vector<8x384xf32>
    %356 = arith.truncf %351 : vector<8x128xf32> to vector<8x128xbf16>
    %c0_106 = arith.constant 0 : index
    %c0_107 = arith.constant 0 : index
    %357 = vector.load %arg6[%c0_106, %c0_107] : memref<128x384xbf16, #tpu.memory_space<vmem>>, vector<128x384xbf16>
    %cst_108 = arith.constant dense<0.000000e+00> : vector<8x384xf32>
    %358 = tpu.matmul %356, %357, %cst_108 {dimension_numbers = #tpu.dot_dimension_numbers<[1], [0], [0], [1], [0, 0, 1, 1], [], []>} : vector<8x128xbf16>, vector<128x384xbf16>, vector<8x384xf32> -> vector<8x384xf32>
    %359 = vector.extract_strided_slice %355 {offsets = [0, 0], sizes = [8, 128], strides = [1, 1]} : vector<8x384xf32> to vector<8x128xf32>
    %360 = vector.extract_strided_slice %358 {offsets = [0, 0], sizes = [8, 128], strides = [1, 1]} : vector<8x384xf32> to vector<8x128xf32>
    %361 = arith.addf %359, %360 : vector<8x128xf32>
    %362 = arith.negf %361 : vector<8x128xf32>
    %363 = math.exp %362 : vector<8x128xf32>
    %cst_109 = arith.constant 1.000000e+00 : f32
    %364 = vector.broadcast %cst_109 : f32 to vector<8x128xf32>
    %365 = arith.addf %364, %363 : vector<8x128xf32>
    %366 = arith.divf %364, %365 : vector<8x128xf32>
    %367 = vector.extract_strided_slice %355 {offsets = [0, 128], sizes = [8, 128], strides = [1, 1]} : vector<8x384xf32> to vector<8x128xf32>
    %368 = vector.extract_strided_slice %358 {offsets = [0, 128], sizes = [8, 128], strides = [1, 1]} : vector<8x384xf32> to vector<8x128xf32>
    %369 = arith.addf %367, %368 : vector<8x128xf32>
    %370 = arith.negf %369 : vector<8x128xf32>
    %371 = math.exp %370 : vector<8x128xf32>
    %cst_110 = arith.constant 1.000000e+00 : f32
    %372 = vector.broadcast %cst_110 : f32 to vector<8x128xf32>
    %373 = arith.addf %372, %371 : vector<8x128xf32>
    %374 = arith.divf %372, %373 : vector<8x128xf32>
    %375 = vector.extract_strided_slice %355 {offsets = [0, 256], sizes = [8, 128], strides = [1, 1]} : vector<8x384xf32> to vector<8x128xf32>
    %376 = vector.extract_strided_slice %358 {offsets = [0, 256], sizes = [8, 128], strides = [1, 1]} : vector<8x384xf32> to vector<8x128xf32>
    %377 = arith.addf %376, %316 : vector<8x128xf32>
    %378 = arith.mulf %366, %377 : vector<8x128xf32>
    %379 = arith.addf %375, %378 : vector<8x128xf32>
    %380 = math.tanh %379 : vector<8x128xf32>
    %cst_111 = arith.constant 1.000000e+00 : f32
    %381 = vector.broadcast %cst_111 : f32 to vector<8x128xf32>
    %382 = arith.subf %381, %374 : vector<8x128xf32>
    %383 = arith.mulf %382, %380 : vector<8x128xf32>
    %384 = arith.mulf %374, %351 : vector<8x128xf32>
    %385 = arith.addf %383, %384 : vector<8x128xf32>
    %c2_i32_112 = arith.constant 2 : i32
    %c8_i32_113 = arith.constant 8 : i32
    %386 = arith.muli %c2_i32_112, %c8_i32_113 : i32
    %387 = tpu.assume_multiple %386, 8 : i32
    %388 = arith.index_cast %387 : i32 to index
    %c0_114 = arith.constant 0 : index
    %389 = vector.load %arg12[%388, %c0_114] : memref<64x384xf32, #tpu.memory_space<vmem>>, vector<8x384xf32>
    %390 = arith.truncf %385 : vector<8x128xf32> to vector<8x128xbf16>
    %c0_115 = arith.constant 0 : index
    %c0_116 = arith.constant 0 : index
    %391 = vector.load %arg6[%c0_115, %c0_116] : memref<128x384xbf16, #tpu.memory_space<vmem>>, vector<128x384xbf16>
    %cst_117 = arith.constant dense<0.000000e+00> : vector<8x384xf32>
    %392 = tpu.matmul %390, %391, %cst_117 {dimension_numbers = #tpu.dot_dimension_numbers<[1], [0], [0], [1], [0, 0, 1, 1], [], []>} : vector<8x128xbf16>, vector<128x384xbf16>, vector<8x384xf32> -> vector<8x384xf32>
    %393 = vector.extract_strided_slice %389 {offsets = [0, 0], sizes = [8, 128], strides = [1, 1]} : vector<8x384xf32> to vector<8x128xf32>
    %394 = vector.extract_strided_slice %392 {offsets = [0, 0], sizes = [8, 128], strides = [1, 1]} : vector<8x384xf32> to vector<8x128xf32>
    %395 = arith.addf %393, %394 : vector<8x128xf32>
    %396 = arith.negf %395 : vector<8x128xf32>
    %397 = math.exp %396 : vector<8x128xf32>
    %cst_118 = arith.constant 1.000000e+00 : f32
    %398 = vector.broadcast %cst_118 : f32 to vector<8x128xf32>
    %399 = arith.addf %398, %397 : vector<8x128xf32>
    %400 = arith.divf %398, %399 : vector<8x128xf32>
    %401 = vector.extract_strided_slice %389 {offsets = [0, 128], sizes = [8, 128], strides = [1, 1]} : vector<8x384xf32> to vector<8x128xf32>
    %402 = vector.extract_strided_slice %392 {offsets = [0, 128], sizes = [8, 128], strides = [1, 1]} : vector<8x384xf32> to vector<8x128xf32>
    %403 = arith.addf %401, %402 : vector<8x128xf32>
    %404 = arith.negf %403 : vector<8x128xf32>
    %405 = math.exp %404 : vector<8x128xf32>
    %cst_119 = arith.constant 1.000000e+00 : f32
    %406 = vector.broadcast %cst_119 : f32 to vector<8x128xf32>
    %407 = arith.addf %406, %405 : vector<8x128xf32>
    %408 = arith.divf %406, %407 : vector<8x128xf32>
    %409 = vector.extract_strided_slice %389 {offsets = [0, 256], sizes = [8, 128], strides = [1, 1]} : vector<8x384xf32> to vector<8x128xf32>
    %410 = vector.extract_strided_slice %392 {offsets = [0, 256], sizes = [8, 128], strides = [1, 1]} : vector<8x384xf32> to vector<8x128xf32>
    %411 = arith.addf %410, %316 : vector<8x128xf32>
    %412 = arith.mulf %400, %411 : vector<8x128xf32>
    %413 = arith.addf %409, %412 : vector<8x128xf32>
    %414 = math.tanh %413 : vector<8x128xf32>
    %cst_120 = arith.constant 1.000000e+00 : f32
    %415 = vector.broadcast %cst_120 : f32 to vector<8x128xf32>
    %416 = arith.subf %415, %408 : vector<8x128xf32>
    %417 = arith.mulf %416, %414 : vector<8x128xf32>
    %418 = arith.mulf %408, %385 : vector<8x128xf32>
    %419 = arith.addf %417, %418 : vector<8x128xf32>
    %c3_i32_121 = arith.constant 3 : i32
    %c8_i32_122 = arith.constant 8 : i32
    %420 = arith.muli %c3_i32_121, %c8_i32_122 : i32
    %421 = tpu.assume_multiple %420, 8 : i32
    %422 = arith.index_cast %421 : i32 to index
    %c0_123 = arith.constant 0 : index
    %423 = vector.load %arg12[%422, %c0_123] : memref<64x384xf32, #tpu.memory_space<vmem>>, vector<8x384xf32>
    %424 = arith.truncf %419 : vector<8x128xf32> to vector<8x128xbf16>
    %c0_124 = arith.constant 0 : index
    %c0_125 = arith.constant 0 : index
    %425 = vector.load %arg6[%c0_124, %c0_125] : memref<128x384xbf16, #tpu.memory_space<vmem>>, vector<128x384xbf16>
    %cst_126 = arith.constant dense<0.000000e+00> : vector<8x384xf32>
    %426 = tpu.matmul %424, %425, %cst_126 {dimension_numbers = #tpu.dot_dimension_numbers<[1], [0], [0], [1], [0, 0, 1, 1], [], []>} : vector<8x128xbf16>, vector<128x384xbf16>, vector<8x384xf32> -> vector<8x384xf32>
    %427 = vector.extract_strided_slice %423 {offsets = [0, 0], sizes = [8, 128], strides = [1, 1]} : vector<8x384xf32> to vector<8x128xf32>
    %428 = vector.extract_strided_slice %426 {offsets = [0, 0], sizes = [8, 128], strides = [1, 1]} : vector<8x384xf32> to vector<8x128xf32>
    %429 = arith.addf %427, %428 : vector<8x128xf32>
    %430 = arith.negf %429 : vector<8x128xf32>
    %431 = math.exp %430 : vector<8x128xf32>
    %cst_127 = arith.constant 1.000000e+00 : f32
    %432 = vector.broadcast %cst_127 : f32 to vector<8x128xf32>
    %433 = arith.addf %432, %431 : vector<8x128xf32>
    %434 = arith.divf %432, %433 : vector<8x128xf32>
    %435 = vector.extract_strided_slice %423 {offsets = [0, 128], sizes = [8, 128], strides = [1, 1]} : vector<8x384xf32> to vector<8x128xf32>
    %436 = vector.extract_strided_slice %426 {offsets = [0, 128], sizes = [8, 128], strides = [1, 1]} : vector<8x384xf32> to vector<8x128xf32>
    %437 = arith.addf %435, %436 : vector<8x128xf32>
    %438 = arith.negf %437 : vector<8x128xf32>
    %439 = math.exp %438 : vector<8x128xf32>
    %cst_128 = arith.constant 1.000000e+00 : f32
    %440 = vector.broadcast %cst_128 : f32 to vector<8x128xf32>
    %441 = arith.addf %440, %439 : vector<8x128xf32>
    %442 = arith.divf %440, %441 : vector<8x128xf32>
    %443 = vector.extract_strided_slice %423 {offsets = [0, 256], sizes = [8, 128], strides = [1, 1]} : vector<8x384xf32> to vector<8x128xf32>
    %444 = vector.extract_strided_slice %426 {offsets = [0, 256], sizes = [8, 128], strides = [1, 1]} : vector<8x384xf32> to vector<8x128xf32>
    %445 = arith.addf %444, %316 : vector<8x128xf32>
    %446 = arith.mulf %434, %445 : vector<8x128xf32>
    %447 = arith.addf %443, %446 : vector<8x128xf32>
    %448 = math.tanh %447 : vector<8x128xf32>
    %cst_129 = arith.constant 1.000000e+00 : f32
    %449 = vector.broadcast %cst_129 : f32 to vector<8x128xf32>
    %450 = arith.subf %449, %442 : vector<8x128xf32>
    %451 = arith.mulf %450, %448 : vector<8x128xf32>
    %452 = arith.mulf %442, %419 : vector<8x128xf32>
    %453 = arith.addf %451, %452 : vector<8x128xf32>
    %c4_i32_130 = arith.constant 4 : i32
    %c8_i32_131 = arith.constant 8 : i32
    %454 = arith.muli %c4_i32_130, %c8_i32_131 : i32
    %455 = tpu.assume_multiple %454, 8 : i32
    %456 = arith.index_cast %455 : i32 to index
    %c0_132 = arith.constant 0 : index
    %457 = vector.load %arg12[%456, %c0_132] : memref<64x384xf32, #tpu.memory_space<vmem>>, vector<8x384xf32>
    %458 = arith.truncf %453 : vector<8x128xf32> to vector<8x128xbf16>
    %c0_133 = arith.constant 0 : index
    %c0_134 = arith.constant 0 : index
    %459 = vector.load %arg6[%c0_133, %c0_134] : memref<128x384xbf16, #tpu.memory_space<vmem>>, vector<128x384xbf16>
    %cst_135 = arith.constant dense<0.000000e+00> : vector<8x384xf32>
    %460 = tpu.matmul %458, %459, %cst_135 {dimension_numbers = #tpu.dot_dimension_numbers<[1], [0], [0], [1], [0, 0, 1, 1], [], []>} : vector<8x128xbf16>, vector<128x384xbf16>, vector<8x384xf32> -> vector<8x384xf32>
    %461 = vector.extract_strided_slice %457 {offsets = [0, 0], sizes = [8, 128], strides = [1, 1]} : vector<8x384xf32> to vector<8x128xf32>
    %462 = vector.extract_strided_slice %460 {offsets = [0, 0], sizes = [8, 128], strides = [1, 1]} : vector<8x384xf32> to vector<8x128xf32>
    %463 = arith.addf %461, %462 : vector<8x128xf32>
    %464 = arith.negf %463 : vector<8x128xf32>
    %465 = math.exp %464 : vector<8x128xf32>
    %cst_136 = arith.constant 1.000000e+00 : f32
    %466 = vector.broadcast %cst_136 : f32 to vector<8x128xf32>
    %467 = arith.addf %466, %465 : vector<8x128xf32>
    %468 = arith.divf %466, %467 : vector<8x128xf32>
    %469 = vector.extract_strided_slice %457 {offsets = [0, 128], sizes = [8, 128], strides = [1, 1]} : vector<8x384xf32> to vector<8x128xf32>
    %470 = vector.extract_strided_slice %460 {offsets = [0, 128], sizes = [8, 128], strides = [1, 1]} : vector<8x384xf32> to vector<8x128xf32>
    %471 = arith.addf %469, %470 : vector<8x128xf32>
    %472 = arith.negf %471 : vector<8x128xf32>
    %473 = math.exp %472 : vector<8x128xf32>
    %cst_137 = arith.constant 1.000000e+00 : f32
    %474 = vector.broadcast %cst_137 : f32 to vector<8x128xf32>
    %475 = arith.addf %474, %473 : vector<8x128xf32>
    %476 = arith.divf %474, %475 : vector<8x128xf32>
    %477 = vector.extract_strided_slice %457 {offsets = [0, 256], sizes = [8, 128], strides = [1, 1]} : vector<8x384xf32> to vector<8x128xf32>
    %478 = vector.extract_strided_slice %460 {offsets = [0, 256], sizes = [8, 128], strides = [1, 1]} : vector<8x384xf32> to vector<8x128xf32>
    %479 = arith.addf %478, %316 : vector<8x128xf32>
    %480 = arith.mulf %468, %479 : vector<8x128xf32>
    %481 = arith.addf %477, %480 : vector<8x128xf32>
    %482 = math.tanh %481 : vector<8x128xf32>
    %cst_138 = arith.constant 1.000000e+00 : f32
    %483 = vector.broadcast %cst_138 : f32 to vector<8x128xf32>
    %484 = arith.subf %483, %476 : vector<8x128xf32>
    %485 = arith.mulf %484, %482 : vector<8x128xf32>
    %486 = arith.mulf %476, %453 : vector<8x128xf32>
    %487 = arith.addf %485, %486 : vector<8x128xf32>
    %c5_i32_139 = arith.constant 5 : i32
    %c8_i32_140 = arith.constant 8 : i32
    %488 = arith.muli %c5_i32_139, %c8_i32_140 : i32
    %489 = tpu.assume_multiple %488, 8 : i32
    %490 = arith.index_cast %489 : i32 to index
    %c0_141 = arith.constant 0 : index
    %491 = vector.load %arg12[%490, %c0_141] : memref<64x384xf32, #tpu.memory_space<vmem>>, vector<8x384xf32>
    %492 = arith.truncf %487 : vector<8x128xf32> to vector<8x128xbf16>
    %c0_142 = arith.constant 0 : index
    %c0_143 = arith.constant 0 : index
    %493 = vector.load %arg6[%c0_142, %c0_143] : memref<128x384xbf16, #tpu.memory_space<vmem>>, vector<128x384xbf16>
    %cst_144 = arith.constant dense<0.000000e+00> : vector<8x384xf32>
    %494 = tpu.matmul %492, %493, %cst_144 {dimension_numbers = #tpu.dot_dimension_numbers<[1], [0], [0], [1], [0, 0, 1, 1], [], []>} : vector<8x128xbf16>, vector<128x384xbf16>, vector<8x384xf32> -> vector<8x384xf32>
    %495 = vector.extract_strided_slice %491 {offsets = [0, 0], sizes = [8, 128], strides = [1, 1]} : vector<8x384xf32> to vector<8x128xf32>
    %496 = vector.extract_strided_slice %494 {offsets = [0, 0], sizes = [8, 128], strides = [1, 1]} : vector<8x384xf32> to vector<8x128xf32>
    %497 = arith.addf %495, %496 : vector<8x128xf32>
    %498 = arith.negf %497 : vector<8x128xf32>
    %499 = math.exp %498 : vector<8x128xf32>
    %cst_145 = arith.constant 1.000000e+00 : f32
    %500 = vector.broadcast %cst_145 : f32 to vector<8x128xf32>
    %501 = arith.addf %500, %499 : vector<8x128xf32>
    %502 = arith.divf %500, %501 : vector<8x128xf32>
    %503 = vector.extract_strided_slice %491 {offsets = [0, 128], sizes = [8, 128], strides = [1, 1]} : vector<8x384xf32> to vector<8x128xf32>
    %504 = vector.extract_strided_slice %494 {offsets = [0, 128], sizes = [8, 128], strides = [1, 1]} : vector<8x384xf32> to vector<8x128xf32>
    %505 = arith.addf %503, %504 : vector<8x128xf32>
    %506 = arith.negf %505 : vector<8x128xf32>
    %507 = math.exp %506 : vector<8x128xf32>
    %cst_146 = arith.constant 1.000000e+00 : f32
    %508 = vector.broadcast %cst_146 : f32 to vector<8x128xf32>
    %509 = arith.addf %508, %507 : vector<8x128xf32>
    %510 = arith.divf %508, %509 : vector<8x128xf32>
    %511 = vector.extract_strided_slice %491 {offsets = [0, 256], sizes = [8, 128], strides = [1, 1]} : vector<8x384xf32> to vector<8x128xf32>
    %512 = vector.extract_strided_slice %494 {offsets = [0, 256], sizes = [8, 128], strides = [1, 1]} : vector<8x384xf32> to vector<8x128xf32>
    %513 = arith.addf %512, %316 : vector<8x128xf32>
    %514 = arith.mulf %502, %513 : vector<8x128xf32>
    %515 = arith.addf %511, %514 : vector<8x128xf32>
    %516 = math.tanh %515 : vector<8x128xf32>
    %cst_147 = arith.constant 1.000000e+00 : f32
    %517 = vector.broadcast %cst_147 : f32 to vector<8x128xf32>
    %518 = arith.subf %517, %510 : vector<8x128xf32>
    %519 = arith.mulf %518, %516 : vector<8x128xf32>
    %520 = arith.mulf %510, %487 : vector<8x128xf32>
    %521 = arith.addf %519, %520 : vector<8x128xf32>
    %c6_i32_148 = arith.constant 6 : i32
    %c8_i32_149 = arith.constant 8 : i32
    %522 = arith.muli %c6_i32_148, %c8_i32_149 : i32
    %523 = tpu.assume_multiple %522, 8 : i32
    %524 = arith.index_cast %523 : i32 to index
    %c0_150 = arith.constant 0 : index
    %525 = vector.load %arg12[%524, %c0_150] : memref<64x384xf32, #tpu.memory_space<vmem>>, vector<8x384xf32>
    %526 = arith.truncf %521 : vector<8x128xf32> to vector<8x128xbf16>
    %c0_151 = arith.constant 0 : index
    %c0_152 = arith.constant 0 : index
    %527 = vector.load %arg6[%c0_151, %c0_152] : memref<128x384xbf16, #tpu.memory_space<vmem>>, vector<128x384xbf16>
    %cst_153 = arith.constant dense<0.000000e+00> : vector<8x384xf32>
    %528 = tpu.matmul %526, %527, %cst_153 {dimension_numbers = #tpu.dot_dimension_numbers<[1], [0], [0], [1], [0, 0, 1, 1], [], []>} : vector<8x128xbf16>, vector<128x384xbf16>, vector<8x384xf32> -> vector<8x384xf32>
    %529 = vector.extract_strided_slice %525 {offsets = [0, 0], sizes = [8, 128], strides = [1, 1]} : vector<8x384xf32> to vector<8x128xf32>
    %530 = vector.extract_strided_slice %528 {offsets = [0, 0], sizes = [8, 128], strides = [1, 1]} : vector<8x384xf32> to vector<8x128xf32>
    %531 = arith.addf %529, %530 : vector<8x128xf32>
    %532 = arith.negf %531 : vector<8x128xf32>
    %533 = math.exp %532 : vector<8x128xf32>
    %cst_154 = arith.constant 1.000000e+00 : f32
    %534 = vector.broadcast %cst_154 : f32 to vector<8x128xf32>
    %535 = arith.addf %534, %533 : vector<8x128xf32>
    %536 = arith.divf %534, %535 : vector<8x128xf32>
    %537 = vector.extract_strided_slice %525 {offsets = [0, 128], sizes = [8, 128], strides = [1, 1]} : vector<8x384xf32> to vector<8x128xf32>
    %538 = vector.extract_strided_slice %528 {offsets = [0, 128], sizes = [8, 128], strides = [1, 1]} : vector<8x384xf32> to vector<8x128xf32>
    %539 = arith.addf %537, %538 : vector<8x128xf32>
    %540 = arith.negf %539 : vector<8x128xf32>
    %541 = math.exp %540 : vector<8x128xf32>
    %cst_155 = arith.constant 1.000000e+00 : f32
    %542 = vector.broadcast %cst_155 : f32 to vector<8x128xf32>
    %543 = arith.addf %542, %541 : vector<8x128xf32>
    %544 = arith.divf %542, %543 : vector<8x128xf32>
    %545 = vector.extract_strided_slice %525 {offsets = [0, 256], sizes = [8, 128], strides = [1, 1]} : vector<8x384xf32> to vector<8x128xf32>
    %546 = vector.extract_strided_slice %528 {offsets = [0, 256], sizes = [8, 128], strides = [1, 1]} : vector<8x384xf32> to vector<8x128xf32>
    %547 = arith.addf %546, %316 : vector<8x128xf32>
    %548 = arith.mulf %536, %547 : vector<8x128xf32>
    %549 = arith.addf %545, %548 : vector<8x128xf32>
    %550 = math.tanh %549 : vector<8x128xf32>
    %cst_156 = arith.constant 1.000000e+00 : f32
    %551 = vector.broadcast %cst_156 : f32 to vector<8x128xf32>
    %552 = arith.subf %551, %544 : vector<8x128xf32>
    %553 = arith.mulf %552, %550 : vector<8x128xf32>
    %554 = arith.mulf %544, %521 : vector<8x128xf32>
    %555 = arith.addf %553, %554 : vector<8x128xf32>
    %c7_i32_157 = arith.constant 7 : i32
    %c8_i32_158 = arith.constant 8 : i32
    %556 = arith.muli %c7_i32_157, %c8_i32_158 : i32
    %557 = tpu.assume_multiple %556, 8 : i32
    %558 = arith.index_cast %557 : i32 to index
    %c0_159 = arith.constant 0 : index
    %559 = vector.load %arg12[%558, %c0_159] : memref<64x384xf32, #tpu.memory_space<vmem>>, vector<8x384xf32>
    %560 = arith.truncf %555 : vector<8x128xf32> to vector<8x128xbf16>
    %c0_160 = arith.constant 0 : index
    %c0_161 = arith.constant 0 : index
    %561 = vector.load %arg6[%c0_160, %c0_161] : memref<128x384xbf16, #tpu.memory_space<vmem>>, vector<128x384xbf16>
    %cst_162 = arith.constant dense<0.000000e+00> : vector<8x384xf32>
    %562 = tpu.matmul %560, %561, %cst_162 {dimension_numbers = #tpu.dot_dimension_numbers<[1], [0], [0], [1], [0, 0, 1, 1], [], []>} : vector<8x128xbf16>, vector<128x384xbf16>, vector<8x384xf32> -> vector<8x384xf32>
    %563 = vector.extract_strided_slice %559 {offsets = [0, 0], sizes = [8, 128], strides = [1, 1]} : vector<8x384xf32> to vector<8x128xf32>
    %564 = vector.extract_strided_slice %562 {offsets = [0, 0], sizes = [8, 128], strides = [1, 1]} : vector<8x384xf32> to vector<8x128xf32>
    %565 = arith.addf %563, %564 : vector<8x128xf32>
    %566 = arith.negf %565 : vector<8x128xf32>
    %567 = math.exp %566 : vector<8x128xf32>
    %cst_163 = arith.constant 1.000000e+00 : f32
    %568 = vector.broadcast %cst_163 : f32 to vector<8x128xf32>
    %569 = arith.addf %568, %567 : vector<8x128xf32>
    %570 = arith.divf %568, %569 : vector<8x128xf32>
    %571 = vector.extract_strided_slice %559 {offsets = [0, 128], sizes = [8, 128], strides = [1, 1]} : vector<8x384xf32> to vector<8x128xf32>
    %572 = vector.extract_strided_slice %562 {offsets = [0, 128], sizes = [8, 128], strides = [1, 1]} : vector<8x384xf32> to vector<8x128xf32>
    %573 = arith.addf %571, %572 : vector<8x128xf32>
    %574 = arith.negf %573 : vector<8x128xf32>
    %575 = math.exp %574 : vector<8x128xf32>
    %cst_164 = arith.constant 1.000000e+00 : f32
    %576 = vector.broadcast %cst_164 : f32 to vector<8x128xf32>
    %577 = arith.addf %576, %575 : vector<8x128xf32>
    %578 = arith.divf %576, %577 : vector<8x128xf32>
    %579 = vector.extract_strided_slice %559 {offsets = [0, 256], sizes = [8, 128], strides = [1, 1]} : vector<8x384xf32> to vector<8x128xf32>
    %580 = vector.extract_strided_slice %562 {offsets = [0, 256], sizes = [8, 128], strides = [1, 1]} : vector<8x384xf32> to vector<8x128xf32>
    %581 = arith.addf %580, %316 : vector<8x128xf32>
    %582 = arith.mulf %570, %581 : vector<8x128xf32>
    %583 = arith.addf %579, %582 : vector<8x128xf32>
    %584 = math.tanh %583 : vector<8x128xf32>
    %cst_165 = arith.constant 1.000000e+00 : f32
    %585 = vector.broadcast %cst_165 : f32 to vector<8x128xf32>
    %586 = arith.subf %585, %578 : vector<8x128xf32>
    %587 = arith.mulf %586, %584 : vector<8x128xf32>
    %588 = arith.mulf %578, %555 : vector<8x128xf32>
    %589 = arith.addf %587, %588 : vector<8x128xf32>
    %c8_i32_166 = arith.constant 8 : i32
    %590 = arith.truncf %589 : vector<8x128xf32> to vector<8x128xbf16>
    %c0_167 = arith.constant 0 : index
    %c0_168 = arith.constant 0 : index
    %591 = vector.load %arg9[%c0_167, %c0_168] : memref<128x128xbf16, #tpu.memory_space<vmem>>, vector<128x128xbf16>
    %cst_169 = arith.constant dense<0.000000e+00> : vector<8x128xf32>
    %592 = tpu.matmul %590, %591, %cst_169 {dimension_numbers = #tpu.dot_dimension_numbers<[1], [0], [0], [1], [0, 0, 1, 1], [], []>} : vector<8x128xbf16>, vector<128x128xbf16>, vector<8x128xf32> -> vector<8x128xf32>
    %c0_170 = arith.constant 0 : index
    %c0_171 = arith.constant 0 : index
    %593 = vector.load %arg10[%c0_170, %c0_171] : memref<1x128xf32, #tpu.memory_space<vmem>>, vector<1x128xf32>
    %594 = vector.broadcast %593 : vector<1x128xf32> to vector<8x128xf32>
    %595 = arith.addf %592, %594 : vector<8x128xf32>
    %c0_172 = arith.constant 0 : index
    %c0_173 = arith.constant 0 : index
    %596 = vector.load %arg11[%c0_172, %c0_173] : memref<8x128xf32, #tpu.memory_space<vmem>>, vector<8x128xf32>
    tpu.vector_store %arg11[%c0_172, %c0_173], %595 {strides = array<i32>} : memref<8x128xf32, #tpu.memory_space<vmem>>, vector<8x128xf32>,
    return
  }
}

</mosaic_0001>

<bundles_post_ra>
// kernel: pose_scoring_forward.1
= control target key start
LH: loop header
LB: loop body
LE: loop exit
PB: predicated region body
PF: predicated region fallthrough
CT: control target
= control target key end

     0   :  { %16 = vsyncpa [#allocation5], 0  ;;  %s6205_s0 = inlined_call_operand.vmem [shape: bf16[64,128], index: 0, kind: input, shape index: {}]   ;;  %s6206_s1 = inlined_call_operand.hbm [shape: bf16[128,384], index: 1, kind: input, shape index: {}]   ;;  %s6207_s2 = inlined_call_operand.hbm [shape: bf16[128,384], index: 2, kind: input, shape index: {}]   ;;  %s6208_s3 = inlined_call_operand.vmem [shape: f32[1,384], index: 3, kind: input, shape index: {}]   ;;  %s6209_s4 = inlined_call_operand.vmem [shape: f32[1,128], index: 4, kind: input, shape index: {}]   ;;  %s6210_s5 = inlined_call_operand.hbm [shape: bf16[128,384], index: 5, kind: input, shape index: {}]   ;;  %s6211_s6 = inlined_call_operand.hbm [shape: bf16[128,384], index: 6, kind: input, shape index: {}]   ;;  %s6212_s7 = inlined_call_operand.vmem [shape: f32[1,384], index: 7, kind: input, shape index: {}]   ;;  %s6213_s8 = inlined_call_operand.vmem [shape: f32[1,128], index: 8, kind: input, shape index: {}]   ;;  %s6214_s9 = inlined_call_operand.vmem [shape: bf16[128,128], index: 9, kind: input, shape index: {}]   ;;  %s6215_s10 = inlined_call_operand.vmem [shape: f32[1,128], index: 10, kind: input, shape index: {}]   ;;  %s6216_s11 = inlined_call_operand.vmem [shape: f32[8,128], index: 11, kind: output, shape index: {}]  }
   0x1   :  { %17 = vsyncpa [#allocation7], 0 }
   0x2   :  { %18 = vsyncpa [#allocation10], 0  ;;  %s38_s19 = sshll.u32 %s6207_s2, 4  ;;  %s5470_s20 = smov [#allocation6]   ;;  %s39_s19 = int_to_ptr.hbm [resolvable:$true] %s38_s19 }
   0x3   :  { %s40_s21 = sshll.u32 %s5470_s20, 4  ;;  %s25_s24 = sshll.u32 %s6206_s1, 4  ;;  %s41_s21 = int_to_ptr.vmem [resolvable:$true] %s40_s21  ;;  %s26_s24 = int_to_ptr.hbm [resolvable:$true] %s25_s24 }
   0x4   :  { %s5471_s25 = smov 192   ;;  %s5472_s26 = smov 12  }
   0x5   :  { %46 = dma.hbm_to_vmem [thread:$0]  %s39_s19, 3072, %s41_s21, [#allocation7], %s5471_s25, %s5471_s25, %s5472_s26  }
   0x6   :  { %s5473_s27 = smov [#allocation4]   ;;  %s55_s12 = sshll.u32 %s6210_s5, 4  ;;  %s56_s12 = int_to_ptr.hbm [resolvable:$true] %s55_s12 }
   0x7   :  { %s27_s28 = sshll.u32 %s5473_s27, 4  ;;  %s68_s14 = sshll.u32 %s6211_s6, 4  ;;  %s28_s28 = int_to_ptr.vmem [resolvable:$true] %s27_s28  ;;  %s69_s14 = int_to_ptr.hbm [resolvable:$true] %s68_s14 }
   0x8   :  { %33 = dma.hbm_to_vmem [thread:$0]  %s26_s24, 3072, %s28_s28, [#allocation5], %s5471_s25, %s5471_s25, %s5472_s26  }
   0x9   :  { %s5474_s15 = smov [#allocation8]   ;;  %s5475_s1 = smov [#allocation9]  }
   0xa   :  { %s57_s16 = sshll.u32 %s5474_s15, 4  ;;  %s70_s17 = sshll.u32 %s5475_s1, 4  ;;  %s58_s16 = int_to_ptr.vmem [resolvable:$true] %s57_s16  ;;  %s71_s17 = int_to_ptr.vmem [resolvable:$true] %s70_s17 }
   0xb   :  { %63 = dma.hbm_to_vmem [thread:$0]  %s56_s12, 3072, %s58_s16, [#allocation7], %s5471_s25, %s5471_s25, %s5472_s26  }
   0xc   :  { %76 = dma.hbm_to_vmem [thread:$0]  %s69_s14, 3072, %s71_s17, [#allocation10], %s5471_s25, %s5471_s25, %s5472_s26  }
   0xd   :  { %5464 = dma.done.wait [#allocation5], 3072  }
   0xe   :  { %5465 = vsyncadd [#allocation5], 4294964224 }
   0xf   :  { %5466 = dma.done.wait [#allocation7], 6144  }
  0x10   :  { %5467 = vsyncadd [#allocation7], 4294961152 }
  0x11   :  { %5468 = dma.done.wait [#allocation10], 3072  }
  0x12   :  { %5469 = vsyncadd [#allocation10], 4294964224  ;;  %v3865_v0 = vld [vmem:[#allocation4 + $0xa8] sm:$0xf]  ;;  %v4941_v1 = vld [vmem:[#allocation4 + $0xb0] sm:$0xf0] }
  0x13   :  { %v3961_v2 = vld [vmem:[#allocation6 + $0xa8] sm:$0xf]  ;;  %v3866_v3 = vor.u32 %v4941_v1, %v3865_v0  ;;  %v4965_v4 = vld [vmem:[#allocation6 + $0xb0] sm:$0xf0]  ;;  %v3853_v5 = vld [vmem:[#allocation4 + $0x90] sm:$0xf] }
  0x14   :  { %v4938_v6 = vld [vmem:[#allocation4 + $0x98] sm:$0xf0]  ;;  %v3962_v7 = vor.u32 %v4965_v4, %v3961_v2  ;;  %v3949_v8 = vld [vmem:[#allocation6 + $0x90] sm:$0xf]  ;;  %v3841_v12 = vld [vmem:[#allocation4 + $0x78] sm:$0xf] }
  0x15   :  { %v4962_v9 = vld [vmem:[#allocation6 + $0x98] sm:$0xf0]  ;;  %302 = vmatpush.bf16.msra.mxu0 %v3866_v3  ;;  %v3854_v10 = vor.u32 %v4938_v6, %v3853_v5  ;;  %v4935_v13 = vld [vmem:[#allocation4 + $0x80] sm:$0xf0]  ;;  %v3937_v14 = vld [vmem:[#allocation6 + $0x78] sm:$0xf] }
  0x16   :  { %583 = vmatpush.bf16.msra.mxu3 %v3962_v7  ;;  %v3950_v11 = vor.u32 %v4962_v9, %v3949_v8  ;;  %v4959_v15 = vld [vmem:[#allocation6 + $0x80] sm:$0xf0]  ;;  %v3842_v16 = vor.u32 %v4935_v13, %v3841_v12  ;;  %v3829_v18 = vld [vmem:[#allocation4 + $0x60] sm:$0xf]  ;;  %v4932_v19 = vld [vmem:[#allocation4 + $0x68] sm:$0xf0] }
  0x17   :  { %v3938_v17 = vor.u32 %v4959_v15, %v3937_v14  ;;  %v3925_v20 = vld [vmem:[#allocation6 + $0x60] sm:$0xf]  ;;  %v4956_v21 = vld [vmem:[#allocation6 + $0x68] sm:$0xf0]  ;;  %v3830_v22 = vor.u32 %v4932_v19, %v3829_v18  ;;  %v3817_v23 = vld [vmem:[#allocation4 + $0x48] sm:$0xf] }
  0x18   :  { %v3926_v24 = vor.u32 %v4956_v21, %v3925_v20  ;;  %v4929_v25 = vld [vmem:[#allocation4 + $0x50] sm:$0xf0]  ;;  %v4940_v26 = vld [vmem:[#allocation4 + $0xac] sm:$0xf]  ;;  %v3867_v27 = vld [vmem:[#allocation4 + $0xb4] sm:$0xf0] }
  0x19   :  { %303 = vmatpush.bf16.msra.mxu0 %v3854_v10  ;;  %v3913_v28 = vld [vmem:[#allocation6 + $0x48] sm:$0xf]  ;;  %v4953_v29 = vld [vmem:[#allocation6 + $0x50] sm:$0xf0]  ;;  %v3870_v30 = vor.u32 %v4940_v26, %v3867_v27  ;;  %v3855_v32 = vld [vmem:[#allocation4 + $0x9c] sm:$0xf0]  ;;  %v3818_v33 = vor.u32 %v4929_v25, %v3817_v23 }
  0x1a   :  { %584 = vmatpush.bf16.msra.mxu3 %v3950_v11  ;;  %v4937_v31 = vld [vmem:[#allocation4 + $0x94] sm:$0xf]  ;;  %v3805_v34 = vld [vmem:[#allocation4 + $0x30] sm:$0xf]  ;;  %v3914_v36 = vor.u32 %v4953_v29, %v3913_v28  ;;  %v4926_v37 = vld [vmem:[#allocation4 + $0x38] sm:$0xf0] }
  0x1b   :  { %331 = vmatpush.bf16.msra.mxu1 %v3870_v30  ;;  %v3858_v35 = vor.u32 %v4937_v31, %v3855_v32  ;;  %v4934_v38 = vld [vmem:[#allocation4 + $0x7c] sm:$0xf]  ;;  %v3843_v39 = vld [vmem:[#allocation4 + $0x84] sm:$0xf0]  ;;  %v3901_v40 = vld [vmem:[#allocation6 + $0x30] sm:$0xf]  ;;  %v3806_v42 = vor.u32 %v4926_v37, %v3805_v34 }
  0x1c   :  { %v4950_v41 = vld [vmem:[#allocation6 + $0x38] sm:$0xf0]  ;;  %v3793_v43 = vld [vmem:[#allocation4 + $0x18] sm:$0xf]  ;;  %v4923_v44 = vld [vmem:[#allocation4 + $0x20] sm:$0xf0]  ;;  %v3846_v46 = vor.u32 %v4934_v38, %v3843_v39 }
  0x1d   :  { %304 = vmatpush.bf16.msra.mxu0 %v3842_v16  ;;  %v3889_v45 = vld [vmem:[#allocation6 + $0x18] sm:$0xf]  ;;  %v3902_v47 = vor.u32 %v4950_v41, %v3901_v40  ;;  %v4931_v48 = vld [vmem:[#allocation4 + $0x64] sm:$0xf]  ;;  %v3831_v49 = vld [vmem:[#allocation4 + $0x6c] sm:$0xf0]  ;;  %v3794_v56 = vor.u32 %v4923_v44, %v3793_v43 }
  0x1e   :  { %585 = vmatpush.bf16.msra.mxu3 %v3938_v17  ;;  %v4947_v50 = vld [vmem:[#allocation6 + $0x20] sm:$0xf0]  ;;  %v3873_v51 = vld [vmem:[#allocation4 + $0xb0] sm:$0xf]  ;;  %v4942_v52 = vld [vmem:[#allocation4 + $0xb8] sm:$0xf0]  ;;  %v3834_v58 = vor.u32 %v4931_v48, %v3831_v49 }
  0x1f   :  { %332 = vmatpush.bf16.msra.mxu1 %v3858_v35  ;;  %v3781_v53 = vld [vmem:[#allocation4] sm:$0xf]  ;;  %v4920_v54 = vld [vmem:[#allocation4 + $0x8] sm:$0xf0]  ;;  %v3874_v55 = vor.u32 %v4942_v52, %v3873_v51  ;;  %v3890_v59 = vor.u32 %v4947_v50, %v3889_v45  ;;  %v3819_v62 = vld [vmem:[#allocation4 + $0x54] sm:$0xf0] }
  0x20   :  { %v3877_v57 = vld [vmem:[#allocation6] sm:$0xf]  ;;  %v4944_v60 = vld [vmem:[#allocation6 + $0x8] sm:$0xf0]  ;;  %v3969_v63 = vld [vmem:[#allocation6 + $0xb0] sm:$0xf]  ;;  %v3782_v5 = vor.u32 %v4920_v54, %v3781_v53 }
  0x21   :  { %305 = vmatpush.bf16.msra.mxu0 %v3830_v22  ;;  %v4928_v61 = vld [vmem:[#allocation4 + $0x4c] sm:$0xf]  ;;  %360 = vmatpush.bf16.msra.mxu2 %v3874_v55  ;;  %v4966_v0 = vld [vmem:[#allocation6 + $0xb8] sm:$0xf0]  ;;  %v3861_v1 = vld [vmem:[#allocation4 + $0x98] sm:$0xf]  ;;  %v3878_v8 = vor.u32 %v4944_v60, %v3877_v57 }
  0x22   :  { %586 = vmatpush.bf16.msra.mxu3 %v3926_v24  ;;  %v4964_v2 = vld [vmem:[#allocation6 + $0xac] sm:$0xf]  ;;  %v3963_v3 = vld [vmem:[#allocation6 + $0xb4] sm:$0xf0]  ;;  %v4939_v4 = vld [vmem:[#allocation4 + $0xa0] sm:$0xf0]  ;;  %v3822_v6 = vor.u32 %v4928_v61, %v3819_v62  ;;  %v3970_v9 = vor.u32 %v4966_v0, %v3969_v63 }
  0x23   :  { %333 = vmatpush.bf16.msra.mxu1 %v3846_v46  ;;  %v3862_v7 = vor.u32 %v4939_v4, %v3861_v1  ;;  %v3957_v10 = vld [vmem:[#allocation6 + $0x98] sm:$0xf]  ;;  %v4925_v11 = vld [vmem:[#allocation4 + $0x34] sm:$0xf]  ;;  %v3807_v12 = vld [vmem:[#allocation4 + $0x3c] sm:$0xf0]  ;;  %v3966_v13 = vor.u32 %v4964_v2, %v3963_v3 }
  0x24   :  { %v4963_v14 = vld [vmem:[#allocation6 + $0xa0] sm:$0xf0]  ;;  %v3849_v15 = vld [vmem:[#allocation4 + $0x80] sm:$0xf]  ;;  %v4936_v16 = vld [vmem:[#allocation4 + $0x88] sm:$0xf0]  ;;  %v3810_v21 = vor.u32 %v4925_v11, %v3807_v12 }
  0x25   :  { %306 = vmatpush.bf16.msra.mxu0 %v3818_v33  ;;  %361 = vmatpush.bf16.msra.mxu2 %v3862_v7  ;;  %v5552_v17 = vld [vmem:[%s6205_s0] sm:$0xff]  ;;  %v4961_v18 = vld [vmem:[#allocation6 + $0x94] sm:$0xf]  ;;  %v3850_v20 = vor.u32 %v4936_v16, %v3849_v15  ;;  %v3958_v22 = vor.u32 %v4963_v14, %v3957_v10  ;;  %v4922_v24 = vld [vmem:[#allocation4 + $0x1c] sm:$0xf]  ;;  %v5476_v34 = vmov 0  }
  0x26   :  { %587 = vmatpush.bf16.msra.mxu3 %v3914_v36  ;;  %v3951_v19 = vld [vmem:[#allocation6 + $0x9c] sm:$0xf0]  ;;  %v3795_v25 = vld [vmem:[#allocation4 + $0x24] sm:$0xf0]  ;;  %v4960_v27 = vld [vmem:[#allocation6 + $0x88] sm:$0xf0] }
  0x27   :  { %334 = vmatpush.bf16.msra.mxu1 %v3834_v58  ;;  %v3945_v23 = vld [vmem:[#allocation6 + $0x80] sm:$0xf]  ;;  %v3954_v26 = vor.u32 %v4961_v18, %v3951_v19  ;;  %v3837_v28 = vld [vmem:[#allocation4 + $0x68] sm:$0xf]  ;;  %v4933_v29 = vld [vmem:[#allocation4 + $0x70] sm:$0xf0]  ;;  %v3798_v35 = vor.u32 %v4922_v24, %v3795_v25 }
  0x28   :  { %v4958_v30 = vld [vmem:[#allocation6 + $0x7c] sm:$0xf]  ;;  %v3939_v31 = vld [vmem:[#allocation6 + $0x84] sm:$0xf0]  ;;  %v3838_v32 = vor.u32 %v4933_v29, %v3837_v28  ;;  %v3825_v33 = vld [vmem:[#allocation4 + $0x50] sm:$0xf]  ;;  %v3946_v37 = vor.u32 %v4960_v27, %v3945_v23 }
  0x29   :  { %307 = vmatpush.bf16.msra.mxu0 %v3806_v42  ;;  %362 = vmatpush.bf16.msra.mxu2 %v3850_v20  ;;  %v4930_v36 = vld [vmem:[#allocation4 + $0x58] sm:$0xf0]  ;;  %v4919_v38 = vld [vmem:[#allocation4 + $0x4] sm:$0xf]  ;;  %v3783_v39 = vld [vmem:[#allocation4 + $0xc] sm:$0xf0]  ;;  %v3942_v40 = vor.u32 %v4958_v30, %v3939_v31 }
  0x2a   :  { %588 = vmatpush.bf16.msra.mxu3 %v3902_v47  ;;  %v4955_v41 = vld [vmem:[#allocation6 + $0x64] sm:$0xf]  ;;  %v3933_v42 = vld [vmem:[#allocation6 + $0x68] sm:$0xf]  ;;  %v4957_v43 = vld [vmem:[#allocation6 + $0x70] sm:$0xf0]  ;;  %v3826_v44 = vor.u32 %v4930_v36, %v3825_v33  ;;  %v3786_v48 = vor.u32 %v4919_v38, %v3783_v39 }
  0x2b   :  { %335 = vmatpush.bf16.msra.mxu1 %v3822_v6  ;;  %v3927_v45 = vld [vmem:[#allocation6 + $0x6c] sm:$0xf0]  ;;  %v3813_v46 = vld [vmem:[#allocation4 + $0x38] sm:$0xf]  ;;  %v4927_v47 = vld [vmem:[#allocation4 + $0x40] sm:$0xf0]  ;;  %v3934_v49 = vor.u32 %v4957_v43, %v3933_v42 }
  0x2c   :  { %v3930_v50 = vor.u32 %v4955_v41, %v3927_v45  ;;  %v4952_v51 = vld [vmem:[#allocation6 + $0x4c] sm:$0xf]  ;;  %v3921_v52 = vld [vmem:[#allocation6 + $0x50] sm:$0xf]  ;;  %v4954_v53 = vld [vmem:[#allocation6 + $0x58] sm:$0xf0]  ;;  %v3814_v54 = vor.u32 %v4927_v47, %v3813_v46 }
  0x2d   :  { %308 = vmatpush.bf16.msra.mxu0 %v3794_v56  ;;  %363 = vmatpush.bf16.msra.mxu2 %v3838_v32  ;;  %v3915_v55 = vld [vmem:[#allocation6 + $0x54] sm:$0xf0]  ;;  %v3801_v56 = vld [vmem:[#allocation4 + $0x20] sm:$0xf]  ;;  %v4924_v57 = vld [vmem:[#allocation4 + $0x28] sm:$0xf0]  ;;  %v3922_v58 = vor.u32 %v4954_v53, %v3921_v52 }
  0x2e   :  { %589 = vmatpush.bf16.msra.mxu3 %v3890_v59  ;;  %v3918_v59 = vor.u32 %v4952_v51, %v3915_v55  ;;  %v3909_v60 = vld [vmem:[#allocation6 + $0x38] sm:$0xf]  ;;  %v4951_v61 = vld [vmem:[#allocation6 + $0x40] sm:$0xf0]  ;;  %v3802_v62 = vor.u32 %v4924_v57, %v3801_v56  ;;  %v4916_v63 = vld [vmem:[%s6205_s0 + $0x8] sm:$0xff] }
  0x2f   :  { %336 = vmatpush.bf16.msra.mxu1 %v3810_v21  ;;  %v4949_v0 = vld [vmem:[#allocation6 + $0x34] sm:$0xf]  ;;  %v3903_v1 = vld [vmem:[#allocation6 + $0x3c] sm:$0xf0]  ;;  %v3910_v2 = vor.u32 %v4951_v61, %v3909_v60  ;;  %v4946_v4 = vld [vmem:[#allocation6 + $0x1c] sm:$0xf] }
  0x30   :  { %v3906_v3 = vor.u32 %v4949_v0, %v3903_v1  ;;  %v4921_v6 = vld [vmem:[#allocation4 + $0x10] sm:$0xf0]  ;;  %v3891_v7 = vld [vmem:[#allocation6 + $0x24] sm:$0xf0]  ;;  %v4943_v15 = vld [vmem:[#allocation6 + $0x4] sm:$0xf] }
  0x31   :  { %309 = vmatpush.bf16.msra.mxu0 %v3782_v5  ;;  %364 = vmatpush.bf16.msra.mxu2 %v3826_v44  ;;  %v3789_v5 = vld [vmem:[#allocation4 + $0x8] sm:$0xf]  ;;  %v3894_v12 = vor.u32 %v4946_v4, %v3891_v7  ;;  %v4945_v14 = vld [vmem:[#allocation6 + $0x10] sm:$0xf0]  ;;  %v3879_v16 = vld [vmem:[#allocation6 + $0xc] sm:$0xf0] }
  0x32   :  { %590 = vmatpush.bf16.msra.mxu3 %v3878_v8  ;;  %v3897_v8 = vld [vmem:[#allocation6 + $0x20] sm:$0xf]  ;;  %v3790_v10 = vor.u32 %v4921_v6, %v3789_v5  ;;  %v3882_v19 = vor.u32 %v4943_v15, %v3879_v16  ;;  %v4917_v20 = vld [vmem:[%s6205_s0 + $0x10] sm:$0xff]  ;;  %v4918_v21 = vld [vmem:[%s6205_s0 + $0x18] sm:$0xff] }
  0x33   :  { %337 = vmatpush.bf16.msra.mxu1 %v3798_v35  ;;  %v4988_v23 = vld [vmem:[#allocation6 + $0xac] sm:$0xf]  ;;  %v4061_v25 = vld [vmem:[#allocation6 + $0xb4] sm:$0xf0]  ;;  %v4047_v27 = vld [vmem:[#allocation6 + $0x90] sm:$0xf] }
  0x34   :  { %310 = vmatmul.bf16.vlgmr.msra.gmra.mxu0 %v5552_v17  ;;  %v4986_v28 = vld [vmem:[#allocation6 + $0x98] sm:$0xf0]  ;;  %v4985_v29 = vld [vmem:[#allocation6 + $0x94] sm:$0xf]  ;;  %v4049_v31 = vld [vmem:[#allocation6 + $0x9c] sm:$0xf0] }
  0x35   :  { %609 = vmatpush.bf16.msrb.mxu0 %v3970_v9  ;;  %591 = vmatmul.bf16.vlgmr.msra.gmra.mxu3 %v5476_v34  ;;  %v4948_v9 = vld [vmem:[#allocation6 + $0x28] sm:$0xf0]  ;;  %v4048_v30 = vor.u32 %v4986_v28, %v4047_v27  ;;  %v4052_v32 = vor.u32 %v4985_v29, %v4049_v31  ;;  %v5572_v36 = vld [vmem:[%s6208_s3] sm:$0x7]  ;;  %v4067_v44 = vld [vmem:[#allocation6 + $0xb0] sm:$0xf] }
  0x36   :  { %596 = vmatpush.bf16.msrb.mxu3 %v3966_v13  ;;  %365 = vmatpush.bf16.msra.mxu2 %v3814_v54  ;;  %v3898_v11 = vor.u32 %v4948_v9, %v3897_v8  ;;  %v3885_v13 = vld [vmem:[#allocation6 + $0x8] sm:$0xf]  ;;  %v5577_v38 = vperm.slane %v5572_v36, 0  ;;  %v4990_v45 = vld [vmem:[#allocation6 + $0xb8] sm:$0xf0]  ;;  %v5586_v52 = vperm.slane %v5572_v36, 1 }
  0x37   :  { %338 = vmatpush.bf16.msra.mxu1 %v3786_v48  ;;  %v3886_v18 = vor.u32 %v4945_v14, %v3885_v13  ;;  %v4068_v46 = vor.u32 %v4990_v45, %v4067_v44  ;;  %v4055_v48 = vld [vmem:[#allocation6 + $0x98] sm:$0xf]  ;;  %v4983_v54 = vld [vmem:[#allocation6 + $0x80] sm:$0xf0]  ;;  %v4982_v55 = vld [vmem:[#allocation6 + $0x7c] sm:$0xf] }
  0x38   :  { %v4035_v53 = vld [vmem:[#allocation6 + $0x78] sm:$0xf]  ;;  %v4037_v57 = vld [vmem:[#allocation6 + $0x84] sm:$0xf0]  ;;  %v4023_v61 = vld [vmem:[#allocation6 + $0x60] sm:$0xf] }
  0x39   :  { %610 = vmatpush.bf16.msrb.mxu0 %v3958_v22  ;;  %v4989_v22 = vld [vmem:[#allocation6 + $0xb0] sm:$0xf0]  ;;  %v4036_v56 = vor.u32 %v4983_v54, %v4035_v53  ;;  %v4040_v60 = vor.u32 %v4982_v55, %v4037_v57  ;;  %v4011_v6 = vld [vmem:[#allocation6 + $0x48] sm:$0xf]  ;;  %v4976_v9 = vld [vmem:[#allocation6 + $0x4c] sm:$0xf] }
  0x3a   :  { %597 = vmatpush.bf16.msrb.mxu3 %v3954_v26  ;;  %339 = vmatmul.bf16.vlgmr.msra.gmra.mxu1 %v5552_v17  ;;  %v4064_v26 = vor.u32 %v4988_v23, %v4061_v25  ;;  %v4977_v7 = vld [vmem:[#allocation6 + $0x50] sm:$0xf0]  ;;  %v4031_v13 = vld [vmem:[#allocation6 + $0x68] sm:$0xf]  ;;  %v4978_v27 = vld [vmem:[#allocation6 + $0x58] sm:$0xf0] }
  0x3b   :  { %366 = vmatpush.bf16.msra.mxu2 %v3802_v62  ;;  %v4980_v62 = vld [vmem:[#allocation6 + $0x68] sm:$0xf0]  ;;  %v4012_v15 = vor.u32 %v4977_v7, %v4011_v6  ;;  %v4981_v16 = vld [vmem:[#allocation6 + $0x70] sm:$0xf0]  ;;  %v4967_v55 = vld [vmem:[#allocation6 + $0x4] sm:$0xf] }
  0x3c   :  { %v4973_v23 = vld [vmem:[#allocation6 + $0x34] sm:$0xf]  ;;  %v5606_v6 = vperm.slane %v5572_v36, 2  ;;  %v5617_v36 = vld [vmem:[%s6209_s4] ss:$0 sm:$0xff] }
  0x3d   :  { %611 = vmatpush.bf16.msrb.mxu0 %v3946_v37 }
  0x3e   :  { %598 = vmatpush.bf16.msrb.mxu3 %v3942_v40 }
  0x3f   :  { %367 = vmatpush.bf16.msra.mxu2 %v3790_v10  ;;  %v4013_v10 = vld [vmem:[#allocation6 + $0x54] sm:$0xf0] }
  0x41   :  { %612 = vmatpush.bf16.msrb.mxu0 %v3934_v49  ;;  %v4987_v49 = vld [vmem:[#allocation6 + $0xa0] sm:$0xf0] }
  0x42   :  { %599 = vmatpush.bf16.msrb.mxu3 %v3930_v50  ;;  %368 = vmatmul.bf16.vlgmr.msra.gmra.mxu2 %v5552_v17  ;;  %v4059_v17 = vld [vmem:[#allocation6 + $0xa8] sm:$0xf]  ;;  %v4056_v51 = vor.u32 %v4987_v49, %v4055_v48  ;;  %v3975_v49 = vld [vmem:[#allocation6] sm:$0xf] }
  0x43   :  { %v4060_v24 = vor.u32 %v4989_v22, %v4059_v17  ;;  %851 = vmatpush.bf16.msrb.mxu2 %v4064_v26  ;;  %v4032_v17 = vor.u32 %v4981_v16, %v4031_v13  ;;  %v4019_v26 = vld [vmem:[#allocation6 + $0x50] sm:$0xf] }
  0x44   :  { %315 = vmatmul.bf16.gmra.mxu0 %v4916_v63  ;;  %v4020_v29 = vor.u32 %v4978_v27, %v4019_v26 }
  0x45   :  { %613 = vmatpush.bf16.msrb.mxu0 %v3922_v58  ;;  %838 = vmatpush.bf16.msrb.mxu1 %v4060_v24  ;;  %v4043_v58 = vld [vmem:[#allocation6 + $0x80] sm:$0xf] }
  0x46   :  { %600 = vmatpush.bf16.msrb.mxu3 %v3918_v59  ;;  %v4984_v59 = vld [vmem:[#allocation6 + $0x88] sm:$0xf0]  ;;  %v4001_v24 = vld [vmem:[#allocation6 + $0x3c] sm:$0xf0] }
  0x47   :  { %852 = vmatpush.bf16.msrb.mxu2 %v4052_v32  ;;  %v4044_v0 = vor.u32 %v4984_v59, %v4043_v58  ;;  %v4004_v31 = vor.u32 %v4973_v23, %v4001_v24  ;;  %v3987_v32 = vld [vmem:[#allocation6 + $0x18] sm:$0xf] }
  0x49   :  { %614 = vmatpush.bf16.msrb.mxu0 %v3910_v2  ;;  %839 = vmatpush.bf16.msrb.mxu1 %v4048_v30  ;;  %v4024_v2 = vor.u32 %v4980_v62, %v4023_v61  ;;  %v4969_v61 = vld [vmem:[#allocation6 + $0x10] sm:$0xf0] }
  0x4a   :  { %601 = vmatpush.bf16.msrb.mxu3 %v3906_v3  ;;  %344 = vmatmul.bf16.gmra.mxu1 %v4916_v63  ;;  %v4025_v3 = vld [vmem:[#allocation6 + $0x6c] sm:$0xf0] }
  0x4b   :  { %853 = vmatpush.bf16.msrb.mxu2 %v4040_v60  ;;  %v3983_v60 = vld [vmem:[#allocation6 + $0x8] sm:$0xf] }
  0x4d   :  { %615 = vmatpush.bf16.msrb.mxu0 %v3898_v11  ;;  %840 = vmatpush.bf16.msrb.mxu1 %v4036_v56  ;;  %v3977_v56 = vld [vmem:[#allocation6 + $0xc] sm:$0xf0] }
  0x4e   :  { %602 = vmatpush.bf16.msrb.mxu3 %v3894_v12 }
  0x51   :  { %616 = vmatpush.bf16.msrb.mxu0 %v3886_v18  ;;  %841 = vmatpush.bf16.msrb.mxu1 %v4024_v2  ;;  %v4016_v18 = vor.u32 %v4976_v9, %v4013_v10 }
  0x52   :  { %603 = vmatpush.bf16.msrb.mxu3 %v3882_v19  ;;  %373 = vmatmul.bf16.gmra.mxu2 %v4916_v63  ;;  %v4979_v63 = vld [vmem:[#allocation6 + $0x64] sm:$0xf] }
  0x53   :  { %v4028_v5 = vor.u32 %v4979_v63, %v4025_v3 }
  0x54   :  { %320 = vmatmul.bf16.gmra.mxu0 %v4917_v20 }
  0x55   :  { %604 = vmatmul.bf16.vlgmr.msrb.gmra.mxu3 %v5476_v34  ;;  %854 = vmatpush.bf16.msrb.mxu2 %v4028_v5 }
  0x56   :  { %864 = vmatpush.bf16.msra.mxu3 %v4068_v46  ;;  %842 = vmatpush.bf16.msrb.mxu1 %v4012_v15  ;;  %v3995_v46 = vld [vmem:[#allocation6 + $0x20] sm:$0xf] }
  0x59   :  { %855 = vmatpush.bf16.msrb.mxu2 %v4016_v18 }
  0x5a   :  { %349 = vmatmul.bf16.gmra.mxu1 %v4917_v20  ;;  %865 = vmatpush.bf16.msra.mxu3 %v4056_v51  ;;  %v4968_v51 = vld [vmem:[#allocation6 + $0x8] sm:$0xf0] }
  0x5b   :  { %v3976_v59 = vor.u32 %v4968_v51, %v3975_v49 }
  0x5d   :  { %856 = vmatpush.bf16.msrb.mxu2 %v4004_v31 }
  0x5e   :  { %866 = vmatpush.bf16.msra.mxu3 %v4044_v0  ;;  %v3980_v0 = vor.u32 %v4967_v55, %v3977_v56 }
  0x62   :  { %378 = vmatmul.bf16.gmra.mxu2 %v4917_v20  ;;  %v3999_v20 = vld [vmem:[#allocation6 + $0x30] sm:$0xf]  ;;  %867 = vmatpush.bf16.msra.mxu3 %v4032_v17 }
  0x64   :  { %325 = vmatmul.bf16.gmra.mxu0 %v4918_v21 }
  0x66   :  { %868 = vmatpush.bf16.msra.mxu3 %v4020_v29 }
  0x6a   :  { %354 = vmatmul.bf16.gmra.mxu1 %v4918_v21 }
  0x72   :  { %383 = vmatmul.bf16.gmra.mxu2 %v4918_v21  ;;  %v4974_v21 = vld [vmem:[#allocation6 + $0x38] sm:$0xf0] }
  0x73   :  { %v4000_v28 = vor.u32 %v4974_v21, %v3999_v20 }
  0x74   :  { %617 = vmatmul.bf16.vlgmr.msrb.gmra.mxu0 %v5476_v34 }
  0x75   :  { %843 = vmatpush.bf16.msrb.mxu1 %v4000_v28 }
  0xb1   :  { %v311_v33 = vpop.f32.mrf.mxu0 }
  0xb2   :  { %v312_v39 = vadd.f32 %v311_v33, %v5577_v38  ;;  %v4971_v33 = vld [vmem:[#allocation6 + $0x20] sm:$0xf0] }
  0xb3   :  { %v3988_v44 = vor.u32 %v4971_v33, %v3987_v32 }
  0xb5   :  { %844 = vmatpush.bf16.msrb.mxu1 %v3988_v44 }
  0xb7   :  { %v340_v1 = vpop.f32.mrf.mxu1 }
  0xb8   :  { %v592_v35 = vpop.f32.mrf.mxu3  ;;  %v341_v12 = vadd.f32 %v340_v1, %v5586_v52 }
  0xb9   :  { %v5574_v37 = vpop.f32.mrf.mxu0  ;;  %v622_v42 = vadd.f32 %v592_v35, %v312_v39  ;;  %v4970_v39 = vld [vmem:[#allocation6 + $0x1c] sm:$0xf]  ;;  %845 = vmatpush.bf16.msrb.mxu1 %v3976_v59 }
  0xbb   :  { %v3971_v47 = vmul.f32 -1.442695, %v622_v42  ;;  %v4975_v42 = vld [vmem:[#allocation6 + $0x40] sm:$0xf0] }
  0xbd   :  { %5205 = vpow2.f32 %v3971_v47  ;;  %v4972_v47 = vld [vmem:[#allocation6 + $0x28] sm:$0xf0] }
  0xbe   :  { %v3996_v58 = vor.u32 %v4972_v47, %v3995_v46 }
  0xc0   :  { %v594_v40 = vpop.f32.mrf.mxu3 }
  0xc1   :  { %v316_v41 = vpop.f32.mrf.mxu0  ;;  %v3989_v40 = vld [vmem:[#allocation6 + $0x24] sm:$0xf0] }
  0xc2   :  { %v5581_v43 = vadd.f32 %v316_v41, %v5577_v38  ;;  %v4007_v41 = vld [vmem:[#allocation6 + $0x38] sm:$0xf]  ;;  %v3992_v48 = vor.u32 %v4970_v39, %v3989_v40 }
  0xc3   :  { %v5206_v4 = vpop.eup %5205  ;;  %v4008_v45 = vor.u32 %v4975_v42, %v4007_v41 }
  0xc4   :  { %v5592_v14 = vadd.f32 1.0, %v5206_v4  ;;  %857 = vmatpush.bf16.msrb.mxu2 %v3992_v48  ;;  %v3984_v4 = vor.u32 %v4969_v61, %v3983_v60  ;;  %v4157_v61 = vld [vmem:[#allocation6 + $0xa8] sm:$0xf] }
  0xc5   :  { %v5594_v19 = vpop.f32.mrf.mxu2  ;;  %869 = vmatpush.bf16.msra.mxu3 %v4008_v45 }
  0xc6   :  { %5207 = vrcp.f32 %v5592_v14  ;;  %v638_v18 = vand.u32 2147483648, %v5592_v14  ;;  %vm632_vm1 = vweird.f32 %v5592_v14  ;;  %v636_v20 = vand.u32 2147483647, %v5592_v14 }
  0xc8   :  { %858 = vmatpush.bf16.msrb.mxu2 %v3980_v0  ;;  %v639_v24 = vor.u32 1.1754944e-38, %v638_v18  ;;  %vm637_vm3 = vcmp.eq.f32.partialorder %v636_v20, 8.507059e+37  ;;  %v4153_v18 = vld [vmem:[#allocation6 + $0x98] sm:$0xf]  ;;  %v5011_v20 = vld [vmem:[#allocation6 + $0xa0] sm:$0xf0] }
  0xc9   :  { %v5583_v50 = vpop.f32.mrf.mxu0  ;;  %870 = vmatpush.bf16.msra.mxu3 %v3996_v58 }
  0xcc   :  { %v5208_v53 = vpop.eup %5207 }
  0xcd   :  { %v5599_v57 = vpop.f32.mrf.mxu2  ;;  %v628_v63 = vmul.f32 %v5208_v53, %v5592_v14  ;;  %871 = vmatpush.bf16.msra.mxu3 %v3984_v4  ;;  %vm633_vm0 = vweird.f32 %v5208_v53  ;;  %v5014_v4 = vld [vmem:[#allocation6 + $0xb8] sm:$0xf0] }
  0xce   :  { %vm634_vm2 = vmor %vm632_vm1, %vm633_vm0 }
  0xcf   :  { %v629_v5 = vsub.f32 1.0, %v628_v63  ;;  %v5012_v63 = vld [vmem:[#allocation6 + $0xac] sm:$0xf] }
  0xd1   :  { %v321_v8 = vpop.f32.mrf.mxu0  ;;  %v630_v9 = vmul.f32 %v5208_v53, %v629_v5 }
  0xd2   :  { %v5589_v11 = vadd.f32 %v321_v8, %v5577_v38 }
  0xd3   :  { %v631_v16 = vadd.f32 %v5208_v53, %v630_v9  ;;  %v4145_v9 = vld [vmem:[#allocation6 + $0x90] sm:$0xf] }
  0xd5   :  { %v374_v7 = vpop.f32.mrf.mxu2 }
  0xd6   :  { %v5609_v8 = vadd.f32 %v374_v7, %v5606_v6 }
  0xd8   :  { %v605_v22 = vpop.f32.mrf.mxu3 }
  0xd9   :  { %v642_v25 = vadd.f32 %v605_v22, %v341_v12  ;;  %v5597_v35 = vpop.f32.mrf.mxu0  ;;  %v635_v22 = vsel %vm634_vm2, %v5208_v53, %v631_v16  ;;  %v4147_v16 = vld [vmem:[#allocation6 + $0x9c] sm:$0xf0] }
  0xda   :  { %v640_v27 = vsel %vm637_vm3, %v639_v24, %v635_v22  ;;  %v4154_v22 = vor.u32 %v5011_v20, %v4153_v18  ;;  %v4133_v24 = vld [vmem:[#allocation6 + $0x78] sm:$0xf]  ;;  %v4997_v18 = vld [vmem:[#allocation6 + $0x34] sm:$0xf]  ;;  %v4099_v20 = vld [vmem:[#allocation6 + $0x3c] sm:$0xf0] }
  0xdb   :  { %v3972_v30 = vmul.f32 -1.442695, %v642_v25  ;;  %v370_v25 = vadd.f32 %v5594_v19, %v5606_v6 }
  0xdd   :  { %5209 = vpow2.f32 %v3972_v30  ;;  %v5621_v21 = vpop.f32.mrf.mxu2 }
  0xe0   :  { %v607_v54 = vpop.f32.mrf.mxu3 }
  0xe1   :  { %v326_v2 = vpop.f32.mrf.mxu0  ;;  %v5638_v54 = vpop.f32.mrf.mxu1 }
  0xe2   :  { %v5603_v3 = vadd.f32 %v326_v2, %v5577_v38  ;;  %v4165_v2 = vld [vmem:[#allocation6 + $0xb0] sm:$0xf] }
  0xe3   :  { %v5210_v62 = vpop.eup %5209  ;;  %v4166_v7 = vor.u32 %v5014_v4, %v4165_v2  ;;  %v4111_v4 = vld [vmem:[#allocation6 + $0x54] sm:$0xf0] }
  0xe4   :  { %v646_v1 = vadd.f32 1.0, %v5210_v62  ;;  %v5013_v62 = vld [vmem:[#allocation6 + $0xb0] sm:$0xf0] }
  0xe5   :  { %v379_v32 = vpop.f32.mrf.mxu2  ;;  %v4158_v0 = vor.u32 %v5013_v62, %v4157_v61  ;;  %1120 = vmatpush.bf16.msra.mxu2 %v4166_v7  ;;  %v5002_v7 = vld [vmem:[#allocation6 + $0x58] sm:$0xf0] }
  0xe6   :  { %5211 = vrcp.f32 %v646_v1  ;;  %vm652_vm4 = vweird.f32 %v646_v1  ;;  %v658_v29 = vand.u32 2147483648, %v646_v1  ;;  %v656_v14 = vand.u32 2147483647, %v646_v1 }
  0xe7   :  { %v5627_v39 = vadd.f32 %v379_v32, %v5606_v6  ;;  %1094 = vmatpush.bf16.msra.mxu0 %v4158_v0  ;;  %v4121_v32 = vld [vmem:[#allocation6 + $0x60] sm:$0xf]  ;;  %v5001_v0 = vld [vmem:[#allocation6 + $0x50] sm:$0xf0] }
  0xe8   :  { %v659_v40 = vor.u32 1.1754944e-38, %v658_v29  ;;  %vm657_vm7 = vcmp.eq.f32.partialorder %v656_v14, 8.507059e+37  ;;  %v4141_v29 = vld [vmem:[#allocation6 + $0x80] sm:$0xf] }
  0xe9   :  { %v5611_v12 = vpop.f32.mrf.mxu0  ;;  %v5640_v55 = vpop.f32.mrf.mxu1  ;;  %1121 = vmatpush.bf16.msra.mxu2 %v4154_v22  ;;  %v343_v22 = vadd.f32 %v5638_v54, %v5586_v52 }
  0xec   :  { %v5212_v10 = vpop.eup %5211 }
  0xed   :  { %v648_v13 = vmul.f32 %v5212_v10, %v646_v1  ;;  %vm653_vm5 = vweird.f32 %v5212_v10  ;;  %v5629_v45 = vpop.f32.mrf.mxu2  ;;  %v4159_v1 = vld [vmem:[#allocation6 + $0xb4] sm:$0xf0] }
  0xee   :  { %vm654_vm6 = vmor %vm652_vm4, %vm653_vm5  ;;  %v4162_v5 = vor.u32 %v5012_v63, %v4159_v1  ;;  %v4109_v63 = vld [vmem:[#allocation6 + $0x48] sm:$0xf]  ;;  %v5000_v1 = vld [vmem:[#allocation6 + $0x4c] sm:$0xf] }
  0xef   :  { %v649_v15 = vsub.f32 1.0, %v648_v13  ;;  %v5009_v13 = vld [vmem:[#allocation6 + $0x94] sm:$0xf]  ;;  %v4110_v2 = vor.u32 %v5001_v0, %v4109_v63 }
  0xf0   :  { %1107 = vmatpush.bf16.msra.mxu1 %v4162_v5  ;;  %v4117_v5 = vld [vmem:[#allocation6 + $0x50] sm:$0xf]  ;;  %v4993_v63 = vld [vmem:[#allocation6 + $0x10] sm:$0xf0] }
  0xf1   :  { %v650_v17 = vmul.f32 %v5212_v10, %v649_v15  ;;  %v618_v23 = vpop.f32.mrf.mxu0  ;;  %v5642_v56 = vpop.f32.mrf.mxu1 }
  0xf2   :  { %v662_v26 = vadd.f32 %v5617_v36, %v618_v23 }
  0xf3   :  { %v651_v28 = vadd.f32 %v5212_v10, %v650_v17  ;;  %v4150_v17 = vor.u32 %v5009_v13, %v4147_v16  ;;  %v4118_v13 = vor.u32 %v5002_v7, %v4117_v5  ;;  %v4998_v16 = vld [vmem:[#allocation6 + $0x38] sm:$0xf0] }
  0xf4   :  { %v663_v30 = vmul.f32 %v662_v26, %v640_v27  ;;  %v5006_v26 = vld [vmem:[#allocation6 + $0x7c] sm:$0xf] }
  0xf5   :  { %v655_v33 = vsel %vm654_vm6, %v5212_v10, %v651_v28  ;;  %v384_v51 = vpop.f32.mrf.mxu2  ;;  %v5010_v10 = vld [vmem:[#allocation6 + $0x98] sm:$0xf0]  ;;  %1108 = vmatpush.bf16.msra.mxu1 %v4150_v17  ;;  %v4135_v28 = vld [vmem:[#allocation6 + $0x84] sm:$0xf0]  ;;  %v4105_v17 = vld [vmem:[#allocation6 + $0x38] sm:$0xf] }
  0xf6   :  { %v664_v31 = vadd.f32 %v663_v30, %v370_v25  ;;  %v660_v41 = vsel %vm657_vm7, %v659_v40, %v655_v33  ;;  %v5636_v53 = vadd.f32 %v384_v51, %v5606_v6  ;;  %v4146_v15 = vor.u32 %v5010_v10, %v4145_v9  ;;  %v5007_v25 = vld [vmem:[#allocation6 + $0x80] sm:$0xf0]  ;;  %v5008_v30 = vld [vmem:[#allocation6 + $0x88] sm:$0xf0] }
  0xf7   :  { %v666_v42 = vsub.f32 1.0, %v660_v41  ;;  %v668_v47 = vmul.f32 0.0, %v660_v41  ;;  %v4134_v27 = vor.u32 %v5007_v25, %v4133_v24  ;;  %v4138_v14 = vor.u32 %v5006_v26, %v4135_v28  ;;  %v5004_v33 = vld [vmem:[#allocation6 + $0x68] sm:$0xf0]  ;;  %v5003_v40 = vld [vmem:[#allocation6 + $0x64] sm:$0xf] }
  0xf8   :  { %5213 = vtanh.f32 %v664_v31  ;;  %1095 = vmatpush.bf16.msra.mxu0 %v4146_v15  ;;  %v4142_v31 = vor.u32 %v5008_v30, %v4141_v29  ;;  %v4122_v41 = vor.u32 %v5004_v33, %v4121_v32  ;;  %v4114_v10 = vor.u32 %v5000_v1, %v4111_v4  ;;  %v4097_v15 = vld [vmem:[#allocation6 + $0x30] sm:$0xf]  ;;  %v4999_v25 = vld [vmem:[#allocation6 + $0x40] sm:$0xf0]  ;;  %v4085_v26 = vld [vmem:[#allocation6 + $0x18] sm:$0xf] }
  0xf9   :  { %v620_v19 = vpop.f32.mrf.mxu0  ;;  %v5644_v58 = vpop.f32.mrf.mxu1  ;;  %1109 = vmatpush.bf16.msra.mxu1 %v4138_v14  ;;  %v4102_v24 = vor.u32 %v4997_v18, %v4099_v20  ;;  %v4106_v29 = vor.u32 %v4999_v25, %v4105_v17  ;;  %v4994_v30 = vld [vmem:[#allocation6 + $0x1c] sm:$0xf]  ;;  %v4087_v14 = vld [vmem:[#allocation6 + $0x24] sm:$0xf0] }
  0xfa   :  { %1122 = vmatpush.bf16.msra.mxu2 %v4142_v31  ;;  %v4093_v31 = vld [vmem:[#allocation6 + $0x20] sm:$0xf] }
  0xfc   :  { %1096 = vmatpush.bf16.msra.mxu0 %v4134_v27  ;;  %v4995_v27 = vld [vmem:[#allocation6 + $0x20] sm:$0xf0] }
  0xfd   :  { %v5652_v19 = vpop.f32.mrf.mxu2 }
  0xfe   :  { %v5214_v44 = vpop.eup %5213 }
  0xff   :  { %v667_v46 = vmul.f32 %v5214_v44, %v666_v42  ;;  %v4123_v42 = vld [vmem:[#allocation6 + $0x6c] sm:$0xf0]  ;;  %v4129_v44 = vld [vmem:[#allocation6 + $0x68] sm:$0xf] }
 0x100   :  { %1097 = vmatpush.bf16.msra.mxu0 %v4122_v41 }
 0x101   :  { %v5631_v48 = vadd.f32 %v668_v47, %v667_v46  ;;  %v5646_v59 = vpop.f32.mrf.mxu1  ;;  %v5005_v46 = vld [vmem:[#allocation6 + $0x70] sm:$0xf0]  ;;  %v314_v47 = vadd.f32 %v5574_v37, %v5577_v38  ;;  %v4098_v37 = vor.u32 %v4998_v16, %v4097_v15 }
 0x102   :  { %v4130_v51 = vor.u32 %v5005_v46, %v4129_v44  ;;  %v4073_v44 = vld [vmem:[#allocation6] sm:$0xf]  ;;  %v4090_v46 = vor.u32 %v4994_v30, %v4087_v14  ;;  %v372_v30 = vadd.f32 %v5599_v57, %v5606_v6 }
 0x103   :  { %v670_v49 = vpack.c.bf16 %v5631_v48, %v5631_v48 }
 0x104   :  { %1123 = vmatpush.bf16.msra.mxu2 %v4130_v51  ;;  %1098 = vmatpush.bf16.msra.mxu0 %v4110_v2  ;;  %v4991_v51 = vld [vmem:[#allocation6 + $0x4] sm:$0xf] }
 0x105   :  { %671 = vst [vmem:[#allocation3] sm:$0xf] %v670_v49  ;;  %846 = vmatmul.bf16.vlgmr.msrb.gmra.mxu1 %v670_v49  ;;  %859 = vmatmul.bf16.vlgmr.msrb.gmra.mxu2 %v670_v49 }
 0x106   :  { %872 = vmatmul.bf16.vlgmr.msra.gmra.mxu3 %v670_v49  ;;  %v4126_v49 = vor.u32 %v5003_v40, %v4123_v42  ;;  %v4996_v40 = vld [vmem:[#allocation6 + $0x28] sm:$0xf0]  ;;  %v4086_v42 = vor.u32 %v4995_v27, %v4085_v26 }
 0x108   :  { %1110 = vmatpush.bf16.msra.mxu1 %v4126_v49  ;;  %1124 = vmatpush.bf16.msra.mxu2 %v4118_v13  ;;  %v4992_v49 = vld [vmem:[#allocation6 + $0x8] sm:$0xf0] }
 0x109   :  { %v5648_v60 = vpop.f32.mrf.mxu1  ;;  %1099 = vmatpush.bf16.msra.mxu0 %v4098_v37  ;;  %v4074_v2 = vor.u32 %v4992_v49, %v4073_v44 }
 0x10c   :  { %1111 = vmatpush.bf16.msra.mxu1 %v4114_v10  ;;  %1125 = vmatpush.bf16.msra.mxu2 %v4106_v29 }
 0x10d   :  { %1100 = vmatpush.bf16.msra.mxu0 %v4086_v42 }
 0x110   :  { %1112 = vmatpush.bf16.msra.mxu1 %v4102_v24 }
 0x111   :  { %v5650_v23 = vpop.f32.mrf.mxu1  ;;  %1101 = vmatpush.bf16.msra.mxu0 %v4074_v2 }
 0x114   :  { %1113 = vmatpush.bf16.msra.mxu1 %v4090_v46 }
 0x182   :  { %v847_v61 = vpop.f32.mrf.mxu1 }
 0x183   :  { %v877_v62 = vadd.f32 %v847_v61, %v314_v47  ;;  %v4094_v47 = vor.u32 %v4996_v40, %v4093_v31  ;;  %v4075_v61 = vld [vmem:[#allocation6 + $0xc] sm:$0xf0] }
 0x184   :  { %v4078_v4 = vor.u32 %v4991_v51, %v4075_v61 }
 0x185   :  { %v4069_v9 = vmul.f32 -1.442695, %v877_v62  ;;  %v4081_v62 = vld [vmem:[#allocation6 + $0x8] sm:$0xf]  ;;  %1126 = vmatpush.bf16.msra.mxu2 %v4094_v47 }
 0x186   :  { %v4082_v5 = vor.u32 %v4993_v63, %v4081_v62  ;;  %1114 = vmatpush.bf16.msra.mxu1 %v4078_v4  ;;  %v4255_v63 = vld [vmem:[#allocation6 + $0xa8] sm:$0xf]  ;;  %v4257_v4 = vld [vmem:[#allocation6 + $0xb4] sm:$0xf0] }
 0x187   :  { %5215 = vpow2.f32 %v4069_v9 }
 0x188   :  { %v860_v28 = vpop.f32.mrf.mxu2 }
 0x189   :  { %v897_v32 = vadd.f32 %v860_v28, %v343_v22  ;;  %v873_v33 = vpop.f32.mrf.mxu3  ;;  %1127 = vmatpush.bf16.msra.mxu2 %v4082_v5  ;;  %v4263_v5 = vld [vmem:[#allocation6 + $0xb0] sm:$0xf] }
 0x18a   :  { %v849_v41 = vpop.f32.mrf.mxu1  ;;  %v917_v29 = vadd.f32 %v5617_v36, %v873_v33 }
 0x18b   :  { %v4070_v54 = vmul.f32 -1.442695, %v897_v32 }
 0x18d   :  { %v5216_v0 = vpop.eup %5215  ;;  %5217 = vpow2.f32 %v4070_v54 }
 0x18e   :  { %v881_v1 = vadd.f32 1.0, %v5216_v0  ;;  %v5037_v0 = vld [vmem:[#allocation6 + $0xb0] sm:$0xf0] }
 0x18f   :  { %v4256_v2 = vor.u32 %v5037_v0, %v4255_v63  ;;  %v4207_v0 = vld [vmem:[#allocation6 + $0x48] sm:$0xf] }
 0x190   :  { %5219 = vrcp.f32 %v881_v1  ;;  %v862_v7 = vpop.f32.mrf.mxu2  ;;  %v893_v18 = vand.u32 2147483648, %v881_v1  ;;  %v891_v17 = vand.u32 2147483647, %v881_v1  ;;  %vm887_vm9 = vweird.f32 %v881_v1 }
 0x191   :  { %v875_v9 = vpop.f32.mrf.mxu3  ;;  %v5038_v7 = vld [vmem:[#allocation6 + $0xb8] sm:$0xf0]  ;;  %1350 = vmatpush.bf16.msrb.mxu3 %v4256_v2  ;;  %v5024_v2 = vld [vmem:[#allocation6 + $0x4c] sm:$0xf] }
 0x192   :  { %v894_v26 = vor.u32 1.1754944e-38, %v893_v18  ;;  %vm892_vm11 = vcmp.eq.f32.partialorder %v891_v17, 8.507059e+37  ;;  %v4251_v18 = vld [vmem:[#allocation6 + $0x98] sm:$0xf] }
 0x193   :  { %v5218_v10 = vpop.eup %5217 }
 0x194   :  { %v901_v13 = vadd.f32 1.0, %v5218_v10  ;;  %v4264_v10 = vor.u32 %v5038_v7, %v4263_v5  ;;  %v4209_v5 = vld [vmem:[#allocation6 + $0x54] sm:$0xf0]  ;;  %v4215_v7 = vld [vmem:[#allocation6 + $0x50] sm:$0xf] }
 0x196   :  { %v5220_v15 = vpop.eup %5219  ;;  %5221 = vrcp.f32 %v901_v13  ;;  %v913_v32 = vand.u32 2147483648, %v901_v13  ;;  %v911_v41 = vand.u32 2147483647, %v901_v13  ;;  %vm907_vm13 = vweird.f32 %v901_v13  ;;  %1376 = vmatpush.bf16.msrb.mxu1 %v4264_v10 }
 0x197   :  { %v883_v16 = vmul.f32 %v5220_v15, %v881_v1  ;;  %vm888_vm8 = vweird.f32 %v5220_v15  ;;  %v5036_v1 = vld [vmem:[#allocation6 + $0xac] sm:$0xf] }
 0x198   :  { %vm889_vm10 = vmor %vm887_vm9, %vm888_vm8  ;;  %v914_v54 = vor.u32 1.1754944e-38, %v913_v32  ;;  %vm912_vm15 = vcmp.eq.f32.partialorder %v911_v41, 8.507059e+37  ;;  %v4260_v9 = vor.u32 %v5036_v1, %v4257_v4  ;;  %v4219_v32 = vld [vmem:[#allocation6 + $0x60] sm:$0xf]  ;;  %v5027_v41 = vld [vmem:[#allocation6 + $0x64] sm:$0xf] }
 0x199   :  { %v884_v37 = vsub.f32 1.0, %v883_v16  ;;  %v5025_v1 = vld [vmem:[#allocation6 + $0x50] sm:$0xf0] }
 0x19a   :  { %1363 = vmatpush.bf16.msrb.mxu0 %v4260_v9  ;;  %v4208_v4 = vor.u32 %v5025_v1, %v4207_v0  ;;  %v5026_v9 = vld [vmem:[#allocation6 + $0x58] sm:$0xf0] }
 0x19b   :  { %v885_v20 = vmul.f32 %v5220_v15, %v884_v37  ;;  %v4245_v37 = vld [vmem:[#allocation6 + $0x9c] sm:$0xf0] }
 0x19c   :  { %v5222_v22 = vpop.eup %5221 }
 0x19d   :  { %v903_v24 = vmul.f32 %v5222_v22, %v901_v13  ;;  %v886_v25 = vadd.f32 %v5220_v15, %v885_v20  ;;  %vm908_vm12 = vweird.f32 %v5222_v22  ;;  %v5034_v13 = vld [vmem:[#allocation6 + $0x98] sm:$0xf0]  ;;  %v5035_v20 = vld [vmem:[#allocation6 + $0xa0] sm:$0xf0] }
 0x19e   :  { %vm909_vm14 = vmor %vm907_vm13, %vm908_vm12 }
 0x19f   :  { %v904_v27 = vsub.f32 1.0, %v903_v24  ;;  %v890_v28 = vsel %vm889_vm10, %v5220_v15, %v886_v25  ;;  %v5033_v15 = vld [vmem:[#allocation6 + $0x94] sm:$0xf]  ;;  %v4231_v24 = vld [vmem:[#allocation6 + $0x78] sm:$0xf] }
 0x1a0   :  { %v895_v14 = vsel %vm892_vm11, %v894_v26, %v890_v28  ;;  %v4248_v17 = vor.u32 %v5033_v15, %v4245_v37  ;;  %v5031_v25 = vld [vmem:[#allocation6 + $0x80] sm:$0xf0]  ;;  %v5030_v26 = vld [vmem:[#allocation6 + $0x7c] sm:$0xf]  ;;  %v4233_v28 = vld [vmem:[#allocation6 + $0x84] sm:$0xf0] }
 0x1a1   :  { %v905_v31 = vmul.f32 %v5222_v22, %v904_v27  ;;  %v918_v40 = vmul.f32 %v917_v29, %v895_v14  ;;  %v4232_v27 = vor.u32 %v5031_v25, %v4231_v24  ;;  %v4239_v29 = vld [vmem:[#allocation6 + $0x80] sm:$0xf]  ;;  %v4236_v14 = vor.u32 %v5030_v26, %v4233_v28  ;;  %v4195_v15 = vld [vmem:[#allocation6 + $0x30] sm:$0xf]  ;;  %v5021_v37 = vld [vmem:[#allocation6 + $0x34] sm:$0xf] }
 0x1a2   :  { %1364 = vmatpush.bf16.msrb.mxu0 %v4248_v17  ;;  %v4203_v17 = vld [vmem:[#allocation6 + $0x38] sm:$0xf]  ;;  %v5019_v26 = vld [vmem:[#allocation6 + $0x20] sm:$0xf0]  ;;  %v4185_v28 = vld [vmem:[#allocation6 + $0x24] sm:$0xf0] }
 0x1a3   :  { %v919_v42 = vadd.f32 %v918_v40, %v372_v30  ;;  %v906_v44 = vadd.f32 %v5222_v22, %v905_v31  ;;  %v5032_v30 = vld [vmem:[#allocation6 + $0x88] sm:$0xf0]  ;;  %v4183_v24 = vld [vmem:[#allocation6 + $0x18] sm:$0xf] }
 0x1a4   :  { %v4240_v31 = vor.u32 %v5032_v30, %v4239_v29  ;;  %v5028_v40 = vld [vmem:[#allocation6 + $0x68] sm:$0xf0]  ;;  %v4191_v30 = vld [vmem:[#allocation6 + $0x20] sm:$0xf] }
 0x1a5   :  { %5223 = vtanh.f32 %v919_v42  ;;  %v910_v46 = vsel %vm909_vm14, %v5222_v22, %v906_v44  ;;  %v4252_v22 = vor.u32 %v5035_v20, %v4251_v18  ;;  %v4220_v42 = vor.u32 %v5028_v40, %v4219_v32  ;;  %v4221_v44 = vld [vmem:[#allocation6 + $0x6c] sm:$0xf0]  ;;  %v4197_v18 = vld [vmem:[#allocation6 + $0x3c] sm:$0xf0] }
 0x1a6   :  { %v915_v47 = vsel %vm912_vm15, %v914_v54, %v910_v46  ;;  %1365 = vmatpush.bf16.msrb.mxu0 %v4236_v14  ;;  %v4227_v54 = vld [vmem:[#allocation6 + $0x68] sm:$0xf]  ;;  %v5029_v46 = vld [vmem:[#allocation6 + $0x70] sm:$0xf0]  ;;  %v4200_v20 = vor.u32 %v5021_v37, %v4197_v18  ;;  %v5020_v14 = vld [vmem:[#allocation6 + $0x28] sm:$0xf0]  ;;  %v4184_v40 = vor.u32 %v5019_v26, %v4183_v24 }
 0x1a7   :  { %v921_v49 = vsub.f32 1.0, %v915_v47  ;;  %v923_v57 = vmul.f32 %v915_v47, %v5631_v48  ;;  %v4243_v48 = vld [vmem:[#allocation6 + $0x90] sm:$0xf]  ;;  %1377 = vmatpush.bf16.msrb.mxu1 %v4252_v22  ;;  %v346_v47 = vadd.f32 %v5640_v55, %v5586_v52  ;;  %v4212_v55 = vor.u32 %v5024_v2, %v4209_v5  ;;  %v5023_v22 = vld [vmem:[#allocation6 + $0x40] sm:$0xf0] }
 0x1a8   :  { %v4244_v16 = vor.u32 %v5034_v13, %v4243_v48  ;;  %v4216_v13 = vor.u32 %v5026_v9, %v4215_v7  ;;  %v4204_v25 = vor.u32 %v5023_v22, %v4203_v17 }
 0x1aa   :  { %1351 = vmatpush.bf16.msrb.mxu3 %v4244_v16  ;;  %v5022_v16 = vld [vmem:[#allocation6 + $0x38] sm:$0xf0] }
 0x1ab   :  { %v5224_v33 = vpop.eup %5223  ;;  %1378 = vmatpush.bf16.msrb.mxu1 %v4240_v31 }
 0x1ac   :  { %v922_v51 = vmul.f32 %v5224_v33, %v921_v49  ;;  %v4224_v49 = vor.u32 %v5027_v41, %v4221_v44  ;;  %v4228_v33 = vor.u32 %v5029_v46, %v4227_v54  ;;  %v4171_v44 = vld [vmem:[#allocation6] sm:$0xf]  ;;  %v5016_v54 = vld [vmem:[#allocation6 + $0x8] sm:$0xf0]  ;;  %v5015_v46 = vld [vmem:[#allocation6 + $0x4] sm:$0xf] }
 0x1ae   :  { %v5662_v61 = vadd.f32 %v923_v57, %v922_v51  ;;  %1352 = vmatpush.bf16.msrb.mxu3 %v4232_v27  ;;  %1366 = vmatpush.bf16.msrb.mxu0 %v4224_v49  ;;  %v5018_v27 = vld [vmem:[#allocation6 + $0x1c] sm:$0xf]  ;;  %v4179_v49 = vld [vmem:[#allocation6 + $0x8] sm:$0xf] }
 0x1af   :  { %1379 = vmatpush.bf16.msrb.mxu1 %v4228_v33  ;;  %v4188_v41 = vor.u32 %v5018_v27, %v4185_v28  ;;  %v5017_v33 = vld [vmem:[#allocation6 + $0x10] sm:$0xf0] }
 0x1b0   :  { %v925_v62 = vpack.c.bf16 %v5662_v61, %v5662_v61  ;;  %v4180_v2 = vor.u32 %v5017_v33, %v4179_v49  ;;  %v4355_v49 = vld [vmem:[#allocation6 + $0xb4] sm:$0xf0]  ;;  %v4361_v33 = vld [vmem:[#allocation6 + $0xb0] sm:$0xf] }
 0x1b2   :  { %927 = vst [vmem:[#allocation3 + $0x4] sm:$0xf] %v925_v62  ;;  %1102 = vmatmul.bf16.vlgmr.msra.gmra.mxu0 %v925_v62  ;;  %1115 = vmatmul.bf16.vlgmr.msra.gmra.mxu1 %v925_v62 }
 0x1b3   :  { %1128 = vmatmul.bf16.vlgmr.msra.gmra.mxu2 %v925_v62  ;;  %1353 = vmatpush.bf16.msrb.mxu3 %v4220_v42  ;;  %v4192_v42 = vor.u32 %v5020_v14, %v4191_v30 }
 0x1b4   :  { %1367 = vmatpush.bf16.msrb.mxu0 %v4212_v55  ;;  %1380 = vmatpush.bf16.msrb.mxu1 %v4216_v13 }
 0x1b7   :  { %1354 = vmatpush.bf16.msrb.mxu3 %v4208_v4 }
 0x1b8   :  { %1368 = vmatpush.bf16.msrb.mxu0 %v4200_v20  ;;  %1381 = vmatpush.bf16.msrb.mxu1 %v4204_v25 }
 0x1bc   :  { %1369 = vmatpush.bf16.msrb.mxu0 %v4188_v41  ;;  %1382 = vmatpush.bf16.msrb.mxu1 %v4192_v42 }
 0x1c0   :  { %1383 = vmatpush.bf16.msrb.mxu1 %v4180_v2  ;;  %v4343_v2 = vld [vmem:[#allocation6 + $0x9c] sm:$0xf0] }
 0x22f   :  { %v1103_v51 = vpop.f32.mrf.mxu0  ;;  %v1116_v57 = vpop.f32.mrf.mxu1 }
 0x230   :  { %v1133_v62 = vadd.f32 %v1103_v51, %v5581_v43  ;;  %v1153_v63 = vadd.f32 %v1116_v57, %v346_v47  ;;  %v4196_v43 = vor.u32 %v5022_v16, %v4195_v15  ;;  %v4173_v47 = vld [vmem:[#allocation6 + $0xc] sm:$0xf0] }
 0x231   :  { %v4176_v1 = vor.u32 %v5015_v46, %v4173_v47  ;;  %v5060_v46 = vld [vmem:[#allocation6 + $0xac] sm:$0xf] }
 0x232   :  { %v4167_v10 = vmul.f32 -1.442695, %v1133_v62  ;;  %v4168_v48 = vmul.f32 -1.442695, %v1153_v63  ;;  %1355 = vmatpush.bf16.msrb.mxu3 %v4196_v43  ;;  %v4172_v63 = vor.u32 %v5016_v54, %v4171_v44  ;;  %v5061_v54 = vld [vmem:[#allocation6 + $0xb0] sm:$0xf0] }
 0x233   :  { %1370 = vmatpush.bf16.msrb.mxu0 %v4176_v1 }
 0x234   :  { %5225 = vpow2.f32 %v4167_v10 }
 0x235   :  { %5227 = vpow2.f32 %v4168_v48 }
 0x236   :  { %v1129_v29 = vpop.f32.mrf.mxu2  ;;  %1356 = vmatpush.bf16.msrb.mxu3 %v4184_v40 }
 0x237   :  { %v1105_v31 = vpop.f32.mrf.mxu0  ;;  %v1118_v32 = vpop.f32.mrf.mxu1  ;;  %v1173_v17 = vadd.f32 %v5617_v36, %v1129_v29 }
 0x23a   :  { %v5226_v51 = vpop.eup %5225  ;;  %1357 = vmatpush.bf16.msrb.mxu3 %v4172_v63  ;;  %v5058_v63 = vld [vmem:[#allocation6 + $0x98] sm:$0xf0] }
 0x23b   :  { %v5228_v57 = vpop.eup %5227  ;;  %v1137_v62 = vadd.f32 1.0, %v5226_v51  ;;  %v5062_v51 = vld [vmem:[#allocation6 + $0xb8] sm:$0xf0] }
 0x23c   :  { %v1157_v0 = vadd.f32 1.0, %v5228_v57  ;;  %v4358_v57 = vor.u32 %v5060_v46, %v4355_v49  ;;  %v5048_v46 = vld [vmem:[#allocation6 + $0x4c] sm:$0xf]  ;;  %v4313_v49 = vld [vmem:[#allocation6 + $0x50] sm:$0xf] }
 0x23d   :  { %5229 = vrcp.f32 %v1137_v62  ;;  %v1149_v13 = vand.u32 2147483648, %v1137_v62  ;;  %v1147_v16 = vand.u32 2147483647, %v1137_v62  ;;  %vm1143_vm1 = vweird.f32 %v1137_v62 }
 0x23e   :  { %5231 = vrcp.f32 %v1157_v0  ;;  %v1131_v4 = vpop.f32.mrf.mxu2  ;;  %v1169_v25 = vand.u32 2147483648, %v1157_v0  ;;  %vm1163_vm5 = vweird.f32 %v1157_v0  ;;  %v1167_v27 = vand.u32 2147483647, %v1157_v0  ;;  %1619 = vmatpush.bf16.msra.mxu3 %v4358_v57  ;;  %v5050_v57 = vld [vmem:[#allocation6 + $0x58] sm:$0xf0] }
 0x23f   :  { %v1150_v43 = vor.u32 1.1754944e-38, %v1149_v13  ;;  %vm1148_vm3 = vcmp.eq.f32.partialorder %v1147_v16, 8.507059e+37  ;;  %v4349_v4 = vld [vmem:[#allocation6 + $0x98] sm:$0xf]  ;;  %v5054_v13 = vld [vmem:[#allocation6 + $0x7c] sm:$0xf] }
 0x240   :  { %v1170_v14 = vor.u32 1.1754944e-38, %v1169_v25  ;;  %vm1168_vm7 = vcmp.eq.f32.partialorder %v1167_v27, 8.507059e+37 }
 0x243   :  { %v5230_v5 = vpop.eup %5229 }
 0x244   :  { %v5232_v7 = vpop.eup %5231  ;;  %v1139_v9 = vmul.f32 %v5230_v5, %v1137_v62  ;;  %vm1144_vm0 = vweird.f32 %v5230_v5  ;;  %v4362_v62 = vor.u32 %v5062_v51, %v4361_v33 }
 0x245   :  { %v1159_v10 = vmul.f32 %v5232_v7, %v1157_v0  ;;  %vm1145_vm2 = vmor %vm1143_vm1, %vm1144_vm0  ;;  %vm1164_vm4 = vweird.f32 %v5232_v7  ;;  %v5057_v0 = vld [vmem:[#allocation6 + $0x94] sm:$0xf] }
 0x246   :  { %v1140_v48 = vsub.f32 1.0, %v1139_v9  ;;  %vm1165_vm6 = vmor %vm1163_vm5, %vm1164_vm4  ;;  %1632 = vmatpush.bf16.msra.mxu0 %v4362_v62  ;;  %v4293_v62 = vld [vmem:[#allocation6 + $0x30] sm:$0xf] }
 0x247   :  { %v1160_v55 = vsub.f32 1.0, %v1159_v10  ;;  %v348_v10 = vadd.f32 %v5642_v56, %v5586_v52  ;;  %v4317_v56 = vld [vmem:[#allocation6 + $0x60] sm:$0xf] }
 0x248   :  { %v1141_v15 = vmul.f32 %v5230_v5, %v1140_v48  ;;  %v4329_v48 = vld [vmem:[#allocation6 + $0x78] sm:$0xf] }
 0x249   :  { %v1161_v37 = vmul.f32 %v5232_v7, %v1160_v55  ;;  %v5055_v55 = vld [vmem:[#allocation6 + $0x80] sm:$0xf0] }
 0x24a   :  { %v1142_v18 = vadd.f32 %v5230_v5, %v1141_v15  ;;  %v4330_v16 = vor.u32 %v5055_v55, %v4329_v48  ;;  %v4281_v55 = vld [vmem:[#allocation6 + $0x18] sm:$0xf] }
 0x24b   :  { %v1162_v24 = vadd.f32 %v5232_v7, %v1161_v37  ;;  %v4331_v37 = vld [vmem:[#allocation6 + $0x84] sm:$0xf0] }
 0x24c   :  { %v1146_v20 = vsel %vm1145_vm2, %v5230_v5, %v1142_v18  ;;  %v5059_v5 = vld [vmem:[#allocation6 + $0xa0] sm:$0xf0]  ;;  %v4337_v18 = vld [vmem:[#allocation6 + $0x80] sm:$0xf] }
 0x24d   :  { %v1151_v22 = vsel %vm1148_vm3, %v1150_v43, %v1146_v20  ;;  %v1166_v30 = vsel %vm1165_vm6, %v5232_v7, %v1162_v24  ;;  %v4346_v7 = vor.u32 %v5057_v0, %v4343_v2  ;;  %v4350_v9 = vor.u32 %v5059_v5, %v4349_v4  ;;  %v5056_v43 = vld [vmem:[#allocation6 + $0x88] sm:$0xf0]  ;;  %v5045_v0 = vld [vmem:[#allocation6 + $0x34] sm:$0xf]  ;;  %v4301_v5 = vld [vmem:[#allocation6 + $0x38] sm:$0xf] }
 0x24e   :  { %v1174_v26 = vmul.f32 %v1173_v17, %v1151_v22  ;;  %v1171_v31 = vsel %vm1168_vm7, %v1170_v14, %v1166_v30  ;;  %v4334_v22 = vor.u32 %v5054_v13, %v4331_v37  ;;  %v4338_v24 = vor.u32 %v5056_v43, %v4337_v18  ;;  %v4319_v30 = vld [vmem:[#allocation6 + $0x6c] sm:$0xf0]  ;;  %v4325_v14 = vld [vmem:[#allocation6 + $0x68] sm:$0xf]  ;;  %v5043_v13 = vld [vmem:[#allocation6 + $0x20] sm:$0xf0] }
 0x24f   :  { %v1177_v32 = vsub.f32 1.0, %v1171_v31  ;;  %v1179_v29 = vmul.f32 %v1171_v31, %v5662_v61  ;;  %v4341_v61 = vld [vmem:[#allocation6 + $0x90] sm:$0xf]  ;;  %1620 = vmatpush.bf16.msra.mxu3 %v4346_v7  ;;  %1633 = vmatpush.bf16.msra.mxu0 %v4350_v9  ;;  %v319_v31 = vadd.f32 %v5583_v50, %v5577_v38  ;;  %v4314_v50 = vor.u32 %v5050_v57, %v4313_v49  ;;  %v5047_v7 = vld [vmem:[#allocation6 + $0x40] sm:$0xf0] }
 0x250   :  { %v1175_v28 = vadd.f32 %v1174_v26, %v5609_v8  ;;  %v4353_v8 = vld [vmem:[#allocation6 + $0xa8] sm:$0xf]  ;;  %v4342_v1 = vor.u32 %v5058_v63, %v4341_v61  ;;  %v5052_v26 = vld [vmem:[#allocation6 + $0x68] sm:$0xf0]  ;;  %v5046_v61 = vld [vmem:[#allocation6 + $0x38] sm:$0xf0] }
 0x251   :  { %v4354_v47 = vor.u32 %v5061_v54, %v4353_v8  ;;  %v4318_v27 = vor.u32 %v5052_v26, %v4317_v56  ;;  %v4294_v9 = vor.u32 %v5046_v61, %v4293_v62  ;;  %v5042_v37 = vld [vmem:[#allocation6 + $0x1c] sm:$0xf]  ;;  %v4283_v18 = vld [vmem:[#allocation6 + $0x24] sm:$0xf0]  ;;  %v4289_v43 = vld [vmem:[#allocation6 + $0x20] sm:$0xf] }
 0x252   :  { %5233 = vtanh.f32 %v1175_v28  ;;  %v5051_v28 = vld [vmem:[#allocation6 + $0x64] sm:$0xf]  ;;  %v4269_v56 = vld [vmem:[#allocation6] sm:$0xf]  ;;  %v5040_v26 = vld [vmem:[#allocation6 + $0x8] sm:$0xf0] }
 0x253   :  { %1606 = vmatpush.bf16.msrb.mxu2 %v4354_v47  ;;  %1621 = vmatpush.bf16.msra.mxu3 %v4334_v22  ;;  %v4307_v47 = vld [vmem:[#allocation6 + $0x54] sm:$0xf0] }
 0x254   :  { %1634 = vmatpush.bf16.msra.mxu0 %v4338_v24  ;;  %v4310_v51 = vor.u32 %v5048_v46, %v4307_v47  ;;  %v4282_v24 = vor.u32 %v5043_v13, %v4281_v55 }
 0x257   :  { %1607 = vmatpush.bf16.msrb.mxu2 %v4342_v1  ;;  %v4295_v1 = vld [vmem:[#allocation6 + $0x3c] sm:$0xf0] }
 0x258   :  { %v5234_v40 = vpop.eup %5233  ;;  %v4298_v48 = vor.u32 %v5045_v0, %v4295_v1 }
 0x259   :  { %v1178_v41 = vmul.f32 %v5234_v40, %v1177_v32  ;;  %v4322_v32 = vor.u32 %v5051_v28, %v4319_v30  ;;  %v5053_v40 = vld [vmem:[#allocation6 + $0x70] sm:$0xf0]  ;;  %v5039_v28 = vld [vmem:[#allocation6 + $0x4] sm:$0xf]  ;;  %v4271_v30 = vld [vmem:[#allocation6 + $0xc] sm:$0xf0] }
 0x25a   :  { %v4326_v8 = vor.u32 %v5053_v40, %v4325_v14 }
 0x25b   :  { %v5672_v42 = vadd.f32 %v1179_v29, %v1178_v41  ;;  %1608 = vmatpush.bf16.msrb.mxu2 %v4330_v16  ;;  %v4305_v41 = vld [vmem:[#allocation6 + $0x48] sm:$0xf]  ;;  %v5049_v29 = vld [vmem:[#allocation6 + $0x50] sm:$0xf0]  ;;  %1622 = vmatpush.bf16.msra.mxu3 %v4322_v32  ;;  %v4302_v16 = vor.u32 %v5047_v7, %v4301_v5  ;;  %v377_v5 = vadd.f32 %v5621_v21, %v5606_v6 }
 0x25c   :  { %v4306_v54 = vor.u32 %v5049_v29, %v4305_v41  ;;  %1635 = vmatpush.bf16.msra.mxu0 %v4326_v8  ;;  %v5041_v32 = vld [vmem:[#allocation6 + $0x10] sm:$0xf0]  ;;  %v4270_v41 = vor.u32 %v5040_v26, %v4269_v56  ;;  %v4274_v29 = vor.u32 %v5039_v28, %v4271_v30  ;;  %v4459_v56 = vld [vmem:[#allocation6 + $0xb0] sm:$0xf]  ;;  %v5086_v26 = vld [vmem:[#allocation6 + $0xb8] sm:$0xf0] }
 0x25d   :  { %v1181_v44 = vpack.c.bf16 %v5672_v42, %v5672_v42  ;;  %v4460_v28 = vor.u32 %v5086_v26, %v4459_v56  ;;  %v5082_v30 = vld [vmem:[#allocation6 + $0x98] sm:$0xf0]  ;;  %v4393_v26 = vld [vmem:[#allocation6 + $0x3c] sm:$0xf0] }
 0x25f   :  { %1183 = vst [vmem:[#allocation3 + $0x8] sm:$0xf] %v1181_v44  ;;  %1358 = vmatmul.bf16.vlgmr.msrb.gmra.mxu3 %v1181_v44  ;;  %1371 = vmatmul.bf16.vlgmr.msrb.gmra.mxu0 %v1181_v44 }
 0x260   :  { %1384 = vmatmul.bf16.vlgmr.msrb.gmra.mxu1 %v1181_v44  ;;  %1609 = vmatpush.bf16.msrb.mxu2 %v4318_v27 }
 0x261   :  { %1623 = vmatpush.bf16.msra.mxu3 %v4310_v51  ;;  %1636 = vmatpush.bf16.msra.mxu0 %v4314_v50 }
 0x264   :  { %1610 = vmatpush.bf16.msrb.mxu2 %v4306_v54 }
 0x265   :  { %1624 = vmatpush.bf16.msra.mxu3 %v4298_v48  ;;  %1637 = vmatpush.bf16.msra.mxu0 %v4302_v16 }
 0x268   :  { %1611 = vmatpush.bf16.msrb.mxu2 %v4294_v9 }
 0x26c   :  { %1612 = vmatpush.bf16.msrb.mxu2 %v4282_v24 }
 0x270   :  { %1613 = vmatpush.bf16.msrb.mxu2 %v4270_v41  ;;  %v5083_v41 = vld [vmem:[#allocation6 + $0xa0] sm:$0xf0] }
 0x2dc   :  { %v1372_v15 = vpop.f32.mrf.mxu0 }
 0x2dd   :  { %v1409_v20 = vadd.f32 %v1372_v15, %v348_v10  ;;  %v5678_v17 = vpop.f32.mrf.mxu1 }
 0x2de   :  { %v1429_v0 = vadd.f32 %v5617_v36, %v5678_v17 }
 0x2df   :  { %v4266_v25 = vmul.f32 -1.442695, %v1409_v20  ;;  %v5044_v20 = vld [vmem:[#allocation6 + $0x28] sm:$0xf0] }
 0x2e0   :  { %v4290_v27 = vor.u32 %v5044_v20, %v4289_v43  ;;  %v5085_v20 = vld [vmem:[#allocation6 + $0xb0] sm:$0xf0] }
 0x2e1   :  { %5235 = vpow2.f32 %v4266_v25  ;;  %v4286_v25 = vor.u32 %v5042_v37, %v4283_v18 }
 0x2e2   :  { %v1359_v44 = vpop.f32.mrf.mxu3  ;;  %1638 = vmatpush.bf16.msra.mxu0 %v4290_v27 }
 0x2e3   :  { %v1389_v33 = vadd.f32 %v1359_v44, %v319_v31  ;;  %v4277_v31 = vld [vmem:[#allocation6 + $0x8] sm:$0xf]  ;;  %1625 = vmatpush.bf16.msra.mxu3 %v4286_v25  ;;  %v4453_v25 = vld [vmem:[#allocation6 + $0xb4] sm:$0xf0] }
 0x2e4   :  { %v1374_v63 = vpop.f32.mrf.mxu0  ;;  %v4278_v44 = vor.u32 %v5041_v32, %v4277_v31  ;;  %v4441_v32 = vld [vmem:[#allocation6 + $0x9c] sm:$0xf0] }
 0x2e5   :  { %v4265_v2 = vmul.f32 -1.442695, %v1389_v33  ;;  %v1387_v4 = vpop.f32.mrf.mxu1 }
 0x2e6   :  { %1639 = vmatpush.bf16.msra.mxu0 %v4278_v44 }
 0x2e7   :  { %v5236_v10 = vpop.eup %5235  ;;  %5237 = vpow2.f32 %v4265_v2  ;;  %1626 = vmatpush.bf16.msra.mxu3 %v4274_v29 }
 0x2e8   :  { %v5682_v15 = vadd.f32 1.0, %v5236_v10 }
 0x2ea   :  { %v1361_v22 = vpop.f32.mrf.mxu3  ;;  %5239 = vrcp.f32 %v5682_v15  ;;  %v1425_v7 = vand.u32 2147483648, %v5682_v15  ;;  %vm1419_vm13 = vweird.f32 %v5682_v15  ;;  %v1423_v10 = vand.u32 2147483647, %v5682_v15 }
 0x2eb   :  { %v5084_v22 = vld [vmem:[#allocation6 + $0xac] sm:$0xf]  ;;  %1888 = vmatpush.bf16.msrb.mxu3 %v4460_v28  ;;  %v5071_v28 = vld [vmem:[#allocation6 + $0x40] sm:$0xf0] }
 0x2ec   :  { %v1426_v13 = vor.u32 1.1754944e-38, %v1425_v7  ;;  %vm1424_vm15 = vcmp.eq.f32.partialorder %v1423_v10, 8.507059e+37  ;;  %v4456_v27 = vor.u32 %v5084_v22, %v4453_v25  ;;  %v351_v7 = vadd.f32 %v5644_v58, %v5586_v52  ;;  %v5070_v58 = vld [vmem:[#allocation6 + $0x38] sm:$0xf0]  ;;  %v5069_v25 = vld [vmem:[#allocation6 + $0x34] sm:$0xf] }
 0x2ed   :  { %v5238_v14 = vpop.eup %5237 }
 0x2ee   :  { %v1393_v40 = vadd.f32 1.0, %v5238_v14  ;;  %1875 = vmatpush.bf16.msra.mxu2 %v4456_v27  ;;  %v5081_v14 = vld [vmem:[#allocation6 + $0x94] sm:$0xf]  ;;  %v4399_v27 = vld [vmem:[#allocation6 + $0x38] sm:$0xf] }
 0x2ef   :  { %v4444_v29 = vor.u32 %v5081_v14, %v4441_v32  ;;  %v4400_v32 = vor.u32 %v5071_v28, %v4399_v27 }
 0x2f0   :  { %5241 = vrcp.f32 %v1393_v40  ;;  %v5240_v8 = vpop.eup %5239  ;;  %v1405_v51 = vand.u32 2147483648, %v1393_v40  ;;  %v1403_v62 = vand.u32 2147483647, %v1393_v40  ;;  %vm1399_vm9 = vweird.f32 %v1393_v40 }
 0x2f1   :  { %v1415_v54 = vmul.f32 %v5240_v8, %v5682_v15  ;;  %vm1420_vm12 = vweird.f32 %v5240_v8  ;;  %v4451_v15 = vld [vmem:[#allocation6 + $0xa8] sm:$0xf] }
 0x2f2   :  { %v1406_v50 = vor.u32 1.1754944e-38, %v1405_v51  ;;  %vm1404_vm11 = vcmp.eq.f32.partialorder %v1403_v62, 8.507059e+37  ;;  %vm1421_vm14 = vmor %vm1419_vm13, %vm1420_vm12  ;;  %v4452_v24 = vor.u32 %v5085_v20, %v4451_v15  ;;  %1876 = vmatpush.bf16.msra.mxu2 %v4444_v29  ;;  %v5080_v51 = vld [vmem:[#allocation6 + $0x88] sm:$0xf0]  ;;  %v5066_v29 = vld [vmem:[#allocation6 + $0x1c] sm:$0xf] }
 0x2f3   :  { %v1416_v49 = vsub.f32 1.0, %v1415_v54  ;;  %v5079_v54 = vld [vmem:[#allocation6 + $0x80] sm:$0xf0] }
 0x2f4   :  { %1862 = vmatpush.bf16.msra.mxu1 %v4452_v24  ;;  %v4391_v24 = vld [vmem:[#allocation6 + $0x30] sm:$0xf] }
 0x2f5   :  { %v1417_v61 = vmul.f32 %v5240_v8, %v1416_v49  ;;  %v4429_v49 = vld [vmem:[#allocation6 + $0x84] sm:$0xf0] }
 0x2f6   :  { %v5242_v46 = vpop.eup %5241 }
 0x2f7   :  { %v1395_v47 = vmul.f32 %v5242_v46, %v1393_v40  ;;  %vm1400_vm8 = vweird.f32 %v5242_v46  ;;  %v1418_v4 = vadd.f32 %v5240_v8, %v1417_v61  ;;  %v4447_v40 = vld [vmem:[#allocation6 + $0x98] sm:$0xf] }
 0x2f8   :  { %vm1401_vm10 = vmor %vm1399_vm9, %vm1400_vm8  ;;  %v4448_v44 = vor.u32 %v5083_v41, %v4447_v40  ;;  %v4379_v40 = vld [vmem:[#allocation6 + $0x18] sm:$0xf]  ;;  %v5067_v41 = vld [vmem:[#allocation6 + $0x20] sm:$0xf0] }
 0x2f9   :  { %v1396_v33 = vsub.f32 1.0, %v1395_v47  ;;  %v1422_v55 = vsel %vm1421_vm14, %v5240_v8, %v1418_v4  ;;  %v4427_v8 = vld [vmem:[#allocation6 + $0x78] sm:$0xf]  ;;  %v4423_v4 = vld [vmem:[#allocation6 + $0x68] sm:$0xf] }
 0x2fa   :  { %v1427_v36 = vsel %vm1424_vm15, %v1426_v13, %v1422_v55  ;;  %1889 = vmatpush.bf16.msrb.mxu3 %v4448_v44  ;;  %v4428_v47 = vor.u32 %v5079_v54, %v4427_v8  ;;  %v5073_v55 = vld [vmem:[#allocation6 + $0x50] sm:$0xf0]  ;;  %v5072_v13 = vld [vmem:[#allocation6 + $0x4c] sm:$0xf]  ;;  %v4381_v44 = vld [vmem:[#allocation6 + $0x24] sm:$0xf0] }
 0x2fb   :  { %v1397_v57 = vmul.f32 %v5242_v46, %v1396_v33  ;;  %v1433_v17 = vsub.f32 1.0, %v1427_v36  ;;  %v1435_v18 = vmul.f32 %v1427_v36, %v5672_v42  ;;  %v4439_v42 = vld [vmem:[#allocation6 + $0x90] sm:$0xf]  ;;  %v4435_v33 = vld [vmem:[#allocation6 + $0x80] sm:$0xf] }
 0x2fc   :  { %v4440_v31 = vor.u32 %v5082_v30, %v4439_v42  ;;  %v4436_v61 = vor.u32 %v5080_v51, %v4435_v33  ;;  %v4387_v8 = vld [vmem:[#allocation6 + $0x20] sm:$0xf]  ;;  %v5068_v54 = vld [vmem:[#allocation6 + $0x28] sm:$0xf0]  ;;  %v4384_v33 = vor.u32 %v5066_v29, %v4381_v44 }
 0x2fd   :  { %v1398_v63 = vadd.f32 %v5242_v46, %v1397_v57  ;;  %v4388_v51 = vor.u32 %v5068_v54, %v4387_v8  ;;  %v5110_v54 = vld [vmem:[#allocation6 + $0xb8] sm:$0xf0] }
 0x2fe   :  { %1863 = vmatpush.bf16.msra.mxu1 %v4440_v31  ;;  %1890 = vmatpush.bf16.msrb.mxu3 %v4436_v61  ;;  %v4392_v31 = vor.u32 %v5070_v58, %v4391_v24  ;;  %v5064_v61 = vld [vmem:[#allocation6 + $0x8] sm:$0xf0]  ;;  %v5706_v58 = vld [vmem:[%s6209_s4] ss:$0 sm:$0xff] }
 0x2ff   :  { %v1402_v1 = vsel %vm1401_vm10, %v5242_v46, %v1398_v63  ;;  %v5078_v46 = vld [vmem:[#allocation6 + $0x7c] sm:$0xf]  ;;  %v4415_v63 = vld [vmem:[#allocation6 + $0x60] sm:$0xf] }
 0x300   :  { %v1407_v2 = vsel %vm1404_vm11, %v1406_v50, %v1402_v1  ;;  %v4432_v62 = vor.u32 %v5078_v46, %v4429_v49  ;;  %v5076_v50 = vld [vmem:[#allocation6 + $0x68] sm:$0xf0]  ;;  %v4380_v49 = vor.u32 %v5067_v41, %v4379_v40 }
 0x301   :  { %v1430_v9 = vmul.f32 %v1429_v0, %v1407_v2  ;;  %v5075_v0 = vld [vmem:[#allocation6 + $0x64] sm:$0xf]  ;;  %v4416_v1 = vor.u32 %v5076_v50, %v4415_v63  ;;  %v4417_v2 = vld [vmem:[#allocation6 + $0x6c] sm:$0xf0] }
 0x302   :  { %1864 = vmatpush.bf16.msra.mxu1 %v4428_v47  ;;  %1877 = vmatpush.bf16.msra.mxu2 %v4432_v62  ;;  %v4367_v62 = vld [vmem:[#allocation6] sm:$0xf]  ;;  %v5063_v63 = vld [vmem:[#allocation6 + $0x4] sm:$0xf]  ;;  %v4369_v50 = vld [vmem:[#allocation6 + $0xc] sm:$0xf0] }
 0x303   :  { %v1431_v48 = vadd.f32 %v1430_v9, %v377_v5  ;;  %v5077_v5 = vld [vmem:[#allocation6 + $0x70] sm:$0xf0]  ;;  %v4420_v9 = vor.u32 %v5075_v0, %v4417_v2  ;;  %v4375_v0 = vld [vmem:[#allocation6 + $0x8] sm:$0xf] }
 0x304   :  { %v4424_v10 = vor.u32 %v5077_v5, %v4423_v4 }
 0x305   :  { %5243 = vtanh.f32 %v1431_v48  ;;  %v4403_v48 = vld [vmem:[#allocation6 + $0x48] sm:$0xf] }
 0x306   :  { %1865 = vmatpush.bf16.msra.mxu1 %v4416_v1  ;;  %1878 = vmatpush.bf16.msra.mxu2 %v4420_v9  ;;  %v5065_v1 = vld [vmem:[#allocation6 + $0x10] sm:$0xf0] }
 0x307   :  { %1891 = vmatpush.bf16.msrb.mxu3 %v4424_v10  ;;  %v4372_v10 = vor.u32 %v5063_v63, %v4369_v50  ;;  %v5101_v63 = vld [vmem:[#allocation6 + $0x70] sm:$0xf0] }
 0x30b   :  { %v5244_v16 = vpop.eup %5243 }
 0x30c   :  { %v1434_v37 = vmul.f32 %v5244_v16, %v1433_v17  ;;  %v4404_v16 = vor.u32 %v5073_v55, %v4403_v48  ;;  %v4376_v48 = vor.u32 %v5065_v1, %v4375_v0  ;;  %v4549_v0 = vld [vmem:[#allocation6 + $0xa8] sm:$0xf]  ;;  %v5109_v1 = vld [vmem:[#allocation6 + $0xb0] sm:$0xf0] }
 0x30e   :  { %v5694_v21 = vadd.f32 %v1435_v18, %v1434_v37  ;;  %v4405_v37 = vld [vmem:[#allocation6 + $0x54] sm:$0xf0]  ;;  %v4411_v18 = vld [vmem:[#allocation6 + $0x50] sm:$0xf]  ;;  %1866 = vmatpush.bf16.msra.mxu1 %v4404_v16 }
 0x30f   :  { %v4408_v22 = vor.u32 %v5072_v13, %v4405_v37 }
 0x310   :  { %v1437_v43 = vpack.c.bf16 %v5694_v21, %v5694_v21 }
 0x311   :  { %1879 = vmatpush.bf16.msra.mxu2 %v4408_v22 }
 0x312   :  { %1439 = vst [vmem:[#allocation3 + $0xc] sm:$0xf] %v1437_v43  ;;  %1614 = vmatmul.bf16.vlgmr.msrb.gmra.mxu2 %v1437_v43  ;;  %1627 = vmatmul.bf16.vlgmr.msra.gmra.mxu3 %v1437_v43 }
 0x313   :  { %1640 = vmatmul.bf16.vlgmr.msra.gmra.mxu0 %v1437_v43  ;;  %v5074_v43 = vld [vmem:[#allocation6 + $0x58] sm:$0xf0]  ;;  %1867 = vmatpush.bf16.msra.mxu1 %v4392_v31 }
 0x314   :  { %v4412_v56 = vor.u32 %v5074_v43, %v4411_v18 }
 0x316   :  { %1892 = vmatpush.bf16.msrb.mxu3 %v4412_v56 }
 0x317   :  { %1868 = vmatpush.bf16.msra.mxu1 %v4380_v49  ;;  %v5107_v49 = vld [vmem:[#allocation6 + $0xa0] sm:$0xf0] }
 0x31a   :  { %1893 = vmatpush.bf16.msrb.mxu3 %v4400_v32 }
 0x31e   :  { %1894 = vmatpush.bf16.msrb.mxu3 %v4388_v51  ;;  %v4533_v51 = vld [vmem:[#allocation6 + $0x80] sm:$0xf] }
 0x322   :  { %1895 = vmatpush.bf16.msrb.mxu3 %v4376_v48 }
 0x390   :  { %v5698_v57 = vpop.f32.mrf.mxu0 }
 0x395   :  { %v1615_v36 = vpop.f32.mrf.mxu2  ;;  %v1628_v17 = vpop.f32.mrf.mxu3 }
 0x396   :  { %v1645_v15 = vadd.f32 %v1615_v36, %v5589_v11  ;;  %v1665_v20 = vadd.f32 %v1628_v17, %v351_v7  ;;  %v4396_v11 = vor.u32 %v5069_v25, %v4393_v26  ;;  %v4368_v7 = vor.u32 %v5064_v61, %v4367_v62  ;;  %v5104_v62 = vld [vmem:[#allocation6 + $0x88] sm:$0xf0]  ;;  %v4521_v61 = vld [vmem:[#allocation6 + $0x68] sm:$0xf] }
 0x397   :  { %v1685_v25 = vadd.f32 %v5706_v58, %v5698_v57  ;;  %v4522_v50 = vor.u32 %v5101_v63, %v4521_v61 }
 0x398   :  { %v4363_v42 = vmul.f32 -1.442695, %v1645_v15  ;;  %v4364_v30 = vmul.f32 -1.442695, %v1665_v20  ;;  %v1643_v14 = vpop.f32.mrf.mxu0  ;;  %1880 = vmatpush.bf16.msra.mxu2 %v4396_v11  ;;  %1869 = vmatpush.bf16.msra.mxu1 %v4368_v7 }
 0x39a   :  { %5245 = vpow2.f32 %v4363_v42 }
 0x39b   :  { %5247 = vpow2.f32 %v4364_v30 }
 0x39c   :  { %1881 = vmatpush.bf16.msra.mxu2 %v4384_v33 }
 0x39d   :  { %v1617_v46 = vpop.f32.mrf.mxu2  ;;  %v1630_v47 = vpop.f32.mrf.mxu3 }
 0x39e   :  { %v4545_v47 = vld [vmem:[#allocation6 + $0x98] sm:$0xf] }
 0x39f   :  { %v4546_v33 = vor.u32 %v5107_v49, %v4545_v47  ;;  %v5097_v47 = vld [vmem:[#allocation6 + $0x50] sm:$0xf0]  ;;  %v5096_v49 = vld [vmem:[#allocation6 + $0x4c] sm:$0xf] }
 0x3a0   :  { %v5246_v2 = vpop.eup %5245  ;;  %1882 = vmatpush.bf16.msra.mxu2 %v4372_v10  ;;  %v5098_v10 = vld [vmem:[#allocation6 + $0x58] sm:$0xf0] }
 0x3a1   :  { %v5248_v4 = vpop.eup %5247  ;;  %v1649_v5 = vadd.f32 1.0, %v5246_v2  ;;  %v5108_v2 = vld [vmem:[#allocation6 + $0xac] sm:$0xf] }
 0x3a2   :  { %v1669_v9 = vadd.f32 1.0, %v5248_v4  ;;  %v4550_v4 = vor.u32 %v5109_v1, %v4549_v0  ;;  %v5094_v0 = vld [vmem:[#allocation6 + $0x38] sm:$0xf0] }
 0x3a3   :  { %5249 = vrcp.f32 %v1649_v5  ;;  %v1661_v37 = vand.u32 2147483648, %v1649_v5  ;;  %v1659_v15 = vand.u32 2147483647, %v1649_v5  ;;  %vm1655_vm1 = vweird.f32 %v1649_v5 }
 0x3a4   :  { %5251 = vrcp.f32 %v1669_v9  ;;  %v1681_v42 = vand.u32 2147483648, %v1669_v9  ;;  %vm1675_vm5 = vweird.f32 %v1669_v9  ;;  %v1679_v30 = vand.u32 2147483647, %v1669_v9  ;;  %2118 = vmatpush.bf16.msrb.mxu0 %v4550_v4  ;;  %v4491_v4 = vld [vmem:[#allocation6 + $0x3c] sm:$0xf0] }
 0x3a5   :  { %v1662_v24 = vor.u32 1.1754944e-38, %v1661_v37  ;;  %vm1660_vm3 = vcmp.eq.f32.partialorder %v1659_v15, 8.507059e+37 }
 0x3a6   :  { %v1682_v11 = vor.u32 1.1754944e-38, %v1681_v42  ;;  %vm1680_vm7 = vcmp.eq.f32.partialorder %v1679_v30, 8.507059e+37  ;;  %v4513_v30 = vld [vmem:[#allocation6 + $0x60] sm:$0xf] }
 0x3a9   :  { %v5250_v55 = vpop.eup %5249 }
 0x3aa   :  { %v5252_v13 = vpop.eup %5251  ;;  %v1651_v36 = vmul.f32 %v5250_v55, %v1649_v5  ;;  %vm1656_vm0 = vweird.f32 %v5250_v55  ;;  %v4551_v5 = vld [vmem:[#allocation6 + $0xb4] sm:$0xf0] }
 0x3ab   :  { %v1671_v17 = vmul.f32 %v5252_v13, %v1669_v9  ;;  %vm1657_vm2 = vmor %vm1655_vm1, %vm1656_vm0  ;;  %vm1676_vm4 = vweird.f32 %v5252_v13  ;;  %v4554_v7 = vor.u32 %v5108_v2, %v4551_v5  ;;  %v4509_v9 = vld [vmem:[#allocation6 + $0x50] sm:$0xf]  ;;  %v5093_v2 = vld [vmem:[#allocation6 + $0x34] sm:$0xf] }
 0x3ac   :  { %v1652_v16 = vsub.f32 1.0, %v1651_v36  ;;  %vm1677_vm6 = vmor %vm1675_vm5, %vm1676_vm4  ;;  %v4510_v48 = vor.u32 %v5098_v10, %v4509_v9  ;;  %v5105_v36 = vld [vmem:[#allocation6 + $0x94] sm:$0xf]  ;;  %v4749_v5 = vld [vmem:[#allocation8 + $0x90] sm:$0xf]  ;;  %v4494_v9 = vor.u32 %v5093_v2, %v4491_v4 }
 0x3ad   :  { %v1672_v18 = vsub.f32 1.0, %v1671_v17  ;;  %2131 = vmatpush.bf16.msrb.mxu1 %v4554_v7  ;;  %v353_v7 = vadd.f32 %v5646_v59, %v5586_v52  ;;  %v5158_v10 = vld [vmem:[#allocation8 + $0x98] sm:$0xf0]  ;;  %v4677_v4 = vld [vmem:[#allocation8] sm:$0xf] }
 0x3ae   :  { %v1653_v43 = vmul.f32 %v5250_v55, %v1652_v16  ;;  %v4539_v16 = vld [vmem:[#allocation6 + $0x9c] sm:$0xf0] }
 0x3af   :  { %v1673_v20 = vmul.f32 %v5252_v13, %v1672_v18  ;;  %v4542_v37 = vor.u32 %v5105_v36, %v4539_v16  ;;  %v4497_v18 = vld [vmem:[#allocation6 + $0x38] sm:$0xf]  ;;  %v4750_v36 = vor.u32 %v5158_v10, %v4749_v5  ;;  %v4479_v16 = vld [vmem:[#allocation6 + $0x24] sm:$0xf0]  ;;  %v5140_v5 = vld [vmem:[#allocation8 + $0x8] sm:$0xf0] }
 0x3b0   :  { %v1654_v22 = vadd.f32 %v5250_v55, %v1653_v43  ;;  %v5095_v43 = vld [vmem:[#allocation6 + $0x40] sm:$0xf0] }
 0x3b1   :  { %v1674_v27 = vadd.f32 %v5252_v13, %v1673_v20  ;;  %2132 = vmatpush.bf16.msrb.mxu1 %v4542_v37  ;;  %v4498_v15 = vor.u32 %v5095_v43, %v4497_v18  ;;  %v4525_v20 = vld [vmem:[#allocation6 + $0x78] sm:$0xf] }
 0x3b2   :  { %v1658_v56 = vsel %vm1657_vm2, %v5250_v55, %v1654_v22  ;;  %v4537_v55 = vld [vmem:[#allocation6 + $0x90] sm:$0xf]  ;;  %v5103_v22 = vld [vmem:[#allocation6 + $0x80] sm:$0xf0]  ;;  %v4737_v37 = vld [vmem:[#allocation8 + $0x78] sm:$0xf] }
 0x3b3   :  { %v1663_v26 = vsel %vm1660_vm3, %v1662_v24, %v1658_v56  ;;  %v1678_v31 = vsel %vm1677_vm6, %v5252_v13, %v1674_v27  ;;  %v5106_v13 = vld [vmem:[#allocation6 + $0x98] sm:$0xf0]  ;;  %v4527_v56 = vld [vmem:[#allocation6 + $0x84] sm:$0xf0]  ;;  %v4485_v27 = vld [vmem:[#allocation6 + $0x20] sm:$0xf] }
 0x3b4   :  { %v1686_v28 = vmul.f32 %v1685_v25, %v1663_v26  ;;  %v1683_v32 = vsel %vm1680_vm7, %v1682_v11, %v1678_v31  ;;  %v4538_v17 = vor.u32 %v5106_v13, %v4537_v55  ;;  %v5102_v24 = vld [vmem:[#allocation6 + $0x7c] sm:$0xf]  ;;  %v4526_v25 = vor.u32 %v5103_v22, %v4525_v20  ;;  %v5099_v31 = vld [vmem:[#allocation6 + $0x64] sm:$0xf] }
 0x3b5   :  { %v1689_v40 = vsub.f32 1.0, %v1683_v32  ;;  %v1691_v29 = vmul.f32 %v1683_v32, %v5694_v21  ;;  %v4534_v21 = vor.u32 %v5104_v62, %v4533_v51  ;;  %v4530_v26 = vor.u32 %v5102_v24, %v4527_v56  ;;  %v4515_v32 = vld [vmem:[#allocation6 + $0x6c] sm:$0xf0]  ;;  %v4503_v51 = vld [vmem:[#allocation6 + $0x54] sm:$0xf0] }
 0x3b6   :  { %v1687_v14 = vadd.f32 %v1686_v28, %v5627_v39  ;;  %v4557_v39 = vld [vmem:[#allocation6 + $0xb0] sm:$0xf]  ;;  %2119 = vmatpush.bf16.msrb.mxu0 %v4538_v17  ;;  %v5092_v28 = vld [vmem:[#allocation6 + $0x28] sm:$0xf0]  ;;  %v4761_v62 = vld [vmem:[#allocation8 + $0xa8] sm:$0xf]  ;;  %v4506_v63 = vor.u32 %v5096_v49, %v4503_v51 }
 0x3b7   :  { %v4558_v46 = vor.u32 %v5110_v54, %v4557_v39  ;;  %2133 = vmatpush.bf16.msrb.mxu1 %v4530_v26  ;;  %v4486_v42 = vor.u32 %v5092_v28, %v4485_v27  ;;  %v5091_v55 = vld [vmem:[#allocation6 + $0x20] sm:$0xf0]  ;;  %v5090_v17 = vld [vmem:[#allocation6 + $0x1c] sm:$0xf]  ;;  %v4465_v24 = vld [vmem:[#allocation6] sm:$0xf] }
 0x3b8   :  { %5253 = vtanh.f32 %v1687_v14  ;;  %v5100_v14 = vld [vmem:[#allocation6 + $0x68] sm:$0xf0]  ;;  %v5087_v27 = vld [vmem:[#allocation6 + $0x4] sm:$0xf]  ;;  %v4467_v28 = vld [vmem:[#allocation6 + $0xc] sm:$0xf0] }
 0x3b9   :  { %2144 = vmatpush.bf16.msrb.mxu2 %v4558_v46  ;;  %v4514_v11 = vor.u32 %v5100_v14, %v4513_v30  ;;  %v4501_v46 = vld [vmem:[#allocation6 + $0x48] sm:$0xf]  ;;  %v5088_v26 = vld [vmem:[#allocation6 + $0x8] sm:$0xf0]  ;;  %v5146_v49 = vld [vmem:[#allocation8 + $0x38] sm:$0xf0] }
 0x3ba   :  { %2120 = vmatpush.bf16.msrb.mxu0 %v4526_v25  ;;  %v4482_v25 = vor.u32 %v5090_v17, %v4479_v16  ;;  %v5152_v30 = vld [vmem:[#allocation8 + $0x68] sm:$0xf0]  ;;  %v382_v17 = vadd.f32 %v5629_v45, %v5606_v6 }
 0x3bd   :  { %2145 = vmatpush.bf16.msrb.mxu2 %v4546_v33  ;;  %v4502_v33 = vor.u32 %v5097_v47, %v4501_v46  ;;  %v4701_v47 = vld [vmem:[#allocation8 + $0x30] sm:$0xf] }
 0x3be   :  { %v5254_v41 = vpop.eup %5253  ;;  %2121 = vmatpush.bf16.msrb.mxu0 %v4514_v11  ;;  %v4466_v11 = vor.u32 %v5088_v26, %v4465_v24 }
 0x3bf   :  { %v1690_v57 = vmul.f32 %v5254_v41, %v1689_v40  ;;  %v324_v40 = vadd.f32 %v5597_v35, %v5577_v38  ;;  %v4518_v41 = vor.u32 %v5099_v31, %v4515_v32  ;;  %v4470_v32 = vor.u32 %v5087_v27, %v4467_v28 }
 0x3c1   :  { %v5712_v44 = vadd.f32 %v1691_v29, %v1690_v57  ;;  %2146 = vmatpush.bf16.msrb.mxu2 %v4534_v21  ;;  %v4473_v29 = vld [vmem:[#allocation6 + $0x8] sm:$0xf]  ;;  %2134 = vmatpush.bf16.msrb.mxu1 %v4518_v41  ;;  %v5161_v21 = vld [vmem:[#allocation8 + $0xb0] sm:$0xf0] }
 0x3c2   :  { %v4762_v35 = vor.u32 %v5161_v21, %v4761_v62  ;;  %2122 = vmatpush.bf16.msrb.mxu0 %v4502_v33  ;;  %v4702_v62 = vor.u32 %v5146_v49, %v4701_v47  ;;  %v4689_v21 = vld [vmem:[#allocation8 + $0x18] sm:$0xf]  ;;  %v4647_v49 = vld [vmem:[#allocation6 + $0xa8] sm:$0xf] }
 0x3c3   :  { %v1693_v8 = vpack.c.bf16 %v5712_v44, %v5712_v44 }
 0x3c5   :  { %1695 = vst [vmem:[#allocation3 + $0x10] sm:$0xf] %v1693_v8  ;;  %1870 = vmatmul.bf16.vlgmr.msra.gmra.mxu1 %v1693_v8  ;;  %1883 = vmatmul.bf16.vlgmr.msra.gmra.mxu2 %v1693_v8 }
 0x3c6   :  { %1896 = vmatmul.bf16.vlgmr.msrb.gmra.mxu3 %v1693_v8  ;;  %2147 = vmatpush.bf16.msrb.mxu2 %v4522_v50  ;;  %v5089_v8 = vld [vmem:[#allocation6 + $0x10] sm:$0xf0]  ;;  %v4489_v50 = vld [vmem:[#allocation6 + $0x30] sm:$0xf] }
 0x3c7   :  { %v4474_v54 = vor.u32 %v5089_v8, %v4473_v29  ;;  %v4490_v1 = vor.u32 %v5094_v0, %v4489_v50  ;;  %2135 = vmatpush.bf16.msrb.mxu1 %v4506_v63  ;;  %v4713_v8 = vld [vmem:[#allocation8 + $0x48] sm:$0xf] }
 0x3c9   :  { %2123 = vmatpush.bf16.msrb.mxu0 %v4490_v1 }
 0x3ca   :  { %2148 = vmatpush.bf16.msrb.mxu2 %v4510_v48  ;;  %v4477_v48 = vld [vmem:[#allocation6 + $0x18] sm:$0xf] }
 0x3cb   :  { %v4478_v22 = vor.u32 %v5091_v55, %v4477_v48  ;;  %2136 = vmatpush.bf16.msrb.mxu1 %v4494_v9 }
 0x3cd   :  { %2124 = vmatpush.bf16.msrb.mxu0 %v4478_v22 }
 0x3ce   :  { %2149 = vmatpush.bf16.msrb.mxu2 %v4498_v15  ;;  %v5155_v15 = vld [vmem:[#allocation8 + $0x80] sm:$0xf0] }
 0x3cf   :  { %v4738_v56 = vor.u32 %v5155_v15, %v4737_v37  ;;  %2137 = vmatpush.bf16.msrb.mxu1 %v4482_v25 }
 0x3d1   :  { %2125 = vmatpush.bf16.msrb.mxu0 %v4466_v11  ;;  %v4643_v11 = vld [vmem:[#allocation6 + $0x98] sm:$0xf] }
 0x3d2   :  { %2150 = vmatpush.bf16.msrb.mxu2 %v4486_v42  ;;  %v4725_v42 = vld [vmem:[#allocation8 + $0x60] sm:$0xf] }
 0x3d3   :  { %2138 = vmatpush.bf16.msrb.mxu1 %v4470_v32 }
 0x3d6   :  { %2151 = vmatpush.bf16.msrb.mxu2 %v4474_v54 }
 0x3da   :  { %2664 = vmatpush.bf16.msra.mxu2 %v4762_v35 }
 0x3de   :  { %2665 = vmatpush.bf16.msra.mxu2 %v4750_v36  ;;  %v4678_v36 = vor.u32 %v5140_v5, %v4677_v4  ;;  %v4637_v5 = vld [vmem:[#allocation6 + $0x9c] sm:$0xf0] }
 0x3e2   :  { %2666 = vmatpush.bf16.msra.mxu2 %v4738_v56 }
 0x442   :  { %v1871_v57 = vpop.f32.mrf.mxu1 }
 0x443   :  { %v1901_v39 = vadd.f32 %v1871_v57, %v324_v40  ;;  %v4726_v40 = vor.u32 %v5152_v30, %v4725_v42  ;;  %v5728_v30 = vld [vmem:[#allocation3] sm:$0xff] }
 0x445   :  { %v4461_v61 = vmul.f32 -1.442695, %v1901_v39  ;;  %2667 = vmatpush.bf16.msra.mxu2 %v4726_v40  ;;  %v5149_v39 = vld [vmem:[#allocation8 + $0x50] sm:$0xf0]  ;;  %v5131_v40 = vld [vmem:[#allocation6 + $0xa0] sm:$0xf0] }
 0x446   :  { %v4714_v46 = vor.u32 %v5149_v39, %v4713_v8  ;;  %v5731_v8 = vld [vmem:[#allocation3 + $0x8] sm:$0xff] }
 0x447   :  { %5255 = vpow2.f32 %v4461_v61  ;;  %v5143_v61 = vld [vmem:[#allocation8 + $0x20] sm:$0xf0] }
 0x448   :  { %v1884_v13 = vpop.f32.mrf.mxu2  ;;  %v4690_v1 = vor.u32 %v5143_v61, %v4689_v21  ;;  %v4649_v21 = vld [vmem:[#allocation6 + $0xb4] sm:$0xf0] }
 0x449   :  { %v1921_v18 = vadd.f32 %v1884_v13, %v353_v7  ;;  %v1897_v43 = vpop.f32.mrf.mxu3  ;;  %2668 = vmatpush.bf16.msra.mxu2 %v4714_v46  ;;  %v5125_v46 = vld [vmem:[#allocation6 + $0x70] sm:$0xf0] }
 0x44a   :  { %v1873_v20 = vpop.f32.mrf.mxu1  ;;  %v1941_v48 = vadd.f32 %v5706_v58, %v1897_v43 }
 0x44b   :  { %v4462_v59 = vmul.f32 -1.442695, %v1921_v18 }
 0x44d   :  { %v5256_v14 = vpop.eup %5255  ;;  %5257 = vpow2.f32 %v4462_v59  ;;  %2669 = vmatpush.bf16.msra.mxu2 %v4702_v62 }
 0x44e   :  { %v1905_v31 = vadd.f32 1.0, %v5256_v14  ;;  %v4655_v14 = vld [vmem:[#allocation6 + $0xb0] sm:$0xf] }
 0x450   :  { %5259 = vrcp.f32 %v1905_v31  ;;  %v1886_v41 = vpop.f32.mrf.mxu2  ;;  %v1917_v35 = vand.u32 2147483648, %v1905_v31  ;;  %v1915_v0 = vand.u32 2147483647, %v1905_v31  ;;  %vm1911_vm9 = vweird.f32 %v1905_v31 }
 0x451   :  { %v1899_v57 = vpop.f32.mrf.mxu3  ;;  %2670 = vmatpush.bf16.msra.mxu2 %v4690_v1  ;;  %v4631_v41 = vld [vmem:[#allocation6 + $0x80] sm:$0xf]  ;;  %v5130_v1 = vld [vmem:[#allocation6 + $0x98] sm:$0xf0] }
 0x452   :  { %v1918_v10 = vor.u32 1.1754944e-38, %v1917_v35  ;;  %vm1916_vm11 = vcmp.eq.f32.partialorder %v1915_v0, 8.507059e+37  ;;  %v5128_v57 = vld [vmem:[#allocation6 + $0x88] sm:$0xf0]  ;;  %v5122_v35 = vld [vmem:[#allocation6 + $0x58] sm:$0xf0] }
 0x453   :  { %v5258_v29 = vpop.eup %5257  ;;  %v4635_v0 = vld [vmem:[#allocation6 + $0x90] sm:$0xf] }
 0x454   :  { %v1925_v54 = vadd.f32 1.0, %v5258_v29  ;;  %v4632_v29 = vor.u32 %v5128_v57, %v4631_v41  ;;  %v4636_v4 = vor.u32 %v5130_v1, %v4635_v0  ;;  %v4577_v0 = vld [vmem:[#allocation6 + $0x24] sm:$0xf0]  ;;  %v4833_v1 = vld [vmem:[#allocation9 + $0x78] sm:$0xf] }
 0x455   :  { %2671 = vmatpush.bf16.msra.mxu2 %v4678_v36  ;;  %v5126_v36 = vld [vmem:[#allocation6 + $0x7c] sm:$0xf] }
 0x456   :  { %v5260_v33 = vpop.eup %5259  ;;  %5261 = vrcp.f32 %v1925_v54  ;;  %v1937_v18 = vand.u32 2147483648, %v1925_v54  ;;  %v1935_v20 = vand.u32 2147483647, %v1925_v54  ;;  %vm1931_vm13 = vweird.f32 %v1925_v54 }
 0x457   :  { %v1907_v51 = vmul.f32 %v5260_v33, %v1905_v31  ;;  %vm1912_vm8 = vweird.f32 %v5260_v33  ;;  %v5134_v31 = vld [vmem:[#allocation6 + $0xb8] sm:$0xf0] }
 0x458   :  { %vm1913_vm10 = vmor %vm1911_vm9, %vm1912_vm8  ;;  %v1938_v43 = vor.u32 1.1754944e-38, %v1937_v18  ;;  %vm1936_vm15 = vcmp.eq.f32.partialorder %v1935_v20, 8.507059e+37  ;;  %v4656_v32 = vor.u32 %v5134_v31, %v4655_v14  ;;  %v4583_v18 = vld [vmem:[#allocation6 + $0x20] sm:$0xf]  ;;  %v5121_v14 = vld [vmem:[#allocation6 + $0x50] sm:$0xf0] }
 0x459   :  { %v1908_v63 = vsub.f32 1.0, %v1907_v51  ;;  %v5132_v51 = vld [vmem:[#allocation6 + $0xac] sm:$0xf] }
 0x45a   :  { %2400 = vmatpush.bf16.msra.mxu1 %v4656_v32  ;;  %v4652_v61 = vor.u32 %v5132_v51, %v4649_v21  ;;  %v5120_v31 = vld [vmem:[#allocation6 + $0x4c] sm:$0xf]  ;;  %v4601_v32 = vld [vmem:[#allocation6 + $0x54] sm:$0xf0] }
 0x45b   :  { %v1909_v50 = vmul.f32 %v5260_v33, %v1908_v63  ;;  %v4607_v63 = vld [vmem:[#allocation6 + $0x50] sm:$0xf]  ;;  %v4604_v41 = vor.u32 %v5120_v31, %v4601_v32  ;;  %v4751_v31 = vld [vmem:[#allocation8 + $0x9c] sm:$0xf0]  ;;  %v5159_v32 = vld [vmem:[#allocation8 + $0xa0] sm:$0xf0] }
 0x45c   :  { %v5262_v2 = vpop.eup %5261  ;;  %2387 = vmatpush.bf16.msra.mxu0 %v4652_v61  ;;  %v4575_v61 = vld [vmem:[#allocation6 + $0x18] sm:$0xf] }
 0x45d   :  { %v1927_v7 = vmul.f32 %v5262_v2, %v1925_v54  ;;  %v1910_v9 = vadd.f32 %v5260_v33, %v1909_v50  ;;  %vm1932_vm12 = vweird.f32 %v5262_v2  ;;  %v4619_v54 = vld [vmem:[#allocation6 + $0x68] sm:$0xf]  ;;  %v4608_v50 = vor.u32 %v5122_v35, %v4607_v63  ;;  %v5115_v63 = vld [vmem:[#allocation6 + $0x20] sm:$0xf0]  ;;  %v5114_v35 = vld [vmem:[#allocation6 + $0x1c] sm:$0xf] }
 0x45e   :  { %vm1933_vm14 = vmor %vm1931_vm13, %vm1932_vm12  ;;  %v4620_v47 = vor.u32 %v5125_v46, %v4619_v54  ;;  %v5118_v54 = vld [vmem:[#allocation6 + $0x38] sm:$0xf0] }
 0x45f   :  { %v1928_v55 = vsub.f32 1.0, %v1927_v7  ;;  %v1914_v13 = vsel %vm1913_vm10, %v5260_v33, %v1910_v9  ;;  %v5133_v33 = vld [vmem:[#allocation6 + $0xb0] sm:$0xf0]  ;;  %v4595_v9 = vld [vmem:[#allocation6 + $0x38] sm:$0xf] }
 0x460   :  { %v1919_v16 = vsel %vm1916_vm11, %v1918_v10, %v1914_v13  ;;  %v4648_v62 = vor.u32 %v5133_v33, %v4647_v49  ;;  %v5119_v10 = vld [vmem:[#allocation6 + $0x40] sm:$0xf0]  ;;  %v4589_v49 = vld [vmem:[#allocation6 + $0x3c] sm:$0xf0]  ;;  %v4845_v33 = vld [vmem:[#allocation9 + $0x90] sm:$0xf] }
 0x461   :  { %v1929_v37 = vmul.f32 %v5262_v2, %v1928_v55  ;;  %v1942_v15 = vmul.f32 %v1941_v48, %v1919_v16  ;;  %v4596_v48 = vor.u32 %v5119_v10, %v4595_v9  ;;  %v4623_v55 = vld [vmem:[#allocation6 + $0x78] sm:$0xf]  ;;  %v5127_v13 = vld [vmem:[#allocation6 + $0x80] sm:$0xf0]  ;;  %v4625_v16 = vld [vmem:[#allocation6 + $0x84] sm:$0xf0] }
 0x462   :  { %2374 = vmatpush.bf16.msra.mxu3 %v4648_v62  ;;  %v5182_v62 = vld [vmem:[#allocation9 + $0x98] sm:$0xf0] }
 0x463   :  { %v1943_v22 = vadd.f32 %v1942_v15, %v382_v17  ;;  %v1930_v24 = vadd.f32 %v5262_v2, %v1929_v37  ;;  %v4624_v17 = vor.u32 %v5127_v13, %v4623_v55  ;;  %v4628_v37 = vor.u32 %v5126_v36, %v4625_v16  ;;  %v5116_v15 = vld [vmem:[#allocation6 + $0x28] sm:$0xf0]  ;;  %v5111_v13 = vld [vmem:[#allocation6 + $0x4] sm:$0xf] }
 0x464   :  { %v4584_v20 = vor.u32 %v5116_v15, %v4583_v18  ;;  %v5740_v21 = vor.u32 %v5182_v62, %v4845_v33  ;;  %v5112_v55 = vld [vmem:[#allocation6 + $0x8] sm:$0xf0]  ;;  %v4821_v18 = vld [vmem:[#allocation9 + $0x60] sm:$0xf] }
 0x465   :  { %5263 = vtanh.f32 %v1943_v22  ;;  %v1934_v59 = vsel %vm1933_vm14, %v5262_v2, %v1930_v24  ;;  %v5129_v2 = vld [vmem:[#allocation6 + $0x94] sm:$0xf]  ;;  %v4611_v22 = vld [vmem:[#allocation6 + $0x60] sm:$0xf]  ;;  %v5124_v24 = vld [vmem:[#allocation6 + $0x68] sm:$0xf0] }
 0x466   :  { %v1939_v25 = vsel %vm1936_vm15, %v1938_v43, %v1934_v59  ;;  %v4640_v7 = vor.u32 %v5129_v2, %v4637_v5  ;;  %2375 = vmatpush.bf16.msra.mxu3 %v4636_v4  ;;  %v5123_v43 = vld [vmem:[#allocation6 + $0x64] sm:$0xf]  ;;  %v4612_v59 = vor.u32 %v5124_v24, %v4611_v22  ;;  %v4580_v4 = vor.u32 %v5114_v35, %v4577_v0  ;;  %v5176_v15 = vld [vmem:[#allocation9 + $0x68] sm:$0xf0]  ;;  %v4763_v24 = vld [vmem:[#allocation8 + $0xb4] sm:$0xf0] }
 0x467   :  { %v1945_v56 = vsub.f32 1.0, %v1939_v25  ;;  %v1947_v45 = vmul.f32 %v1939_v25, %v5712_v44  ;;  %v4644_v44 = vor.u32 %v5131_v40, %v4643_v11  ;;  %v4613_v25 = vld [vmem:[#allocation6 + $0x6c] sm:$0xf0]  ;;  %v4857_v40 = vld [vmem:[#allocation9 + $0xa8] sm:$0xf]  ;;  %v5749_v22 = vor.u32 %v5176_v15, %v4821_v18 }
 0x468   :  { %2388 = vmatpush.bf16.msra.mxu0 %v4640_v7  ;;  %v5179_v2 = vld [vmem:[#allocation9 + $0x80] sm:$0xf0]  ;;  %v356_v7 = vadd.f32 %v5648_v60, %v5586_v52  ;;  %v5160_v60 = vld [vmem:[#allocation8 + $0xac] sm:$0xf]  ;;  %v4745_v62 = vld [vmem:[#allocation8 + $0x80] sm:$0xf] }
 0x469   :  { %2401 = vmatpush.bf16.msra.mxu1 %v4644_v44  ;;  %v5185_v44 = vld [vmem:[#allocation9 + $0xb0] sm:$0xf0]  ;;  %v5743_v5 = vor.u32 %v5179_v2, %v4833_v1  ;;  %v5167_v0 = vld [vmem:[#allocation9 + $0x20] sm:$0xf0]  ;;  %v5164_v18 = vld [vmem:[#allocation9 + $0x8] sm:$0xf0] }
 0x46a   :  { %2376 = vmatpush.bf16.msra.mxu3 %v4624_v17  ;;  %v5737_v57 = vor.u32 %v5185_v44, %v4857_v40  ;;  %v5151_v1 = vld [vmem:[#allocation8 + $0x64] sm:$0xf] }
 0x46b   :  { %v5264_v26 = vpop.eup %5263 }
 0x46c   :  { %v1946_v27 = vmul.f32 %v5264_v26, %v1945_v56  ;;  %2389 = vmatpush.bf16.msra.mxu0 %v4628_v37  ;;  %v4616_v56 = vor.u32 %v5123_v43, %v4613_v25  ;;  %v4571_v26 = vld [vmem:[#allocation6 + $0x8] sm:$0xf]  ;;  %v4565_v37 = vld [vmem:[#allocation6 + $0xc] sm:$0xf0] }
 0x46d   :  { %2402 = vmatpush.bf16.msra.mxu1 %v4632_v29  ;;  %v4587_v29 = vld [vmem:[#allocation6 + $0x30] sm:$0xf] }
 0x46e   :  { %v5724_v28 = vadd.f32 %v1947_v45, %v1946_v27  ;;  %2377 = vmatpush.bf16.msra.mxu3 %v4612_v59  ;;  %v5113_v27 = vld [vmem:[#allocation6 + $0x10] sm:$0xf0]  ;;  %v4588_v46 = vor.u32 %v5118_v54, %v4587_v29  ;;  %v4769_v43 = vld [vmem:[#allocation8 + $0xb0] sm:$0xf] }
 0x46f   :  { %v4572_v45 = vor.u32 %v5113_v27, %v4571_v26  ;;  %v5162_v26 = vld [vmem:[#allocation8 + $0xb8] sm:$0xf0]  ;;  %v4809_v27 = vld [vmem:[#allocation9 + $0x48] sm:$0xf] }
 0x470   :  { %v1949_v42 = vpack.c.bf16 %v5724_v28, %v5724_v28  ;;  %2390 = vmatpush.bf16.msra.mxu0 %v4616_v56  ;;  %v4766_v56 = vor.u32 %v5160_v60, %v4763_v24  ;;  %v4715_v60 = vld [vmem:[#allocation8 + $0x54] sm:$0xf0] }
 0x471   :  { %2403 = vmatpush.bf16.msra.mxu1 %v4620_v47  ;;  %v5117_v47 = vld [vmem:[#allocation6 + $0x34] sm:$0xf] }
 0x472   :  { %1951 = vst [vmem:[#allocation3 + $0x14] sm:$0xf] %v1949_v42  ;;  %2126 = vmatmul.bf16.vlgmr.msrb.gmra.mxu0 %v1949_v42  ;;  %2139 = vmatmul.bf16.vlgmr.msrb.gmra.mxu1 %v1949_v42  ;;  %v4592_v51 = vor.u32 %v5117_v47, %v4589_v49  ;;  %v5170_v47 = vld [vmem:[#allocation9 + $0x38] sm:$0xf0] }
 0x473   :  { %2152 = vmatmul.bf16.vlgmr.msrb.gmra.mxu2 %v1949_v42  ;;  %v4599_v42 = vld [vmem:[#allocation6 + $0x48] sm:$0xf]  ;;  %v5154_v49 = vld [vmem:[#allocation8 + $0x7c] sm:$0xf] }
 0x474   :  { %v4600_v11 = vor.u32 %v5121_v14, %v4599_v42  ;;  %2391 = vmatpush.bf16.msra.mxu0 %v4604_v41  ;;  %v5157_v42 = vld [vmem:[#allocation8 + $0x94] sm:$0xf] }
 0x475   :  { %2404 = vmatpush.bf16.msra.mxu1 %v4608_v50  ;;  %v4576_v50 = vor.u32 %v5115_v63, %v4575_v61  ;;  %v4754_v40 = vor.u32 %v5157_v42, %v4751_v31  ;;  %v5156_v61 = vld [vmem:[#allocation8 + $0x88] sm:$0xf0] }
 0x476   :  { %2378 = vmatpush.bf16.msra.mxu3 %v4600_v11  ;;  %v4757_v11 = vld [vmem:[#allocation8 + $0x98] sm:$0xf]  ;;  %v4746_v35 = vor.u32 %v5156_v61, %v4745_v62  ;;  %v4697_v61 = vld [vmem:[#allocation8 + $0x20] sm:$0xf] }
 0x477   :  { %v4758_v44 = vor.u32 %v5159_v32, %v4757_v11 }
 0x478   :  { %2392 = vmatpush.bf16.msra.mxu0 %v4592_v51  ;;  %v4739_v51 = vld [vmem:[#allocation8 + $0x84] sm:$0xf0] }
 0x479   :  { %v5734_v39 = vld [vmem:[#allocation3 + $0x10] sm:$0xff]  ;;  %2405 = vmatpush.bf16.msra.mxu1 %v4596_v48  ;;  %v4563_v48 = vld [vmem:[#allocation6] sm:$0xf]  ;;  %v4742_v63 = vor.u32 %v5154_v49, %v4739_v51 }
 0x47a   :  { %2379 = vmatpush.bf16.msra.mxu3 %v4588_v46  ;;  %v4564_v16 = vor.u32 %v5112_v55, %v4563_v48  ;;  %v4797_v46 = vld [vmem:[#allocation9 + $0x30] sm:$0xf] }
 0x47b   :  { %v5757_v33 = vor.u32 %v5170_v47, %v4797_v46  ;;  %v5142_v46 = vld [vmem:[#allocation8 + $0x1c] sm:$0xf]  ;;  %v4691_v47 = vld [vmem:[#allocation8 + $0x24] sm:$0xf0] }
 0x47c   :  { %2393 = vmatpush.bf16.msra.mxu0 %v4580_v4  ;;  %v4727_v4 = vld [vmem:[#allocation8 + $0x6c] sm:$0xf0]  ;;  %v4694_v62 = vor.u32 %v5142_v46, %v4691_v47  ;;  %v5172_v46 = vld [vmem:[#allocation9 + $0x4c] sm:$0xf]  ;;  %v4811_v47 = vld [vmem:[#allocation9 + $0x54] sm:$0xf0] }
 0x47d   :  { %2406 = vmatpush.bf16.msra.mxu1 %v4584_v20  ;;  %v4568_v20 = vor.u32 %v5111_v13, %v4565_v37  ;;  %v4773_v37 = vld [vmem:[#allocation9] sm:$0xf] }
 0x47e   :  { %2380 = vmatpush.bf16.msra.mxu3 %v4576_v50  ;;  %v4785_v50 = vld [vmem:[#allocation9 + $0x18] sm:$0xf]  ;;  %v5766_v15 = vor.u32 %v5164_v18, %v4773_v37 }
 0x47f   :  { %v5762_v13 = vor.u32 %v5167_v0, %v4785_v50  ;;  %v5139_v0 = vld [vmem:[#allocation8 + $0x4] sm:$0xf] }
 0x480   :  { %2394 = vmatpush.bf16.msra.mxu0 %v4568_v20  ;;  %v5148_v20 = vld [vmem:[#allocation8 + $0x4c] sm:$0xf] }
 0x481   :  { %2407 = vmatpush.bf16.msra.mxu1 %v4572_v45  ;;  %v5173_v45 = vld [vmem:[#allocation9 + $0x50] sm:$0xf0]  ;;  %v4718_v24 = vor.u32 %v5148_v20, %v4715_v60 }
 0x482   :  { %2381 = vmatpush.bf16.msra.mxu3 %v4564_v16  ;;  %v5752_v14 = vor.u32 %v5173_v45, %v4809_v27  ;;  %v4709_v27 = vld [vmem:[#allocation8 + $0x38] sm:$0xf]  ;;  %v5147_v45 = vld [vmem:[#allocation8 + $0x40] sm:$0xf0] }
 0x483   :  { %2672 = vmatmul.bf16.vlgmr.msra.gmra.mxu2 %v5728_v30 }
 0x485   :  { %2942 = vmatpush.bf16.msrb.mxu1 %v5737_v57 }
 0x486   :  { %2693 = vmatpush.bf16.msrb.mxu3 %v4766_v56  ;;  %v5145_v56 = vld [vmem:[#allocation8 + $0x34] sm:$0xf] }
 0x489   :  { %2943 = vmatpush.bf16.msrb.mxu1 %v5740_v21 }
 0x48a   :  { %2694 = vmatpush.bf16.msrb.mxu3 %v4754_v40  ;;  %v4710_v40 = vor.u32 %v5147_v45, %v4709_v27  ;;  %v4859_v27 = vld [vmem:[#allocation9 + $0xb4] sm:$0xf0] }
 0x48d   :  { %2944 = vmatpush.bf16.msrb.mxu1 %v5743_v5 }
 0x48e   :  { %2695 = vmatpush.bf16.msrb.mxu3 %v4742_v63  ;;  %v5144_v63 = vld [vmem:[#allocation8 + $0x28] sm:$0xf0] }
 0x48f   :  { %v4698_v50 = vor.u32 %v5144_v63, %v4697_v61  ;;  %v5166_v63 = vld [vmem:[#allocation9 + $0x1c] sm:$0xf] }
 0x491   :  { %2945 = vmatpush.bf16.msrb.mxu1 %v5749_v22 }
 0x493   :  { %2677 = vmatmul.bf16.gmra.mxu2 %v5731_v8 }
 0x495   :  { %2946 = vmatpush.bf16.msrb.mxu1 %v5752_v14 }
 0x499   :  { %2947 = vmatpush.bf16.msrb.mxu1 %v5757_v33 }
 0x49d   :  { %2948 = vmatpush.bf16.msrb.mxu1 %v5762_v13 }
 0x4a1   :  { %2949 = vmatpush.bf16.msrb.mxu1 %v5766_v15 }
 0x4a3   :  { %2682 = vmatmul.bf16.gmra.mxu2 %v5734_v39 }
 0x4ef   :  { %v2127_v9 = vpop.f32.mrf.mxu0  ;;  %v2140_v10 = vpop.f32.mrf.mxu1 }
 0x4f0   :  { %v2157_v36 = vadd.f32 %v2127_v9, %v5603_v3  ;;  %v2177_v17 = vadd.f32 %v2140_v10, %v356_v7  ;;  %v4770_v3 = vor.u32 %v5162_v26, %v4769_v43  ;;  %v4733_v7 = vld [vmem:[#allocation8 + $0x68] sm:$0xf]  ;;  %v5153_v9 = vld [vmem:[#allocation8 + $0x70] sm:$0xf0]  ;;  %v4721_v43 = vld [vmem:[#allocation8 + $0x50] sm:$0xf] }
 0x4f1   :  { %v4703_v26 = vld [vmem:[#allocation8 + $0x3c] sm:$0xf0] }
 0x4f2   :  { %v4559_v59 = vmul.f32 -1.442695, %v2157_v36  ;;  %v4560_v25 = vmul.f32 -1.442695, %v2177_v17  ;;  %2722 = vmatpush.bf16.msrb.mxu0 %v4770_v3  ;;  %v4730_v36 = vor.u32 %v5151_v1, %v4727_v4  ;;  %v4734_v17 = vor.u32 %v5153_v9, %v4733_v7  ;;  %v4679_v1 = vld [vmem:[#allocation8 + $0xc] sm:$0xf0] }
 0x4f3   :  { %v4706_v11 = vor.u32 %v5145_v56, %v4703_v26  ;;  %v4685_v4 = vld [vmem:[#allocation8 + $0x8] sm:$0xf]  ;;  %v5141_v7 = vld [vmem:[#allocation8 + $0x10] sm:$0xf0] }
 0x4f4   :  { %5265 = vpow2.f32 %v4559_v59  ;;  %2696 = vmatpush.bf16.msrb.mxu3 %v4730_v36  ;;  %v5150_v59 = vld [vmem:[#allocation8 + $0x58] sm:$0xf0]  ;;  %v4686_v18 = vor.u32 %v5141_v7, %v4685_v4 }
 0x4f5   :  { %5267 = vpow2.f32 %v4560_v25  ;;  %v4722_v25 = vor.u32 %v5150_v59, %v4721_v43 }
 0x4f6   :  { %v5754_v41 = vpop.f32.mrf.mxu2  ;;  %2723 = vmatpush.bf16.msrb.mxu0 %v4758_v44 }
 0x4f7   :  { %v2129_v29 = vpop.f32.mrf.mxu0  ;;  %v2142_v54 = vpop.f32.mrf.mxu1  ;;  %v2197_v36 = vadd.f32 %v5706_v58, %v5754_v41 }
 0x4f8   :  { %2697 = vmatpush.bf16.msrb.mxu3 %v4718_v24 }
 0x4fa   :  { %v5266_v2 = vpop.eup %5265  ;;  %2724 = vmatpush.bf16.msrb.mxu0 %v4746_v35 }
 0x4fb   :  { %v5268_v10 = vpop.eup %5267  ;;  %v2161_v48 = vadd.f32 1.0, %v5266_v2 }
 0x4fc   :  { %v5759_v55 = vadd.f32 1.0, %v5268_v10  ;;  %2698 = vmatpush.bf16.msrb.mxu3 %v4706_v11  ;;  %v5178_v11 = vld [vmem:[#allocation9 + $0x7c] sm:$0xf] }
 0x4fd   :  { %5269 = vrcp.f32 %v2161_v48  ;;  %v2173_v54 = vand.u32 2147483648, %v2161_v48  ;;  %v2171_v51 = vand.u32 2147483647, %v2161_v48  ;;  %vm2167_vm1 = vweird.f32 %v2161_v48 }
 0x4fe   :  { %5271 = vrcp.f32 %v5759_v55  ;;  %v2155_v16 = vpop.f32.mrf.mxu2  ;;  %2725 = vmatpush.bf16.msrb.mxu0 %v4734_v17  ;;  %v4682_v17 = vor.u32 %v5139_v0, %v4679_v1  ;;  %v2193_v20 = vand.u32 2147483648, %v5759_v55  ;;  %vm2187_vm5 = vweird.f32 %v5759_v55  ;;  %v4775_v0 = vld [vmem:[#allocation9 + $0xc] sm:$0xf0] }
 0x4ff   :  { %v2174_v9 = vor.u32 1.1754944e-38, %v2173_v54  ;;  %vm2172_vm3 = vcmp.eq.f32.partialorder %v2171_v51, 8.507059e+37  ;;  %v2191_v60 = vand.u32 2147483647, %v5759_v55  ;;  %v5169_v51 = vld [vmem:[#allocation9 + $0x34] sm:$0xf] }
 0x500   :  { %2699 = vmatpush.bf16.msrb.mxu3 %v4694_v62  ;;  %v2194_v58 = vor.u32 1.1754944e-38, %v2193_v20  ;;  %v4799_v62 = vld [vmem:[#allocation9 + $0x3c] sm:$0xf0] }
 0x501   :  { %vm2192_vm7 = vcmp.eq.f32.partialorder %v2191_v60, 8.507059e+37  ;;  %v5809_v61 = vor.u32 %v5169_v51, %v4799_v62 }
 0x502   :  { %2726 = vmatpush.bf16.msrb.mxu0 %v4722_v25 }
 0x503   :  { %v5270_v3 = vpop.eup %5269 }
 0x504   :  { %v5272_v42 = vpop.eup %5271  ;;  %v2163_v31 = vmul.f32 %v5270_v3, %v2161_v48  ;;  %vm2168_vm0 = vweird.f32 %v5270_v3  ;;  %2700 = vmatpush.bf16.msrb.mxu3 %v4682_v17 }
 0x505   :  { %v2183_v32 = vmul.f32 %v5272_v42, %v5759_v55  ;;  %vm2169_vm2 = vmor %vm2167_vm1, %vm2168_vm0  ;;  %vm2188_vm4 = vweird.f32 %v5272_v42 }
 0x506   :  { %v2164_v44 = vsub.f32 1.0, %v2163_v31  ;;  %2727 = vmatpush.bf16.msrb.mxu0 %v4710_v40  ;;  %vm2189_vm6 = vmor %vm2187_vm5, %vm2188_vm4  ;;  %v4847_v31 = vld [vmem:[#allocation9 + $0x9c] sm:$0xf0] }
 0x507   :  { %v2184_v29 = vsub.f32 1.0, %v2183_v32  ;;  %v4835_v32 = vld [vmem:[#allocation9 + $0x84] sm:$0xf0] }
 0x508   :  { %v2165_v49 = vmul.f32 %v5270_v3, %v2164_v44  ;;  %v5791_v40 = vor.u32 %v5178_v11, %v4835_v32  ;;  %v5175_v44 = vld [vmem:[#allocation9 + $0x64] sm:$0xf] }
 0x509   :  { %v2185_v35 = vmul.f32 %v5272_v42, %v2184_v29  ;;  %v4823_v29 = vld [vmem:[#allocation9 + $0x6c] sm:$0xf0] }
 0x50a   :  { %v2166_v2 = vadd.f32 %v5270_v3, %v2165_v49  ;;  %2728 = vmatpush.bf16.msrb.mxu0 %v4698_v50  ;;  %v5796_v54 = vor.u32 %v5175_v44, %v4823_v29  ;;  %v5801_v49 = vor.u32 %v5172_v46, %v4811_v47  ;;  %v4817_v46 = vld [vmem:[#allocation9 + $0x50] sm:$0xf]  ;;  %v5174_v47 = vld [vmem:[#allocation9 + $0x58] sm:$0xf0] }
 0x50b   :  { %v2186_v37 = vadd.f32 %v5272_v42, %v2185_v35  ;;  %v4787_v35 = vld [vmem:[#allocation9 + $0x24] sm:$0xf0] }
 0x50c   :  { %v2170_v10 = vsel %vm2169_vm2, %v5270_v3, %v2166_v2  ;;  %v5184_v3 = vld [vmem:[#allocation9 + $0xac] sm:$0xf]  ;;  %v5814_v50 = vor.u32 %v5166_v63, %v4787_v35 }
 0x50d   :  { %v2175_v16 = vsel %vm2172_vm3, %v2174_v9, %v2170_v10  ;;  %v2190_v43 = vsel %vm2189_vm6, %v5272_v42, %v2186_v37  ;;  %v5181_v42 = vld [vmem:[#allocation9 + $0x94] sm:$0xf]  ;;  %v329_v10 = vadd.f32 %v5611_v12, %v5577_v38  ;;  %v4853_v12 = vld [vmem:[#allocation9 + $0x98] sm:$0xf] }
 0x50e   :  { %v2198_v48 = vmul.f32 %v2197_v36, %v2175_v16  ;;  %2729 = vmatpush.bf16.msrb.mxu0 %v4686_v18  ;;  %v2195_v41 = vsel %vm2192_vm7, %v2194_v58, %v2190_v43 }
 0x50f   :  { %v2201_v59 = vsub.f32 1.0, %v2195_v41  ;;  %v2203_v26 = vmul.f32 %v2195_v41, %v5724_v28  ;;  %v5786_v28 = vor.u32 %v5181_v42, %v4847_v31  ;;  %v5183_v41 = vld [vmem:[#allocation9 + $0xa0] sm:$0xf0]  ;;  %v4829_v42 = vld [vmem:[#allocation9 + $0x68] sm:$0xf] }
 0x510   :  { %v2199_v24 = vadd.f32 %v2198_v48, %v5636_v53  ;;  %v5782_v53 = vor.u32 %v5184_v3, %v4859_v27  ;;  %v5177_v31 = vld [vmem:[#allocation9 + $0x70] sm:$0xf0] }
 0x511   :  { %v5866_v44 = vor.u32 %v5177_v31, %v4829_v42 }
 0x512   :  { %5273 = vtanh.f32 %v2199_v24 }
 0x518   :  { %v5274_v25 = vpop.eup %5273 }
 0x519   :  { %v2202_v56 = vmul.f32 %v5274_v25, %v2201_v59  ;;  %v5856_v59 = vor.u32 %v5183_v41, %v4853_v12 }
 0x51b   :  { %v5778_v45 = vadd.f32 %v2203_v26, %v2202_v56  ;;  %v4841_v56 = vld [vmem:[#allocation9 + $0x80] sm:$0xf]  ;;  %v5180_v26 = vld [vmem:[#allocation9 + $0x88] sm:$0xf0] }
 0x51c   :  { %v5862_v27 = vor.u32 %v5180_v26, %v4841_v56 }
 0x51d   :  { %v2205_v55 = vpack.c.bf16 %v5778_v45, %v5778_v45 }
 0x51f   :  { %2207 = vst [vmem:[#allocation3 + $0x18] sm:$0xf] %v2205_v55  ;;  %2382 = vmatmul.bf16.vlgmr.msra.gmra.mxu3 %v2205_v55  ;;  %2395 = vmatmul.bf16.vlgmr.msra.gmra.mxu0 %v2205_v55 }
 0x520   :  { %2408 = vmatmul.bf16.vlgmr.msra.gmra.mxu1 %v2205_v55  ;;  %3033 = vmatpush.bf16.msra.mxu3 %v5737_v57 }
 0x521   :  { %2955 = vmatpush.bf16.msra.mxu1 %v5782_v53  ;;  %3046 = vmatpush.bf16.msra.mxu0 %v5782_v53 }
 0x524   :  { %3034 = vmatpush.bf16.msra.mxu3 %v5740_v21 }
 0x525   :  { %2956 = vmatpush.bf16.msra.mxu1 %v5786_v28  ;;  %3047 = vmatpush.bf16.msra.mxu0 %v5786_v28 }
 0x528   :  { %3035 = vmatpush.bf16.msra.mxu3 %v5743_v5 }
 0x529   :  { %2957 = vmatpush.bf16.msra.mxu1 %v5791_v40  ;;  %3048 = vmatpush.bf16.msra.mxu0 %v5791_v40 }
 0x52c   :  { %3036 = vmatpush.bf16.msra.mxu3 %v5749_v22 }
 0x52d   :  { %2958 = vmatpush.bf16.msra.mxu1 %v5796_v54  ;;  %3049 = vmatpush.bf16.msra.mxu0 %v5796_v54 }
 0x52f   :  { %2701 = vmatmul.bf16.vlgmr.msrb.gmra.mxu3 %v5728_v30  ;;  %2730 = vmatmul.bf16.vlgmr.msrb.gmra.mxu0 %v5728_v30  ;;  %v5163_v30 = vld [vmem:[#allocation9 + $0x4] sm:$0xf] }
 0x530   :  { %2950 = vmatmul.bf16.vlgmr.msrb.gmra.mxu1 %v5476_v34  ;;  %3037 = vmatpush.bf16.msra.mxu3 %v5752_v14  ;;  %v5819_v1 = vor.u32 %v5163_v30, %v4775_v0  ;;  %v5872_v30 = vor.u32 %v5174_v47, %v4817_v46 }
 0x531   :  { %2959 = vmatpush.bf16.msra.mxu1 %v5801_v49  ;;  %3050 = vmatpush.bf16.msra.mxu0 %v5801_v49 }
 0x534   :  { %3038 = vmatpush.bf16.msra.mxu3 %v5757_v33 }
 0x535   :  { %2960 = vmatpush.bf16.msra.mxu1 %v5809_v61  ;;  %3051 = vmatpush.bf16.msra.mxu0 %v5809_v61 }
 0x538   :  { %3039 = vmatpush.bf16.msra.mxu3 %v5762_v13 }
 0x539   :  { %2961 = vmatpush.bf16.msra.mxu1 %v5814_v50  ;;  %3052 = vmatpush.bf16.msra.mxu0 %v5814_v50 }
 0x53c   :  { %3040 = vmatpush.bf16.msra.mxu3 %v5766_v15 }
 0x53d   :  { %2962 = vmatpush.bf16.msra.mxu1 %v5819_v1  ;;  %3053 = vmatpush.bf16.msra.mxu0 %v5819_v1 }
 0x53f   :  { %2706 = vmatmul.bf16.gmra.mxu3 %v5731_v8  ;;  %2735 = vmatmul.bf16.gmra.mxu0 %v5731_v8  ;;  %v358_v8 = vadd.f32 %v5650_v23, %v5586_v52  ;;  %v4865_v52 = vld [vmem:[#allocation9 + $0xb0] sm:$0xf]  ;;  %v5186_v23 = vld [vmem:[#allocation9 + $0xb8] sm:$0xf0] }
 0x540   :  { %3137 = vmatpush.bf16.msrb.mxu3 %v5782_v53  ;;  %2963 = vmatmul.bf16.vlgmr.msra.gmra.mxu1 %v5476_v34  ;;  %v5849_v43 = vor.u32 %v5186_v23, %v4865_v52  ;;  %v5168_v23 = vld [vmem:[#allocation9 + $0x28] sm:$0xf0] }
 0x542   :  { %2968 = vmatpush.bf16.msrb.mxu2 %v5849_v43  ;;  %3059 = vmatpush.bf16.msrb.mxu1 %v5849_v43 }
 0x543   :  { %3150 = vmatpush.bf16.msrb.mxu0 %v5849_v43 }
 0x544   :  { %3138 = vmatpush.bf16.msrb.mxu3 %v5786_v28 }
 0x546   :  { %2969 = vmatpush.bf16.msrb.mxu2 %v5856_v59  ;;  %3060 = vmatpush.bf16.msrb.mxu1 %v5856_v59 }
 0x547   :  { %3151 = vmatpush.bf16.msrb.mxu0 %v5856_v59 }
 0x548   :  { %3139 = vmatpush.bf16.msrb.mxu3 %v5791_v40 }
 0x54a   :  { %2970 = vmatpush.bf16.msrb.mxu2 %v5862_v27  ;;  %3061 = vmatpush.bf16.msrb.mxu1 %v5862_v27 }
 0x54b   :  { %3152 = vmatpush.bf16.msrb.mxu0 %v5862_v27 }
 0x54c   :  { %3140 = vmatpush.bf16.msrb.mxu3 %v5796_v54 }
 0x54e   :  { %2971 = vmatpush.bf16.msrb.mxu2 %v5866_v44  ;;  %3062 = vmatpush.bf16.msrb.mxu1 %v5866_v44 }
 0x54f   :  { %2711 = vmatmul.bf16.gmra.mxu3 %v5734_v39  ;;  %2740 = vmatmul.bf16.gmra.mxu0 %v5734_v39 }
 0x550   :  { %3141 = vmatpush.bf16.msrb.mxu3 %v5801_v49  ;;  %3153 = vmatpush.bf16.msrb.mxu0 %v5866_v44 }
 0x552   :  { %2972 = vmatpush.bf16.msrb.mxu2 %v5872_v30  ;;  %3063 = vmatpush.bf16.msrb.mxu1 %v5872_v30 }
 0x554   :  { %3142 = vmatpush.bf16.msrb.mxu3 %v5809_v61  ;;  %3154 = vmatpush.bf16.msrb.mxu0 %v5872_v30 }
 0x558   :  { %3143 = vmatpush.bf16.msrb.mxu3 %v5814_v50 }
 0x55c   :  { %3144 = vmatpush.bf16.msrb.mxu3 %v5819_v1 }
 0x59c   :  { %v2396_v2 = vpop.f32.mrf.mxu0 }
 0x59d   :  { %v2433_v4 = vadd.f32 %v2396_v2, %v358_v8  ;;  %v5840_v7 = vpop.f32.mrf.mxu1  ;;  %v4805_v2 = vld [vmem:[#allocation9 + $0x38] sm:$0xf] }
 0x59f   :  { %v4658_v9 = vmul.f32 -1.442695, %v2433_v4  ;;  %v5171_v4 = vld [vmem:[#allocation9 + $0x40] sm:$0xf0] }
 0x5a1   :  { %5275 = vpow2.f32 %v4658_v9 }
 0x5a2   :  { %v2383_v36 = vpop.f32.mrf.mxu3 }
 0x5a3   :  { %v2413_v39 = vadd.f32 %v2383_v36, %v329_v10  ;;  %v5366_v10 = vld [vmem:[%s6209_s4] ss:$0 sm:$0xff] }
 0x5a4   :  { %v2398_v17 = vpop.f32.mrf.mxu0  ;;  %v2453_v36 = vadd.f32 %v5366_v10, %v5840_v7  ;;  %v4793_v7 = vld [vmem:[#allocation9 + $0x20] sm:$0xf] }
 0x5a5   :  { %v4657_v16 = vmul.f32 -1.442695, %v2413_v39  ;;  %v2411_v37 = vpop.f32.mrf.mxu1  ;;  %v5896_v41 = vor.u32 %v5168_v23, %v4793_v7 }
 0x5a6   :  { %v5885_v37 = vor.u32 %v5171_v4, %v4805_v2 }
 0x5a7   :  { %v5276_v18 = vpop.eup %5275  ;;  %5277 = vpow2.f32 %v4657_v16 }
 0x5a8   :  { %v5844_v20 = vadd.f32 1.0, %v5276_v18  ;;  %v387_v18 = vadd.f32 %v5652_v19, %v5606_v6  ;;  %2973 = vmatpush.bf16.msrb.mxu2 %v5885_v37  ;;  %3064 = vmatpush.bf16.msrb.mxu1 %v5885_v37  ;;  %v4781_v19 = vld [vmem:[#allocation9 + $0x8] sm:$0xf] }
 0x5a9   :  { %3155 = vmatpush.bf16.msrb.mxu0 %v5885_v37 }
 0x5aa   :  { %v2385_v48 = vpop.f32.mrf.mxu3  ;;  %5279 = vrcp.f32 %v5844_v20  ;;  %vm2443_vm13 = vweird.f32 %v5844_v20 }
 0x5ab   :  { %v2449_v48 = vand.u32 2147483648, %v5844_v20 }
 0x5ac   :  { %2974 = vmatpush.bf16.msrb.mxu2 %v5896_v41  ;;  %3065 = vmatpush.bf16.msrb.mxu1 %v5896_v41 }
 0x5ad   :  { %v5278_v60 = vpop.eup %5277  ;;  %v5847_v24 = vpop.f32.mrf.mxu1  ;;  %v2450_v6 = vor.u32 1.1754944e-38, %v2449_v48  ;;  %3156 = vmatpush.bf16.msrb.mxu0 %v5896_v41 }
 0x5ae   :  { %v2417_v38 = vadd.f32 1.0, %v5278_v60  ;;  %v2447_v60 = vand.u32 2147483647, %v5844_v20 }
 0x5b0   :  { %5281 = vrcp.f32 %v2417_v38  ;;  %v5854_v58 = vpop.eup %5279  ;;  %v2429_v51 = vand.u32 2147483648, %v2417_v38  ;;  %v2427_v63 = vand.u32 2147483647, %v2417_v38  ;;  %vm2423_vm9 = vweird.f32 %v2417_v38 }
 0x5b1   :  { %v2439_v25 = vmul.f32 %v5854_v58, %v5844_v20  ;;  %vm2444_vm12 = vweird.f32 %v5854_v58  ;;  %vm2448_vm15 = vcmp.eq.f32.partialorder %v2447_v60, 8.507059e+37 }
 0x5b2   :  { %v2430_v9 = vor.u32 1.1754944e-38, %v2429_v51  ;;  %vm2428_vm11 = vcmp.eq.f32.partialorder %v2427_v63, 8.507059e+37  ;;  %vm2445_vm14 = vmor %vm2443_vm13, %vm2444_vm12 }
 0x5b3   :  { %v2440_v32 = vsub.f32 1.0, %v2439_v25  ;;  %v5165_v25 = vld [vmem:[#allocation9 + $0x10] sm:$0xf0] }
 0x5b4   :  { %v5901_v20 = vor.u32 %v5165_v25, %v4781_v19 }
 0x5b5   :  { %v2953_v3 = vpop.f32.mrf.mxu1  ;;  %v2441_v35 = vmul.f32 %v5854_v58, %v2440_v32  ;;  %v2673_v32 = vpop.f32.mrf.mxu2 }
 0x5b6   :  { %v5282_v55 = vpop.eup %5281  ;;  %2975 = vmatpush.bf16.msrb.mxu2 %v5901_v20  ;;  %3066 = vmatpush.bf16.msrb.mxu1 %v5901_v20 }
 0x5b7   :  { %v2419_v11 = vmul.f32 %v5282_v55, %v2417_v38  ;;  %vm2424_vm8 = vweird.f32 %v5282_v55  ;;  %v2442_v17 = vadd.f32 %v5854_v58, %v2441_v35  ;;  %3157 = vmatpush.bf16.msrb.mxu0 %v5901_v20  ;;  %v2702_v35 = vpop.f32.mrf.mxu3 }
 0x5b8   :  { %vm2425_vm10 = vmor %vm2423_vm9, %vm2424_vm8 }
 0x5b9   :  { %v2420_v29 = vsub.f32 1.0, %v2419_v11  ;;  %v2446_v12 = vsel %vm2445_vm14, %v5854_v58, %v2442_v17 }
 0x5ba   :  { %v2451_v26 = vsel %vm2448_vm15, %v2450_v6, %v2446_v12  ;;  %3124 = vmatpush.bf16.msra.mxu2 %v5737_v57  ;;  %3215 = vmatpush.bf16.msra.mxu1 %v5737_v57 }
 0x5bb   :  { %v2421_v62 = vmul.f32 %v5282_v55, %v2420_v29  ;;  %v2457_v58 = vsub.f32 1.0, %v2451_v26 }
 0x5bd   :  { %v2422_v0 = vadd.f32 %v5282_v55, %v2421_v62  ;;  %v5875_v8 = vpop.f32.mrf.mxu1  ;;  %v5934_v29 = vpop.f32.mrf.mxu2 }
 0x5be   :  { %3125 = vmatpush.bf16.msra.mxu2 %v5740_v21  ;;  %3216 = vmatpush.bf16.msra.mxu1 %v5740_v21 }
 0x5bf   :  { %v2426_v39 = vsel %vm2425_vm10, %v5282_v55, %v2422_v0  ;;  %v2459_v55 = vmul.f32 %v2451_v26, %v5778_v45 }
 0x5c0   :  { %v2431_v16 = vsel %vm2428_vm11, %v2430_v9, %v2426_v39 }
 0x5c1   :  { %v2454_v52 = vmul.f32 %v2453_v36, %v2431_v16 }
 0x5c2   :  { %3126 = vmatpush.bf16.msra.mxu2 %v5743_v5  ;;  %3217 = vmatpush.bf16.msra.mxu1 %v5743_v5 }
 0x5c3   :  { %v2455_v38 = vadd.f32 %v2454_v52, %v387_v18 }
 0x5c5   :  { %5283 = vtanh.f32 %v2455_v38  ;;  %v2966_v56 = vpop.f32.mrf.mxu1  ;;  %v5939_v46 = vpop.f32.mrf.mxu2 }
 0x5c6   :  { %3127 = vmatpush.bf16.msra.mxu2 %v5749_v22  ;;  %3218 = vmatpush.bf16.msra.mxu1 %v5749_v22  ;;  %v5962_v56 = vld [vmem:[%s6213_s8] ss:$0 sm:$0xff] }
 0x5ca   :  { %3128 = vmatpush.bf16.msra.mxu2 %v5752_v14  ;;  %3219 = vmatpush.bf16.msra.mxu1 %v5752_v14 }
 0x5cb   :  { %v5284_v3 = vpop.eup %5283 }
 0x5cc   :  { %v2458_v42 = vmul.f32 %v5284_v3, %v2457_v58 }
 0x5cd   :  { %v5947_v0 = vpop.f32.mrf.mxu2 }
 0x5ce   :  { %v2460_v31 = vadd.f32 %v2459_v55, %v2458_v42  ;;  %3129 = vmatpush.bf16.msra.mxu2 %v5757_v33  ;;  %3220 = vmatpush.bf16.msra.mxu1 %v5757_v33  ;;  %v2731_v42 = vpop.f32.mrf.mxu0 }
 0x5d0   :  { %v2461_v11 = vpack.c.bf16 %v2460_v31, %v2460_v31 }
 0x5d2   :  { %2463 = vst [vmem:[#allocation3 + $0x1c] sm:$0xf] %v2461_v11  ;;  %3130 = vmatpush.bf16.msra.mxu2 %v5762_v13  ;;  %3221 = vmatpush.bf16.msra.mxu1 %v5762_v13 }
 0x5d5   :  { %v5951_v36 = vpop.f32.mrf.mxu2 }
 0x5d6   :  { %3131 = vmatpush.bf16.msra.mxu2 %v5766_v15  ;;  %3222 = vmatpush.bf16.msra.mxu1 %v5766_v15 }
 0x5d9   :  { %v5138_v45 = vld [vmem:[#allocation3 + $0x18] sm:$0xff] }
 0x5da   :  { %2687 = vmatmul.bf16.gmra.mxu2 %v5138_v45  ;;  %2716 = vmatmul.bf16.gmra.mxu3 %v5138_v45 }
 0x5db   :  { %2745 = vmatmul.bf16.gmra.mxu0 %v5138_v45 }
 0x5ea   :  { %2976 = vmatmul.bf16.vlgmr.msrb.gmra.mxu2 %v5476_v34  ;;  %v2504_v34 = vld [vmem:[%s6212_s7] sm:$0x7] }
 0x5eb   :  { %3228 = vmatpush.bf16.msrb.mxu2 %v5782_v53  ;;  %v5941_v47 = vperm.slane %v2504_v34, 0  ;;  %v5945_v63 = vperm.slane %v2504_v34, 1  ;;  %v5964_v3 = vperm.slane %v2504_v34, 2 }
 0x5ed   :  { %v2674_v51 = vadd.f32 %v2673_v32, %v5941_v47  ;;  %v2703_v4 = vadd.f32 %v2702_v35, %v5945_v63 }
 0x5ef   :  { %3229 = vmatpush.bf16.msrb.mxu2 %v5786_v28  ;;  %v2981_v62 = vadd.f32 %v5847_v24, %v2674_v51  ;;  %v3001_v9 = vadd.f32 %v5875_v8, %v2703_v4  ;;  %v5953_v24 = vpop.f32.mrf.mxu2 }
 0x5f1   :  { %v4867_v2 = vmul.f32 -1.442695, %v2981_v62  ;;  %v4868_v10 = vmul.f32 -1.442695, %v3001_v9  ;;  %v2732_v62 = vadd.f32 %v2731_v42, %v5964_v3 }
 0x5f3   :  { %3230 = vmatpush.bf16.msrb.mxu2 %v5791_v40  ;;  %5285 = vpow2.f32 %v4867_v2 }
 0x5f4   :  { %5287 = vpow2.f32 %v4868_v10 }
 0x5f7   :  { %3231 = vmatpush.bf16.msrb.mxu2 %v5796_v54 }
 0x5f9   :  { %v5286_v39 = vpop.eup %5285 }
 0x5fa   :  { %v2985_v17 = vadd.f32 1.0, %v5286_v39  ;;  %v5288_v16 = vpop.eup %5287 }
 0x5fb   :  { %3232 = vmatpush.bf16.msrb.mxu2 %v5801_v49  ;;  %v3005_v18 = vadd.f32 1.0, %v5288_v16 }
 0x5fc   :  { %5289 = vrcp.f32 %v2985_v17  ;;  %v2997_v25 = vand.u32 2147483648, %v2985_v17  ;;  %vm2991_vm1 = vweird.f32 %v2985_v17  ;;  %v2995_v26 = vand.u32 2147483647, %v2985_v17 }
 0x5fd   :  { %5291 = vrcp.f32 %v3005_v18  ;;  %v3017_v35 = vand.u32 2147483648, %v3005_v18  ;;  %vm3011_vm5 = vweird.f32 %v3005_v18  ;;  %v3015_v4 = vand.u32 2147483647, %v3005_v18 }
 0x5fe   :  { %v2998_v11 = vor.u32 1.1754944e-38, %v2997_v25  ;;  %vm2996_vm3 = vcmp.eq.f32.partialorder %v2995_v26, 8.507059e+37 }
 0x5ff   :  { %3233 = vmatpush.bf16.msrb.mxu2 %v5809_v61  ;;  %v3018_v10 = vor.u32 1.1754944e-38, %v3017_v35  ;;  %vm3016_vm7 = vcmp.eq.f32.partialorder %v3015_v4, 8.507059e+37 }
 0x602   :  { %v5290_v48 = vpop.eup %5289 }
 0x603   :  { %3234 = vmatpush.bf16.msrb.mxu2 %v5814_v50  ;;  %v2987_v52 = vmul.f32 %v5290_v48, %v2985_v17  ;;  %v5292_v23 = vpop.eup %5291  ;;  %vm2992_vm0 = vweird.f32 %v5290_v48 }
 0x604   :  { %v3007_v8 = vmul.f32 %v5292_v23, %v3005_v18  ;;  %vm2993_vm2 = vmor %vm2991_vm1, %vm2992_vm0  ;;  %vm3012_vm4 = vweird.f32 %v5292_v23  ;;  %v2733_v18 = vpop.f32.mrf.mxu0 }
 0x605   :  { %v2988_v60 = vsub.f32 1.0, %v2987_v52  ;;  %vm3013_vm6 = vmor %vm3011_vm5, %vm3012_vm4 }
 0x606   :  { %v3008_v6 = vsub.f32 1.0, %v3007_v8 }
 0x607   :  { %3235 = vmatpush.bf16.msrb.mxu2 %v5819_v1  ;;  %v2989_v38 = vmul.f32 %v5290_v48, %v2988_v60 }
 0x608   :  { %v3009_v58 = vmul.f32 %v5292_v23, %v3008_v6 }
 0x609   :  { %v2990_v19 = vadd.f32 %v5290_v48, %v2989_v38 }
 0x60a   :  { %v3010_v51 = vadd.f32 %v5292_v23, %v3009_v58 }
 0x60b   :  { %v2994_v55 = vsel %vm2993_vm2, %v5290_v48, %v2990_v19 }
 0x60c   :  { %v2999_v32 = vsel %vm2996_vm3, %v2998_v11, %v2994_v55  ;;  %v3014_v34 = vsel %vm3013_vm6, %v5292_v23, %v3010_v51  ;;  %v2704_v23 = vpop.f32.mrf.mxu3  ;;  %v5996_v6 = vpop.f32.mrf.mxu0 }
 0x60d   :  { %v3019_v17 = vsel %vm3016_vm7, %v3018_v10, %v3014_v34  ;;  %v2676_v34 = vadd.f32 %v5934_v29, %v5941_v47 }
 0x60e   :  { %v3025_v16 = vsub.f32 1.0, %v3019_v17  ;;  %v3027_v60 = vmul.f32 0.0, %v3019_v17 }
 0x614   :  { %v5998_v19 = vpop.f32.mrf.mxu3  ;;  %v6000_v25 = vpop.f32.mrf.mxu0 }
 0x61c   :  { %v6002_v26 = vpop.f32.mrf.mxu3  ;;  %v6004_v58 = vpop.f32.mrf.mxu0 }
 0x624   :  { %v6006_v55 = vpop.f32.mrf.mxu3  ;;  %v6008_v42 = vpop.f32.mrf.mxu0 }
 0x658   :  { %v6012_v11 = vpop.f32.mrf.mxu0 }
 0x659   :  { %6218 = vst [vmem:[#allocation15_spill] sm:$0xff] %v6012_v11 }
 0x65d   :  { %v5955_v7 = vpop.f32.mrf.mxu2 }
 0x665   :  { %v5957_v12 = vpop.f32.mrf.mxu2 }
 0x666   :  { %6217 = vst [vmem:[#allocation14_spill] sm:$0xff] %v5957_v12 }
 0x66d   :  { %v2977_v31 = vpop.f32.mrf.mxu2 }
 0x66e   :  { %v3021_v45 = vadd.f32 %v5962_v56, %v2977_v31  ;;  %v6010_v31 = vpop.f32.mrf.mxu3 }
 0x670   :  { %v3022_v2 = vmul.f32 %v3021_v45, %v2999_v32  ;;  %v6016_v32 = vpop.f32.mrf.mxu0 }
 0x671   :  { %6220 = vst [vmem:[#allocation17_spill] sm:$0xff] %v6016_v32 }
 0x672   :  { %v3023_v9 = vadd.f32 %v3022_v2, %v2732_v62  ;;  %v2705_v62 = vadd.f32 %v2704_v23, %v5945_v63 }
 0x674   :  { %5293 = vtanh.f32 %v3023_v9 }
 0x675   :  { %v2979_v39 = vpop.f32.mrf.mxu2 }
 0x676   :  { %v6014_v45 = vpop.f32.mrf.mxu3 }
 0x677   :  { %6219 = vst [vmem:[#allocation16_spill] sm:$0xff] %v6014_v45 }
 0x67a   :  { %v5294_v48 = vpop.eup %5293 }
 0x67b   :  { %v3026_v52 = vmul.f32 %v5294_v48, %v3025_v16 }
 0x67d   :  { %v5968_v8 = vadd.f32 %v3027_v60, %v3026_v52 }
 0x67e   :  { %v6018_v51 = vpop.f32.mrf.mxu3 }
 0x67f   :  { %v3032_v38 = vpack.c.bf16 %v5968_v8, %v5968_v8  ;;  %6221 = vst [vmem:[#allocation18_spill] sm:$0xff] %v6018_v51 }
 0x681   :  { %3041 = vmatmul.bf16.vlgmr.msra.gmra.mxu3 %v3032_v38  ;;  %3054 = vmatmul.bf16.vlgmr.msra.gmra.mxu0 %v3032_v38 }
 0x682   :  { %3067 = vmatmul.bf16.vlgmr.msrb.gmra.mxu1 %v3032_v38  ;;  %3241 = vmatpush.bf16.msra.mxu3 %v5849_v43 }
 0x683   :  { %3306 = vmatpush.bf16.msra.mxu0 %v5737_v57  ;;  %3319 = vmatpush.bf16.msrb.mxu1 %v5782_v53 }
 0x686   :  { %3242 = vmatpush.bf16.msra.mxu3 %v5856_v59 }
 0x687   :  { %3307 = vmatpush.bf16.msra.mxu0 %v5740_v21  ;;  %3320 = vmatpush.bf16.msrb.mxu1 %v5786_v28 }
 0x68a   :  { %3243 = vmatpush.bf16.msra.mxu3 %v5862_v27 }
 0x68b   :  { %3308 = vmatpush.bf16.msra.mxu0 %v5743_v5  ;;  %3321 = vmatpush.bf16.msrb.mxu1 %v5791_v40 }
 0x68e   :  { %3244 = vmatpush.bf16.msra.mxu3 %v5866_v44 }
 0x68f   :  { %3309 = vmatpush.bf16.msra.mxu0 %v5749_v22  ;;  %3322 = vmatpush.bf16.msrb.mxu1 %v5796_v54 }
 0x692   :  { %3245 = vmatpush.bf16.msra.mxu3 %v5872_v30 }
 0x693   :  { %3310 = vmatpush.bf16.msra.mxu0 %v5752_v14  ;;  %3323 = vmatpush.bf16.msrb.mxu1 %v5801_v49 }
 0x696   :  { %3246 = vmatpush.bf16.msra.mxu3 %v5885_v37 }
 0x697   :  { %3311 = vmatpush.bf16.msra.mxu0 %v5757_v33  ;;  %3324 = vmatpush.bf16.msrb.mxu1 %v5809_v61 }
 0x69a   :  { %3247 = vmatpush.bf16.msra.mxu3 %v5896_v41 }
 0x69b   :  { %3312 = vmatpush.bf16.msra.mxu0 %v5762_v13  ;;  %3325 = vmatpush.bf16.msrb.mxu1 %v5814_v50 }
 0x69e   :  { %3248 = vmatpush.bf16.msra.mxu3 %v5901_v20 }
 0x69f   :  { %3313 = vmatpush.bf16.msra.mxu0 %v5766_v15  ;;  %3326 = vmatpush.bf16.msrb.mxu1 %v5819_v1 }
 0x6fe   :  { %v3055_v35 = vpop.f32.mrf.mxu0 }
 0x6ff   :  { %v3092_v2 = vadd.f32 %v3055_v35, %v2705_v62  ;;  %v3068_v4 = vpop.f32.mrf.mxu1 }
 0x701   :  { %v4870_v9 = vmul.f32 -1.442695, %v3092_v2 }
 0x703   :  { %5295 = vpow2.f32 %v4870_v9 }
 0x704   :  { %v3042_v10 = vpop.f32.mrf.mxu3 }
 0x705   :  { %v3072_v39 = vadd.f32 %v3042_v10, %v2676_v34 }
 0x706   :  { %v3057_v17 = vpop.f32.mrf.mxu0 }
 0x707   :  { %v4869_v16 = vmul.f32 -1.442695, %v3072_v39  ;;  %v3070_v48 = vpop.f32.mrf.mxu1 }
 0x709   :  { %v5296_v52 = vpop.eup %5295  ;;  %5297 = vpow2.f32 %v4869_v16  ;;  %v3112_v16 = vadd.f32 %v5962_v56, %v3068_v4 }
 0x70a   :  { %v3096_v60 = vadd.f32 1.0, %v5296_v52 }
 0x70c   :  { %v3044_v38 = vpop.f32.mrf.mxu3  ;;  %5299 = vrcp.f32 %v3096_v60  ;;  %vm3102_vm13 = vweird.f32 %v3096_v60 }
 0x70d   :  { %v2734_v38 = vadd.f32 %v2733_v18, %v5964_v3 }
 0x70f   :  { %v5298_v32 = vpop.eup %5297 }
 0x710   :  { %v3076_v23 = vadd.f32 1.0, %v5298_v32 }
 0x712   :  { %5301 = vrcp.f32 %v3076_v23  ;;  %v5300_v62 = vpop.eup %5299  ;;  %v3088_v9 = vand.u32 2147483648, %v3076_v23  ;;  %v3086_v34 = vand.u32 2147483647, %v3076_v23  ;;  %vm3082_vm9 = vweird.f32 %v3076_v23 }
 0x713   :  { %v3098_v35 = vmul.f32 %v5300_v62, %v3096_v60  ;;  %vm3103_vm12 = vweird.f32 %v5300_v62 }
 0x714   :  { %v3089_v17 = vor.u32 1.1754944e-38, %v3088_v9  ;;  %vm3087_vm11 = vcmp.eq.f32.partialorder %v3086_v34, 8.507059e+37  ;;  %vm3104_vm14 = vmor %vm3102_vm13, %vm3103_vm12 }
 0x715   :  { %v3099_v12 = vsub.f32 1.0, %v3098_v35  ;;  %v3108_v35 = vand.u32 2147483648, %v3096_v60 }
 0x717   :  { %v3100_v10 = vmul.f32 %v5300_v62, %v3099_v12 }
 0x718   :  { %v5302_v2 = vpop.eup %5301 }
 0x719   :  { %v3078_v51 = vmul.f32 %v5302_v2, %v3076_v23  ;;  %vm3083_vm8 = vweird.f32 %v5302_v2  ;;  %v3101_v32 = vadd.f32 %v5300_v62, %v3100_v10 }
 0x71a   :  { %vm3084_vm10 = vmor %vm3082_vm9, %vm3083_vm8 }
 0x71b   :  { %v3079_v29 = vsub.f32 1.0, %v3078_v51  ;;  %v3105_v12 = vsel %vm3104_vm14, %v5300_v62, %v3101_v32 }
 0x71d   :  { %v3080_v11 = vmul.f32 %v5302_v2, %v3079_v29  ;;  %v3106_v29 = vand.u32 2147483647, %v3096_v60  ;;  %v2708_v60 = vadd.f32 %v5998_v19, %v5945_v63 }
 0x71f   :  { %v3081_v39 = vadd.f32 %v5302_v2, %v3080_v11  ;;  %v3109_v11 = vor.u32 1.1754944e-38, %v3108_v35  ;;  %vm3107_vm15 = vcmp.eq.f32.partialorder %v3106_v29, 8.507059e+37 }
 0x721   :  { %v3085_v48 = vsel %vm3084_vm10, %v5302_v2, %v3081_v39  ;;  %v3110_v23 = vsel %vm3107_vm15, %v3109_v11, %v3105_v12 }
 0x722   :  { %v3090_v52 = vsel %vm3087_vm11, %v3089_v17, %v3085_v48  ;;  %v3116_v9 = vsub.f32 1.0, %v3110_v23  ;;  %v3118_v34 = vmul.f32 %v3110_v23, %v5968_v8 }
 0x723   :  { %v3113_v51 = vmul.f32 %v3112_v16, %v3090_v52 }
 0x725   :  { %v3114_v45 = vadd.f32 %v3113_v51, %v2734_v38 }
 0x727   :  { %5303 = vtanh.f32 %v3114_v45  ;;  %v2679_v45 = vadd.f32 %v5939_v46, %v5941_v47 }
 0x72d   :  { %v5304_v4 = vpop.eup %5303 }
 0x72e   :  { %v3117_v2 = vmul.f32 %v5304_v4, %v3116_v9 }
 0x730   :  { %v6026_v10 = vadd.f32 %v3118_v34, %v3117_v2 }
 0x732   :  { %v3123_v18 = vpack.c.bf16 %v6026_v10, %v6026_v10 }
 0x734   :  { %3132 = vmatmul.bf16.vlgmr.msra.gmra.mxu2 %v3123_v18  ;;  %3145 = vmatmul.bf16.vlgmr.msrb.gmra.mxu3 %v3123_v18 }
 0x735   :  { %3158 = vmatmul.bf16.vlgmr.msrb.gmra.mxu0 %v3123_v18  ;;  %3332 = vmatpush.bf16.msra.mxu2 %v5849_v43 }
 0x736   :  { %3397 = vmatpush.bf16.msrb.mxu3 %v5737_v57  ;;  %3410 = vmatpush.bf16.msrb.mxu0 %v5782_v53 }
 0x739   :  { %3333 = vmatpush.bf16.msra.mxu2 %v5856_v59 }
 0x73a   :  { %3398 = vmatpush.bf16.msrb.mxu3 %v5740_v21  ;;  %3411 = vmatpush.bf16.msrb.mxu0 %v5786_v28 }
 0x73d   :  { %3334 = vmatpush.bf16.msra.mxu2 %v5862_v27 }
 0x73e   :  { %3399 = vmatpush.bf16.msrb.mxu3 %v5743_v5  ;;  %3412 = vmatpush.bf16.msrb.mxu0 %v5791_v40 }
 0x741   :  { %3335 = vmatpush.bf16.msra.mxu2 %v5866_v44 }
 0x742   :  { %3400 = vmatpush.bf16.msrb.mxu3 %v5749_v22  ;;  %3413 = vmatpush.bf16.msrb.mxu0 %v5796_v54 }
 0x745   :  { %3336 = vmatpush.bf16.msra.mxu2 %v5872_v30 }
 0x746   :  { %3401 = vmatpush.bf16.msrb.mxu3 %v5752_v14  ;;  %3414 = vmatpush.bf16.msrb.mxu0 %v5801_v49 }
 0x749   :  { %3337 = vmatpush.bf16.msra.mxu2 %v5885_v37 }
 0x74a   :  { %3402 = vmatpush.bf16.msrb.mxu3 %v5757_v33  ;;  %3415 = vmatpush.bf16.msrb.mxu0 %v5809_v61 }
 0x74d   :  { %3338 = vmatpush.bf16.msra.mxu2 %v5896_v41 }
 0x74e   :  { %3403 = vmatpush.bf16.msrb.mxu3 %v5762_v13  ;;  %3416 = vmatpush.bf16.msrb.mxu0 %v5814_v50 }
 0x751   :  { %3339 = vmatpush.bf16.msra.mxu2 %v5901_v20 }
 0x752   :  { %3404 = vmatpush.bf16.msrb.mxu3 %v5766_v15  ;;  %3417 = vmatpush.bf16.msrb.mxu0 %v5819_v1 }
 0x7b2   :  { %v3159_v8 = vpop.f32.mrf.mxu0 }
 0x7b7   :  { %v3133_v62 = vpop.f32.mrf.mxu2  ;;  %v3146_v39 = vpop.f32.mrf.mxu3 }
 0x7b8   :  { %v3163_v17 = vadd.f32 %v3133_v62, %v2679_v45  ;;  %v3183_v16 = vadd.f32 %v3146_v39, %v2708_v60 }
 0x7ba   :  { %v4871_v48 = vmul.f32 -1.442695, %v3163_v17  ;;  %v4872_v32 = vmul.f32 -1.442695, %v3183_v16  ;;  %v3161_v52 = vpop.f32.mrf.mxu0  ;;  %v3203_v17 = vadd.f32 %v5962_v56, %v3159_v8 }
 0x7bb   :  { %v2737_v52 = vadd.f32 %v5996_v6, %v5964_v3 }
 0x7bc   :  { %5305 = vpow2.f32 %v4871_v48 }
 0x7bd   :  { %5307 = vpow2.f32 %v4872_v32 }
 0x7bf   :  { %v3135_v38 = vpop.f32.mrf.mxu2  ;;  %v3148_v35 = vpop.f32.mrf.mxu3 }
 0x7c2   :  { %v5306_v51 = vpop.eup %5305 }
 0x7c3   :  { %v5308_v29 = vpop.eup %5307  ;;  %v3167_v12 = vadd.f32 1.0, %v5306_v51 }
 0x7c4   :  { %v3187_v11 = vadd.f32 1.0, %v5308_v29 }
 0x7c5   :  { %5309 = vrcp.f32 %v3167_v12  ;;  %v3179_v2 = vand.u32 2147483648, %v3167_v12  ;;  %v3177_v45 = vand.u32 2147483647, %v3167_v12  ;;  %vm3173_vm1 = vweird.f32 %v3167_v12 }
 0x7c6   :  { %5311 = vrcp.f32 %v3187_v11  ;;  %v3199_v35 = vand.u32 2147483648, %v3187_v11  ;;  %vm3193_vm5 = vweird.f32 %v3187_v11  ;;  %v3197_v51 = vand.u32 2147483647, %v3187_v11 }
 0x7c7   :  { %v3180_v39 = vor.u32 1.1754944e-38, %v3179_v2  ;;  %vm3178_vm3 = vcmp.eq.f32.partialorder %v3177_v45, 8.507059e+37  ;;  %v2710_v45 = vadd.f32 %v6002_v26, %v5945_v63 }
 0x7c8   :  { %vm3198_vm7 = vcmp.eq.f32.partialorder %v3197_v51, 8.507059e+37 }
 0x7cb   :  { %v5310_v46 = vpop.eup %5309 }
 0x7cc   :  { %v5312_v23 = vpop.eup %5311  ;;  %v3169_v19 = vmul.f32 %v5310_v46, %v3167_v12  ;;  %vm3174_vm0 = vweird.f32 %v5310_v46  ;;  %v3200_v12 = vor.u32 1.1754944e-38, %v3199_v35 }
 0x7cd   :  { %v3189_v9 = vmul.f32 %v5312_v23, %v3187_v11  ;;  %vm3175_vm2 = vmor %vm3173_vm1, %vm3174_vm0  ;;  %vm3194_vm4 = vweird.f32 %v5312_v23 }
 0x7ce   :  { %v3170_v4 = vsub.f32 1.0, %v3169_v19  ;;  %vm3195_vm6 = vmor %vm3193_vm5, %vm3194_vm4 }
 0x7cf   :  { %v3190_v34 = vsub.f32 1.0, %v3189_v9 }
 0x7d0   :  { %v3171_v18 = vmul.f32 %v5310_v46, %v3170_v4 }
 0x7d1   :  { %v3191_v60 = vmul.f32 %v5312_v23, %v3190_v34 }
 0x7d2   :  { %v3172_v62 = vadd.f32 %v5310_v46, %v3171_v18 }
 0x7d3   :  { %v3192_v32 = vadd.f32 %v5312_v23, %v3191_v60 }
 0x7d4   :  { %v3176_v16 = vsel %vm3175_vm2, %v5310_v46, %v3172_v62 }
 0x7d5   :  { %v3181_v48 = vsel %vm3178_vm3, %v3180_v39, %v3176_v16  ;;  %v3196_v19 = vsel %vm3195_vm6, %v5312_v23, %v3192_v32 }
 0x7d6   :  { %v3204_v38 = vmul.f32 %v3203_v17, %v3181_v48  ;;  %v3201_v9 = vsel %vm3198_vm7, %v3200_v12, %v3196_v19 }
 0x7d7   :  { %v3207_v8 = vsub.f32 1.0, %v3201_v9  ;;  %v3209_v2 = vmul.f32 %v3201_v9, %v6026_v10  ;;  %v2681_v10 = vadd.f32 %v5947_v0, %v5941_v47 }
 0x7d8   :  { %v3205_v29 = vadd.f32 %v3204_v38, %v2737_v52 }
 0x7da   :  { %5313 = vtanh.f32 %v3205_v29 }
 0x7e0   :  { %v5314_v46 = vpop.eup %5313 }
 0x7e1   :  { %v3208_v4 = vmul.f32 %v5314_v46, %v3207_v8 }
 0x7e3   :  { %v6062_v34 = vadd.f32 %v3209_v2, %v3208_v4 }
 0x7e5   :  { %v3214_v6 = vpack.c.bf16 %v6062_v34, %v6062_v34 }
 0x7e7   :  { %3223 = vmatmul.bf16.vlgmr.msra.gmra.mxu1 %v3214_v6  ;;  %3236 = vmatmul.bf16.vlgmr.msrb.gmra.mxu2 %v3214_v6 }
 0x7e8   :  { %3249 = vmatmul.bf16.vlgmr.msra.gmra.mxu3 %v3214_v6  ;;  %3423 = vmatpush.bf16.msra.mxu1 %v5849_v43 }
 0x7e9   :  { %3488 = vmatpush.bf16.msrb.mxu2 %v5737_v57  ;;  %3501 = vmatpush.bf16.msra.mxu3 %v5782_v53 }
 0x7ec   :  { %3424 = vmatpush.bf16.msra.mxu1 %v5856_v59 }
 0x7ed   :  { %3489 = vmatpush.bf16.msrb.mxu2 %v5740_v21  ;;  %3502 = vmatpush.bf16.msra.mxu3 %v5786_v28 }
 0x7f0   :  { %3425 = vmatpush.bf16.msra.mxu1 %v5862_v27 }
 0x7f1   :  { %3490 = vmatpush.bf16.msrb.mxu2 %v5743_v5  ;;  %3503 = vmatpush.bf16.msra.mxu3 %v5791_v40 }
 0x7f4   :  { %3426 = vmatpush.bf16.msra.mxu1 %v5866_v44 }
 0x7f5   :  { %3491 = vmatpush.bf16.msrb.mxu2 %v5749_v22  ;;  %3504 = vmatpush.bf16.msra.mxu3 %v5796_v54 }
 0x7f8   :  { %3427 = vmatpush.bf16.msra.mxu1 %v5872_v30 }
 0x7f9   :  { %3492 = vmatpush.bf16.msrb.mxu2 %v5752_v14  ;;  %3505 = vmatpush.bf16.msra.mxu3 %v5801_v49 }
 0x7fc   :  { %3428 = vmatpush.bf16.msra.mxu1 %v5885_v37 }
 0x7fd   :  { %3493 = vmatpush.bf16.msrb.mxu2 %v5757_v33  ;;  %3506 = vmatpush.bf16.msra.mxu3 %v5809_v61 }
 0x800   :  { %3429 = vmatpush.bf16.msra.mxu1 %v5896_v41 }
 0x801   :  { %3494 = vmatpush.bf16.msrb.mxu2 %v5762_v13  ;;  %3507 = vmatpush.bf16.msra.mxu3 %v5814_v50 }
 0x804   :  { %3430 = vmatpush.bf16.msra.mxu1 %v5901_v20 }
 0x805   :  { %3495 = vmatpush.bf16.msrb.mxu2 %v5766_v15  ;;  %3508 = vmatpush.bf16.msra.mxu3 %v5819_v1 }
 0x864   :  { %v3224_v11 = vpop.f32.mrf.mxu1 }
 0x865   :  { %v3254_v23 = vadd.f32 %v3224_v11, %v2681_v10 }
 0x867   :  { %v4873_v18 = vmul.f32 -1.442695, %v3254_v23  ;;  %v2739_v23 = vadd.f32 %v6000_v25, %v5964_v3 }
 0x869   :  { %5315 = vpow2.f32 %v4873_v18 }
 0x86a   :  { %v3237_v60 = vpop.f32.mrf.mxu2 }
 0x86b   :  { %v3274_v62 = vadd.f32 %v3237_v60, %v2710_v45  ;;  %v3250_v39 = vpop.f32.mrf.mxu3 }
 0x86c   :  { %v3226_v17 = vpop.f32.mrf.mxu1  ;;  %v3294_v11 = vadd.f32 %v5962_v56, %v3250_v39 }
 0x86d   :  { %v4874_v16 = vmul.f32 -1.442695, %v3274_v62 }
 0x86f   :  { %v5316_v48 = vpop.eup %5315  ;;  %5317 = vpow2.f32 %v4874_v16 }
 0x870   :  { %v3258_v32 = vadd.f32 1.0, %v5316_v48 }
 0x872   :  { %5319 = vrcp.f32 %v3258_v32  ;;  %v3239_v52 = vpop.f32.mrf.mxu2  ;;  %v3270_v12 = vand.u32 2147483648, %v3258_v32  ;;  %v3268_v9 = vand.u32 2147483647, %v3258_v32  ;;  %vm3264_vm9 = vweird.f32 %v3258_v32 }
 0x873   :  { %v3252_v38 = vpop.f32.mrf.mxu3 }
 0x874   :  { %v3271_v2 = vor.u32 1.1754944e-38, %v3270_v12  ;;  %vm3269_vm11 = vcmp.eq.f32.partialorder %v3268_v9, 8.507059e+37 }
 0x875   :  { %v5318_v35 = vpop.eup %5317 }
 0x876   :  { %v3278_v0 = vadd.f32 1.0, %v5318_v35 }
 0x878   :  { %v5320_v51 = vpop.eup %5319  ;;  %5321 = vrcp.f32 %v3278_v0  ;;  %v3290_v60 = vand.u32 2147483648, %v3278_v0  ;;  %v3288_v17 = vand.u32 2147483647, %v3278_v0  ;;  %vm3284_vm13 = vweird.f32 %v3278_v0 }
 0x879   :  { %v3260_v29 = vmul.f32 %v5320_v51, %v3258_v32  ;;  %vm3265_vm8 = vweird.f32 %v5320_v51 }
 0x87a   :  { %vm3266_vm10 = vmor %vm3264_vm9, %vm3265_vm8  ;;  %v3291_v32 = vor.u32 1.1754944e-38, %v3290_v60  ;;  %vm3289_vm15 = vcmp.eq.f32.partialorder %v3288_v17, 8.507059e+37 }
 0x87b   :  { %v3261_v19 = vsub.f32 1.0, %v3260_v29 }
 0x87d   :  { %v3262_v26 = vmul.f32 %v5320_v51, %v3261_v19 }
 0x87e   :  { %v5322_v8 = vpop.eup %5321 }
 0x87f   :  { %v3280_v46 = vmul.f32 %v5322_v8, %v3278_v0  ;;  %v3263_v4 = vadd.f32 %v5320_v51, %v3262_v26  ;;  %vm3285_vm12 = vweird.f32 %v5322_v8 }
 0x880   :  { %vm3286_vm14 = vmor %vm3284_vm13, %vm3285_vm12 }
 0x881   :  { %v3281_v6 = vsub.f32 1.0, %v3280_v46  ;;  %v3267_v10 = vsel %vm3266_vm10, %v5320_v51, %v3263_v4 }
 0x882   :  { %v3272_v18 = vsel %vm3269_vm11, %v3271_v2, %v3267_v10 }
 0x883   :  { %v3282_v45 = vmul.f32 %v5322_v8, %v3281_v6  ;;  %v3295_v62 = vmul.f32 %v3294_v11, %v3272_v18 }
 0x885   :  { %v3283_v16 = vadd.f32 %v5322_v8, %v3282_v45  ;;  %v3296_v48 = vadd.f32 %v3295_v62, %v2739_v23  ;;  %v2742_v45 = vadd.f32 %v6004_v58, %v5964_v3 }
 0x887   :  { %v3287_v52 = vsel %vm3286_vm14, %v5322_v8, %v3283_v16  ;;  %5323 = vtanh.f32 %v3296_v48 }
 0x888   :  { %v3292_v38 = vsel %vm3289_vm15, %v3291_v32, %v3287_v52 }
 0x889   :  { %v3298_v35 = vsub.f32 1.0, %v3292_v38  ;;  %v3300_v25 = vmul.f32 %v3292_v38, %v6062_v34 }
 0x88d   :  { %v5324_v39 = vpop.eup %5323 }
 0x88e   :  { %v3299_v51 = vmul.f32 %v5324_v39, %v3298_v35 }
 0x890   :  { %v6098_v29 = vadd.f32 %v3300_v25, %v3299_v51 }
 0x892   :  { %v3305_v19 = vpack.c.bf16 %v6098_v29, %v6098_v29 }
 0x894   :  { %3314 = vmatmul.bf16.vlgmr.msra.gmra.mxu0 %v3305_v19  ;;  %3327 = vmatmul.bf16.vlgmr.msrb.gmra.mxu1 %v3305_v19 }
 0x895   :  { %3340 = vmatmul.bf16.vlgmr.msra.gmra.mxu2 %v3305_v19  ;;  %3514 = vmatpush.bf16.msra.mxu0 %v5849_v43 }
 0x896   :  { %3579 = vmatpush.bf16.msrb.mxu1 %v5737_v57  ;;  %3592 = vmatpush.bf16.msra.mxu2 %v5782_v53  ;;  %v2684_v57 = vadd.f32 %v5951_v36, %v5941_v47 }
 0x899   :  { %3515 = vmatpush.bf16.msra.mxu0 %v5856_v59 }
 0x89a   :  { %3580 = vmatpush.bf16.msrb.mxu1 %v5740_v21  ;;  %3593 = vmatpush.bf16.msra.mxu2 %v5786_v28  ;;  %v2713_v21 = vadd.f32 %v6006_v55, %v5945_v63 }
 0x89d   :  { %3516 = vmatpush.bf16.msra.mxu0 %v5862_v27 }
 0x89e   :  { %3581 = vmatpush.bf16.msrb.mxu1 %v5743_v5  ;;  %3594 = vmatpush.bf16.msra.mxu2 %v5791_v40 }
 0x8a1   :  { %3517 = vmatpush.bf16.msra.mxu0 %v5866_v44 }
 0x8a2   :  { %3582 = vmatpush.bf16.msrb.mxu1 %v5749_v22  ;;  %3595 = vmatpush.bf16.msra.mxu2 %v5796_v54 }
 0x8a5   :  { %3518 = vmatpush.bf16.msra.mxu0 %v5872_v30 }
 0x8a6   :  { %3583 = vmatpush.bf16.msrb.mxu1 %v5752_v14  ;;  %3596 = vmatpush.bf16.msra.mxu2 %v5801_v49 }
 0x8a9   :  { %3519 = vmatpush.bf16.msra.mxu0 %v5885_v37 }
 0x8aa   :  { %3584 = vmatpush.bf16.msrb.mxu1 %v5757_v33  ;;  %3597 = vmatpush.bf16.msra.mxu2 %v5809_v61 }
 0x8ad   :  { %3520 = vmatpush.bf16.msra.mxu0 %v5896_v41 }
 0x8ae   :  { %3585 = vmatpush.bf16.msrb.mxu1 %v5762_v13  ;;  %3598 = vmatpush.bf16.msra.mxu2 %v5814_v50 }
 0x8b1   :  { %3521 = vmatpush.bf16.msra.mxu0 %v5901_v20 }
 0x8b2   :  { %3586 = vmatpush.bf16.msrb.mxu1 %v5766_v15  ;;  %3599 = vmatpush.bf16.msra.mxu2 %v5819_v1 }
 0x911   :  { %v3315_v5 = vpop.f32.mrf.mxu0  ;;  %v3328_v22 = vpop.f32.mrf.mxu1 }
 0x912   :  { %v3345_v14 = vadd.f32 %v3315_v5, %v2684_v57  ;;  %v3365_v33 = vadd.f32 %v3328_v22, %v2713_v21 }
 0x914   :  { %v4875_v53 = vmul.f32 -1.442695, %v3345_v14  ;;  %v4876_v13 = vmul.f32 -1.442695, %v3365_v33 }
 0x916   :  { %5325 = vpow2.f32 %v4875_v53 }
 0x917   :  { %5327 = vpow2.f32 %v4876_v13 }
 0x918   :  { %v3341_v28 = vpop.f32.mrf.mxu2 }
 0x919   :  { %v3317_v40 = vpop.f32.mrf.mxu0  ;;  %v3330_v54 = vpop.f32.mrf.mxu1  ;;  %v3385_v11 = vadd.f32 %v5962_v56, %v3341_v28 }
 0x91c   :  { %v5326_v15 = vpop.eup %5325 }
 0x91d   :  { %v5328_v49 = vpop.eup %5327  ;;  %v3349_v61 = vadd.f32 1.0, %v5326_v15 }
 0x91e   :  { %v3369_v50 = vadd.f32 1.0, %v5328_v49 }
 0x91f   :  { %5329 = vrcp.f32 %v3349_v61  ;;  %v3361_v9 = vand.u32 2147483648, %v3349_v61  ;;  %v3359_v46 = vand.u32 2147483647, %v3349_v61  ;;  %vm3355_vm1 = vweird.f32 %v3349_v61 }
 0x920   :  { %5331 = vrcp.f32 %v3369_v50  ;;  %v3343_v1 = vpop.f32.mrf.mxu2  ;;  %v3381_v60 = vand.u32 2147483648, %v3369_v50  ;;  %vm3375_vm5 = vweird.f32 %v3369_v50  ;;  %v3379_v17 = vand.u32 2147483647, %v3369_v50 }
 0x921   :  { %v3362_v6 = vor.u32 1.1754944e-38, %v3361_v9  ;;  %vm3360_vm3 = vcmp.eq.f32.partialorder %v3359_v46, 8.507059e+37 }
 0x922   :  { %v3382_v32 = vor.u32 1.1754944e-38, %v3381_v60  ;;  %vm3380_vm7 = vcmp.eq.f32.partialorder %v3379_v17, 8.507059e+37  ;;  %v6222_v17 = vld [vmem:[#allocation16_spill] sm:$0xff] }
 0x925   :  { %v5330_v36 = vpop.eup %5329 }
 0x926   :  { %v5332_v55 = vpop.eup %5331  ;;  %v3351_v34 = vmul.f32 %v5330_v36, %v3349_v61  ;;  %vm3356_vm0 = vweird.f32 %v5330_v36 }
 0x927   :  { %v3371_v0 = vmul.f32 %v5332_v55, %v3369_v50  ;;  %vm3357_vm2 = vmor %vm3355_vm1, %vm3356_vm0  ;;  %vm3376_vm4 = vweird.f32 %v5332_v55 }
 0x928   :  { %v3352_v12 = vsub.f32 1.0, %v3351_v34  ;;  %vm3377_vm6 = vmor %vm3375_vm5, %vm3376_vm4 }
 0x929   :  { %v3372_v26 = vsub.f32 1.0, %v3371_v0 }
 0x92a   :  { %v3353_v8 = vmul.f32 %v5330_v36, %v3352_v12  ;;  %v2744_v12 = vadd.f32 %v6008_v42, %v5964_v3 }
 0x92b   :  { %v3373_v4 = vmul.f32 %v5332_v55, %v3372_v26 }
 0x92c   :  { %v3354_v2 = vadd.f32 %v5330_v36, %v3353_v8 }
 0x92d   :  { %v3374_v23 = vadd.f32 %v5332_v55, %v3373_v4 }
 0x92e   :  { %v3358_v10 = vsel %vm3357_vm2, %v5330_v36, %v3354_v2 }
 0x92f   :  { %v3363_v18 = vsel %vm3360_vm3, %v3362_v6, %v3358_v10  ;;  %v3378_v48 = vsel %vm3377_vm6, %v5332_v55, %v3374_v23 }
 0x930   :  { %v3386_v62 = vmul.f32 %v3385_v11, %v3363_v18  ;;  %v3383_v52 = vsel %vm3380_vm7, %v3382_v32, %v3378_v48 }
 0x931   :  { %v3389_v38 = vsub.f32 1.0, %v3383_v52  ;;  %v3391_v51 = vmul.f32 %v3383_v52, %v6098_v29  ;;  %v2715_v29 = vadd.f32 %v6010_v31, %v5945_v63 }
 0x932   :  { %v3387_v16 = vadd.f32 %v3386_v62, %v2742_v45  ;;  %v2689_v62 = vadd.f32 %v5955_v7, %v5941_v47 }
 0x934   :  { %5333 = vtanh.f32 %v3387_v16  ;;  %v2718_v16 = vadd.f32 %v6222_v17, %v5945_v63 }
 0x93a   :  { %v5334_v35 = vpop.eup %5333 }
 0x93b   :  { %v3390_v39 = vmul.f32 %v5334_v35, %v3389_v38 }
 0x93d   :  { %v6134_v25 = vadd.f32 %v3391_v51, %v3390_v39 }
 0x93f   :  { %v3396_v58 = vpack.c.bf16 %v6134_v25, %v6134_v25 }
 0x941   :  { %3405 = vmatmul.bf16.vlgmr.msrb.gmra.mxu3 %v3396_v58  ;;  %3418 = vmatmul.bf16.vlgmr.msrb.gmra.mxu0 %v3396_v58 }
 0x942   :  { %3431 = vmatmul.bf16.vlgmr.msra.gmra.mxu1 %v3396_v58  ;;  %3605 = vmatpush.bf16.msrb.mxu3 %v5849_v43 }
 0x946   :  { %3606 = vmatpush.bf16.msrb.mxu3 %v5856_v59  ;;  %v2686_v59 = vadd.f32 %v5953_v24, %v5941_v47 }
 0x94a   :  { %3607 = vmatpush.bf16.msrb.mxu3 %v5862_v27 }
 0x94e   :  { %3608 = vmatpush.bf16.msrb.mxu3 %v5866_v44 }
 0x952   :  { %3609 = vmatpush.bf16.msrb.mxu3 %v5872_v30 }
 0x956   :  { %3610 = vmatpush.bf16.msrb.mxu3 %v5885_v37 }
 0x95a   :  { %3611 = vmatpush.bf16.msrb.mxu3 %v5896_v41 }
 0x95e   :  { %3612 = vmatpush.bf16.msrb.mxu3 %v5901_v20 }
 0x9be   :  { %v3419_v19 = vpop.f32.mrf.mxu0 }
 0x9bf   :  { %v3456_v57 = vadd.f32 %v3419_v19, %v2715_v29  ;;  %v3432_v43 = vpop.f32.mrf.mxu1 }
 0x9c0   :  { %v3476_v36 = vadd.f32 %v5962_v56, %v3432_v43 }
 0x9c1   :  { %v4878_v21 = vmul.f32 -1.442695, %v3456_v57 }
 0x9c3   :  { %5335 = vpow2.f32 %v4878_v21 }
 0x9c4   :  { %v3406_v27 = vpop.f32.mrf.mxu3 }
 0x9c5   :  { %v3436_v44 = vadd.f32 %v3406_v27, %v2686_v59 }
 0x9c6   :  { %v3421_v30 = vpop.f32.mrf.mxu0 }
 0x9c7   :  { %v4877_v5 = vmul.f32 -1.442695, %v3436_v44  ;;  %v3434_v37 = vpop.f32.mrf.mxu1 }
 0x9c9   :  { %v5336_v22 = vpop.eup %5335  ;;  %5337 = vpow2.f32 %v4877_v5 }
 0x9ca   :  { %v3460_v41 = vadd.f32 1.0, %v5336_v22 }
 0x9cc   :  { %v3408_v20 = vpop.f32.mrf.mxu3  ;;  %5339 = vrcp.f32 %v3460_v41  ;;  %v3472_v26 = vand.u32 2147483648, %v3460_v41  ;;  %vm3466_vm13 = vweird.f32 %v3460_v41  ;;  %v3470_v8 = vand.u32 2147483647, %v3460_v41 }
 0x9ce   :  { %v3473_v2 = vor.u32 1.1754944e-38, %v3472_v26  ;;  %vm3471_vm15 = vcmp.eq.f32.partialorder %v3470_v8, 8.507059e+37  ;;  %v5194_v26 = vld [vmem:[%s6214_s9 + $0x38] sm:$0xff]  ;;  %v5192_v8 = vld [vmem:[%s6214_s9 + $0x28] sm:$0xff] }
 0x9cf   :  { %v5338_v14 = vpop.eup %5337  ;;  %3735 = vmatpush.bf16.msrb.mxu0 %v5194_v26 }
 0x9d0   :  { %v3440_v31 = vadd.f32 1.0, %v5338_v14 }
 0x9d2   :  { %5341 = vrcp.f32 %v3440_v31  ;;  %v5340_v33 = vpop.eup %5339  ;;  %v3452_v54 = vand.u32 2147483648, %v3440_v31  ;;  %v3450_v49 = vand.u32 2147483647, %v3440_v31  ;;  %vm3446_vm9 = vweird.f32 %v3440_v31 }
 0x9d3   :  { %v3462_v53 = vmul.f32 %v5340_v33, %v3460_v41  ;;  %vm3467_vm12 = vweird.f32 %v5340_v33 }
 0x9d4   :  { %v3453_v1 = vor.u32 1.1754944e-38, %v3452_v54  ;;  %vm3451_vm11 = vcmp.eq.f32.partialorder %v3450_v49, 8.507059e+37  ;;  %vm3468_vm14 = vmor %vm3466_vm13, %vm3467_vm12 }
 0x9d5   :  { %v3463_v40 = vsub.f32 1.0, %v3462_v53 }
 0x9d7   :  { %v3464_v61 = vmul.f32 %v5340_v33, %v3463_v40 }
 0x9d8   :  { %v5342_v13 = vpop.eup %5341 }
 0x9d9   :  { %v3442_v28 = vmul.f32 %v5342_v13, %v3440_v31  ;;  %vm3447_vm8 = vweird.f32 %v5342_v13  ;;  %v3465_v34 = vadd.f32 %v5340_v33, %v3464_v61 }
 0x9da   :  { %vm3448_vm10 = vmor %vm3446_vm9, %vm3447_vm8 }
 0x9db   :  { %v3443_v24 = vsub.f32 1.0, %v3442_v28  ;;  %v3469_v4 = vsel %vm3468_vm14, %v5340_v33, %v3465_v34  ;;  %v6223_v28 = vld [vmem:[#allocation15_spill] sm:$0xff] }
 0x9dc   :  { %v3474_v6 = vsel %vm3471_vm15, %v3473_v2, %v3469_v4  ;;  %v2747_v40 = vadd.f32 %v6223_v28, %v5964_v3  ;;  %v5191_v2 = vld [vmem:[%s6214_s9 + $0x20] sm:$0xff] }
 0x9dd   :  { %v3444_v15 = vmul.f32 %v5342_v13, %v3443_v24  ;;  %v3480_v10 = vsub.f32 1.0, %v3474_v6  ;;  %v3482_v18 = vmul.f32 %v3474_v6, %v6134_v25 }
 0x9df   :  { %v3445_v50 = vadd.f32 %v5342_v13, %v3444_v15 }
 0x9e1   :  { %v3449_v55 = vsel %vm3448_vm10, %v5342_v13, %v3445_v50 }
 0x9e2   :  { %v3454_v0 = vsel %vm3451_vm11, %v3453_v1, %v3449_v55 }
 0x9e3   :  { %v3477_v9 = vmul.f32 %v3476_v36, %v3454_v0 }
 0x9e5   :  { %v3478_v46 = vadd.f32 %v3477_v9, %v2744_v12  ;;  %v5193_v9 = vld [vmem:[%s6214_s9 + $0x30] sm:$0xff] }
 0x9e6   :  { %3736 = vmatpush.bf16.msrb.mxu0 %v5193_v9 }
 0x9e7   :  { %5343 = vtanh.f32 %v3478_v46  ;;  %v6224_v46 = vld [vmem:[#allocation14_spill] sm:$0xff] }
 0x9e8   :  { %v2691_v4 = vadd.f32 %v6224_v46, %v5941_v47 }
 0x9ea   :  { %3737 = vmatpush.bf16.msrb.mxu0 %v5192_v8 }
 0x9ed   :  { %v5344_v11 = vpop.eup %5343 }
 0x9ee   :  { %v3481_v23 = vmul.f32 %v5344_v11, %v3480_v10  ;;  %3738 = vmatpush.bf16.msrb.mxu0 %v5191_v2 }
 0x9f0   :  { %v3483_v45 = vadd.f32 %v3482_v18, %v3481_v23  ;;  %v5190_v23 = vld [vmem:[%s6214_s9 + $0x18] sm:$0xff]  ;;  %v6225_v18 = vld [vmem:[#allocation18_spill] sm:$0xff] }
 0x9f2   :  { %v3487_v60 = vpack.c.bf16 %v3483_v45, %v3483_v45  ;;  %3739 = vmatpush.bf16.msrb.mxu0 %v5190_v23 }
 0x9f4   :  { %3496 = vmatmul.bf16.vlgmr.msrb.gmra.mxu2 %v3487_v60  ;;  %3509 = vmatmul.bf16.vlgmr.msra.gmra.mxu3 %v3487_v60 }
 0x9f5   :  { %3522 = vmatmul.bf16.vlgmr.msra.gmra.mxu0 %v3487_v60 }
 0xa72   :  { %v3523_v42 = vpop.f32.mrf.mxu0 }
 0xa73   :  { %v3567_v31 = vadd.f32 %v5962_v56, %v3523_v42 }
 0xa77   :  { %v3497_v48 = vpop.f32.mrf.mxu2  ;;  %v3510_v32 = vpop.f32.mrf.mxu3 }
 0xa78   :  { %v3527_v52 = vadd.f32 %v3497_v48, %v2689_v62  ;;  %v3547_v38 = vadd.f32 %v3510_v32, %v2718_v16  ;;  %v5189_v62 = vld [vmem:[%s6214_s9 + $0x10] sm:$0xff]  ;;  %v5188_v48 = vld [vmem:[%s6214_s9 + $0x8] sm:$0xff] }
 0xa79   :  { %3740 = vmatpush.bf16.msrb.mxu0 %v5189_v62 }
 0xa7a   :  { %v4879_v35 = vmul.f32 -1.442695, %v3527_v52  ;;  %v4880_v39 = vmul.f32 -1.442695, %v3547_v38  ;;  %v3525_v51 = vpop.f32.mrf.mxu0 }
 0xa7c   :  { %5345 = vpow2.f32 %v4879_v35 }
 0xa7d   :  { %5347 = vpow2.f32 %v4880_v39  ;;  %3741 = vmatpush.bf16.msrb.mxu0 %v5188_v48 }
 0xa7f   :  { %v3499_v25 = vpop.f32.mrf.mxu2  ;;  %v3512_v58 = vpop.f32.mrf.mxu3 }
 0xa82   :  { %v5346_v29 = vpop.eup %5345 }
 0xa83   :  { %v5348_v19 = vpop.eup %5347  ;;  %v3531_v57 = vadd.f32 1.0, %v5346_v29 }
 0xa84   :  { %v3551_v43 = vadd.f32 1.0, %v5348_v19 }
 0xa85   :  { %5349 = vrcp.f32 %v3531_v57  ;;  %v3543_v30 = vand.u32 2147483648, %v3531_v57  ;;  %v3541_v22 = vand.u32 2147483647, %v3531_v57  ;;  %vm3537_vm1 = vweird.f32 %v3531_v57 }
 0xa86   :  { %5351 = vrcp.f32 %v3551_v43  ;;  %v3563_v54 = vand.u32 2147483648, %v3551_v43  ;;  %vm3557_vm5 = vweird.f32 %v3551_v43  ;;  %v3561_v15 = vand.u32 2147483647, %v3551_v43 }
 0xa87   :  { %v3544_v14 = vor.u32 1.1754944e-38, %v3543_v30  ;;  %vm3542_vm3 = vcmp.eq.f32.partialorder %v3541_v22, 8.507059e+37  ;;  %v6226_v22 = vld [vmem:[#allocation17_spill] sm:$0xff] }
 0xa88   :  { %v3564_v50 = vor.u32 1.1754944e-38, %v3563_v54  ;;  %vm3562_vm7 = vcmp.eq.f32.partialorder %v3561_v15, 8.507059e+37 }
 0xa8b   :  { %v5350_v7 = vpop.eup %5349 }
 0xa8c   :  { %v5352_v21 = vpop.eup %5351  ;;  %v3533_v59 = vmul.f32 %v5350_v7, %v3531_v57  ;;  %vm3538_vm0 = vweird.f32 %v5350_v7 }
 0xa8d   :  { %v3553_v27 = vmul.f32 %v5352_v21, %v3551_v43  ;;  %vm3539_vm2 = vmor %vm3537_vm1, %vm3538_vm0  ;;  %vm3558_vm4 = vweird.f32 %v5352_v21 }
 0xa8e   :  { %v3534_v44 = vsub.f32 1.0, %v3533_v59  ;;  %vm3559_vm6 = vmor %vm3557_vm5, %vm3558_vm4 }
 0xa8f   :  { %v3554_v5 = vsub.f32 1.0, %v3553_v27 }
 0xa90   :  { %v3535_v37 = vmul.f32 %v5350_v7, %v3534_v44 }
 0xa91   :  { %v3555_v41 = vmul.f32 %v5352_v21, %v3554_v5  ;;  %v5367_v5 = vld [vmem:[%s6213_s8] ss:$0 sm:$0xff] }
 0xa92   :  { %v3536_v20 = vadd.f32 %v5350_v7, %v3535_v37 }
 0xa93   :  { %v3556_v13 = vadd.f32 %v5352_v21, %v3555_v41  ;;  %v2749_v41 = vadd.f32 %v6226_v22, %v5964_v3 }
 0xa94   :  { %v3540_v33 = vsel %vm3539_vm2, %v5350_v7, %v3536_v20 }
 0xa95   :  { %v3545_v53 = vsel %vm3542_vm3, %v3544_v14, %v3540_v33  ;;  %v3560_v61 = vsel %vm3559_vm6, %v5352_v21, %v3556_v13 }
 0xa96   :  { %v3568_v24 = vmul.f32 %v3567_v31, %v3545_v53  ;;  %v3565_v1 = vsel %vm3562_vm7, %v3564_v50, %v3560_v61 }
 0xa97   :  { %v3571_v56 = vsub.f32 1.0, %v3565_v1  ;;  %v3573_v34 = vmul.f32 %v3565_v1, %v3483_v45  ;;  %v2720_v45 = vadd.f32 %v6225_v18, %v5945_v63  ;;  %v5187_v63 = vld [vmem:[%s6214_s9] sm:$0xff] }
 0xa98   :  { %v3569_v49 = vadd.f32 %v3568_v24, %v2747_v40  ;;  %3742 = vmatpush.bf16.msrb.mxu0 %v5187_v63 }
 0xa9a   :  { %5353 = vtanh.f32 %v3569_v49 }
 0xaa0   :  { %v5354_v36 = vpop.eup %5353 }
 0xaa1   :  { %v3572_v55 = vmul.f32 %v5354_v36, %v3571_v56  ;;  %v5204_v56 = vld [vmem:[%s6215_s10] ss:$0 sm:$0xff] }
 0xaa3   :  { %v6161_v0 = vadd.f32 %v3573_v34, %v3572_v55 }
 0xaa5   :  { %v3578_v12 = vpack.c.bf16 %v6161_v0, %v6161_v0 }
 0xaa7   :  { %3587 = vmatmul.bf16.vlgmr.msrb.gmra.mxu1 %v3578_v12  ;;  %3600 = vmatmul.bf16.vlgmr.msra.gmra.mxu2 %v3578_v12 }
 0xaa8   :  { %3613 = vmatmul.bf16.vlgmr.msrb.gmra.mxu3 %v3578_v12 }
 0xb24   :  { %v3588_v6 = vpop.f32.mrf.mxu1 }
 0xb25   :  { %v3618_v10 = vadd.f32 %v3588_v6, %v2691_v4 }
 0xb27   :  { %v4881_v11 = vmul.f32 -1.442695, %v3618_v10 }
 0xb29   :  { %5355 = vpow2.f32 %v4881_v11 }
 0xb2a   :  { %v3601_v60 = vpop.f32.mrf.mxu2 }
 0xb2b   :  { %v3638_v42 = vadd.f32 %v3601_v60, %v2720_v45  ;;  %v3614_v47 = vpop.f32.mrf.mxu3 }
 0xb2c   :  { %v3590_v17 = vpop.f32.mrf.mxu1  ;;  %v3658_v37 = vadd.f32 %v5367_v5, %v3614_v47 }
 0xb2d   :  { %v4882_v16 = vmul.f32 -1.442695, %v3638_v42 }
 0xb2f   :  { %v5356_v32 = vpop.eup %5355  ;;  %5357 = vpow2.f32 %v4882_v16 }
 0xb30   :  { %v3622_v52 = vadd.f32 1.0, %v5356_v32 }
 0xb32   :  { %5359 = vrcp.f32 %v3622_v52  ;;  %v3603_v38 = vpop.f32.mrf.mxu2  ;;  %v3634_v19 = vand.u32 2147483648, %v3622_v52  ;;  %v3632_v43 = vand.u32 2147483647, %v3622_v52  ;;  %vm3628_vm9 = vweird.f32 %v3622_v52 }
 0xb33   :  { %v3616_v35 = vpop.f32.mrf.mxu3 }
 0xb34   :  { %v3635_v27 = vor.u32 1.1754944e-38, %v3634_v19  ;;  %vm3633_vm11 = vcmp.eq.f32.partialorder %v3632_v43, 8.507059e+37 }
 0xb35   :  { %v5358_v39 = vpop.eup %5357 }
 0xb36   :  { %v3642_v51 = vadd.f32 1.0, %v5358_v39 }
 0xb38   :  { %v5360_v25 = vpop.eup %5359  ;;  %5361 = vrcp.f32 %v3642_v51  ;;  %v3654_v31 = vand.u32 2147483648, %v3642_v51  ;;  %v3652_v53 = vand.u32 2147483647, %v3642_v51  ;;  %vm3648_vm13 = vweird.f32 %v3642_v51 }
 0xb39   :  { %v3624_v58 = vmul.f32 %v5360_v25, %v3622_v52  ;;  %vm3629_vm8 = vweird.f32 %v5360_v25 }
 0xb3a   :  { %vm3630_vm10 = vmor %vm3628_vm9, %vm3629_vm8  ;;  %v3655_v40 = vor.u32 1.1754944e-38, %v3654_v31  ;;  %vm3653_vm15 = vcmp.eq.f32.partialorder %v3652_v53, 8.507059e+37 }
 0xb3b   :  { %v3625_v29 = vsub.f32 1.0, %v3624_v58 }
 0xb3d   :  { %v3626_v57 = vmul.f32 %v5360_v25, %v3625_v29 }
 0xb3e   :  { %v5362_v7 = vpop.eup %5361 }
 0xb3f   :  { %v3644_v21 = vmul.f32 %v5362_v7, %v3642_v51  ;;  %v3627_v59 = vadd.f32 %v5360_v25, %v3626_v57  ;;  %vm3649_vm12 = vweird.f32 %v5362_v7 }
 0xb40   :  { %vm3650_vm14 = vmor %vm3648_vm13, %vm3649_vm12 }
 0xb41   :  { %v3645_v44 = vsub.f32 1.0, %v3644_v21  ;;  %v3631_v30 = vsel %vm3630_vm10, %v5360_v25, %v3627_v59 }
 0xb42   :  { %v3636_v20 = vsel %vm3633_vm11, %v3635_v27, %v3631_v30 }
 0xb43   :  { %v3646_v14 = vmul.f32 %v5362_v7, %v3645_v44  ;;  %v3659_v33 = vmul.f32 %v3658_v37, %v3636_v20 }
 0xb45   :  { %v3647_v13 = vadd.f32 %v5362_v7, %v3646_v14  ;;  %v3660_v28 = vadd.f32 %v3659_v33, %v2749_v41 }
 0xb47   :  { %v3651_v24 = vsel %vm3650_vm14, %v5362_v7, %v3647_v13  ;;  %5363 = vtanh.f32 %v3660_v28 }
 0xb48   :  { %v3656_v54 = vsel %vm3653_vm15, %v3655_v40, %v3651_v24 }
 0xb49   :  { %v3662_v15 = vsub.f32 1.0, %v3656_v54  ;;  %v3664_v3 = vmul.f32 %v3656_v54, %v6161_v0 }
 0xb4d   :  { %v5364_v49 = vpop.eup %5363 }
 0xb4e   :  { %v3663_v61 = vmul.f32 %v5364_v49, %v3662_v15 }
 0xb50   :  { %v3665_v50 = vadd.f32 %v3664_v3, %v3663_v61 }
 0xb52   :  { %v3666_v1 = vpack.c.bf16 %v3665_v50, %v3665_v50 }
 0xb54   :  { %3743 = vmatmul.bf16.vlgmr.msrb.gmra.mxu0 %v3666_v1 }
 0xbd1   :  { %v3744_v36 = vpop.f32.mrf.mxu0 }
 0xbd2   :  { %v3745_v55 = vadd.f32 %v5204_v56, %v3744_v36 }
 0xbd4   :  { %3748 = vst [vmem:[%s6216_s11] sm:$0xff] %v3745_v55 }
 0xbd9   :  { %v3746_v34 = vpop.f32.mrf.mxu0 }
 0xbda   :  { %3753 = vsyncpa [#allocation5], 1 }
 0xbdb   :  { %3754 = vsyncpa [#allocation7], 1 }
 0xbdc   :  { %3755 = vsyncpa [#allocation10], 1 }

</bundles_post_ra>
